<compile_context>
chip_gen: v7x
topology: tpu7x:2x2x1
jax: 0.10.0
libtpu: 0.0.40
codegen_flags: <defaults>
</compile_context>

<pallas_src>
import math

import jax
import jax.numpy as jnp
from jax.experimental import pallas as pl
from jax.experimental.pallas import tpu as pltpu


_MAX_LANES = 1024          # lane-dense last dim (multiple of 128)
_MAX_TILE_ROWS = 1024      # (1024, 1024) f32 tile = 4 MiB
_FAST_PATH_ELEMS = 32768   # < 256 KiB of interleaved f32 -> plain jnp path


def _modrelu_kernel(bias_ref, x_ref, o_ref):
    """Fused ModReLU on an interleaved (re, im, re, im, ...) f32 tile."""
    b = bias_ref[0, 0]                                  # scalar bias from SMEM
    x = x_ref[...]                                      # (tm, lanes), interleaved
    sq = x * x
    lanes = x.shape[-1]
    # Pair-sum |z|^2: even lane j pairs with lane j+1, odd lane j with j-1.
    # Both rolls land on the XLU slot (free under an HBM-bound roofline).
    fwd = pltpu.roll(sq, 1, 1)            # lane j <- sq[j-1]  (partner for odd lanes)
    bwd = pltpu.roll(sq, lanes - 1, 1)    # lane j <- sq[j+1]  (partner for even lanes)
    lane = jax.lax.broadcasted_iota(jnp.int32, x.shape, 1)
    partner = jnp.where((lane & 1) == 0, bwd, fwd)
    mag = jnp.sqrt(sq + partner)          # |z|, identical on both lanes of a pair
    # Exact divide (NOT pl.reciprocal(approx=True)): keeps 1e-5 parity with torch.
    inv = 1.0 / (mag + jnp.float32(1e-6))
    scale = jnp.maximum(mag + b, jnp.float32(0.0)) * inv   # relu(|z|+b) / (|z|+1e-6)
    o_ref[...] = x * scale                # scale is shared by the re & im lanes


def _modrelu_reference(z, bias):
    """Pure-JAX reference mirroring the PyTorch forward exactly."""
    abs_z = jnp.abs(z)
    phase = z / (abs_z + 1e-6)
    activated = jnp.maximum(abs_z + bias, 0.0)
    return (activated * phase).astype(jnp.complex64)


def _to_interleaved_f32(z):
    """complex64 -> flat f32 (re0, im0, re1, im1, ...)."""
    try:
        pairs = jax.lax.bitcast_convert_type(z, jnp.float32)      # (..., 2); free bitcast
    except (TypeError, ValueError, NotImplementedError):
        pairs = jnp.stack([jnp.real(z), jnp.imag(z)], axis=-1)    # one fused HBM pass
    return pairs.astype(jnp.float32).reshape(-1)


def _from_interleaved_f32(flat, shape):
    """flat f32 (re0, im0, ...) -> complex64 of `shape`."""
    pairs = flat.reshape(*shape, 2)
    try:
        return jax.lax.bitcast_convert_type(pairs, jnp.complex64)  # free bitcast
    except (TypeError, ValueError, NotImplementedError):
        return jax.lax.complex(pairs[..., 0], pairs[..., 1])       # one fused HBM pass


def _pick_lanes(m):
    """Largest multiple of 128 (<= 1024) dividing m, else 1024 (caller pads tail)."""
    for lanes in range(_MAX_LANES, 127, -128):
        if m % lanes == 0:
            return lanes
    return _MAX_LANES


def _pick_tile_rows(rows):
    """Row tile: big enough to amortize ~0.35us/step, small enough to keep
    >= 4 grid steps (v7x dual-TC + pipeline overlap) and <= 16 MiB VMEM."""
    tm = min(_MAX_TILE_ROWS, rows)
    if rows >= 4 * 64:  # only split once tiles can stay >= 64 rows (>= 256 KiB)
        tm = min(tm, ((pl.cdiv(rows, 4) + 7) // 8) * 8)
    if tm < rows:
        tm = max(8, (tm // 8) * 8)   # (8, 128) block-shape rule when not full-extent
    return tm


def modrelu(z: jax.Array, bias) -> jax.Array:
    """ModReLU forward. z: complex64 of any shape; bias: scalar. Returns complex64."""
    orig_shape = z.shape
    n = math.prod(orig_shape)
    z = jnp.asarray(z, jnp.complex64)
    bias_f = jnp.asarray(bias, jnp.float32)

    if n == 0:
        return jnp.zeros(orig_shape, jnp.complex64)
    if n < _FAST_PATH_ELEMS:
        # Pallas per-call + per-step overhead dominates tiny activations.
        return _modrelu_reference(z, bias_f)

    flat = _to_interleaved_f32(z)          # length m = 2n, interleaved re/im
    m = 2 * n
    lanes = _pick_lanes(m)
    rows = pl.cdiv(m, lanes)
    padded = rows * lanes
    if padded != m:
        # Ragged tail (< lanes elems). Zero padding is numerically safe:
        # re = im = 0 -> output 0 regardless of bias sign.
        # TODO(synk): mask the tail in-kernel instead of this extra pad pass.
        flat = jnp.pad(flat, (0, padded - m))
    slab = flat.reshape(rows, lanes)

    tm = _pick_tile_rows(rows)
    grid = (pl.cdiv(rows, tm),)
    bias_arr = bias_f.reshape(1, 1)

    slab_spec = pl.BlockSpec((tm, lanes), lambda i: (i, 0))
    out = pl.pallas_call(
        _modrelu_kernel,
        out_shape=jax.ShapeDtypeStruct((rows, lanes), jnp.float32),
        grid=grid,
        in_specs=[pl.BlockSpec(memory_space=pltpu.MemorySpace.SMEM), slab_spec],
        out_specs=slab_spec,
        compiler_params=pltpu.CompilerParams(
            dimension_semantics=("parallel",),   # independent row blocks
            vmem_limit_bytes=40 * 1024 * 1024,   # 16 MiB double-buffered tiles + headroom
        ),
    )(bias_arr, slab)

    out_flat = out.reshape(-1)
    if padded != m:
        out_flat = out_flat[:m]
    return _from_interleaved_f32(out_flat, orig_shape)


if __name__ == "__main__":
    key = jax.random.PRNGKey(0)
    bias = -0.5  # scalar learnable bias (typical ModReLU threshold)

    def make_z(k, shape):
        k_re, k_im = jax.random.split(k)
        return jax.lax.complex(
            jax.random.normal(k_re, shape, dtype=jnp.float32),
            jax.random.normal(k_im, shape, dtype=jnp.float32),
        ).astype(jnp.complex64)

    k_small, k_big = jax.random.split(key)

    # Spec-sized NCHW input (2, 4, 16, 16): small -> fused-XLA fast path.
    z_small = make_z(k_small, (2, 4, 16, 16))
    y_small = modrelu(z_small, bias)
    jax.block_until_ready(y_small)
    assert y_small.shape == z_small.shape and y_small.dtype == jnp.complex64
    assert jnp.allclose(y_small, _modrelu_reference(z_small, bias), atol=1e-5, rtol=1e-5)

    # Larger activation: exercises the Pallas kernel path (interleaved slab).
    z_big = make_z(k_big, (2, 4, 128, 128))
    y_big = modrelu(z_big, bias)
    jax.block_until_ready(y_big)
    assert y_big.shape == z_big.shape and y_big.dtype == jnp.complex64
    assert jnp.allclose(y_big, _modrelu_reference(z_big, bias), atol=1e-5, rtol=1e-5)

    print("KERNEL_OK")
</pallas_src>

<mosaic_0001>
module attributes {stable_mosaic.version = 11 : i64} {
  func.func @_modrelu_kernel(%arg0: i32, %arg1: memref<1x1xf32, #tpu.memory_space<smem>>, %arg2: memref<64x1024xf32, #tpu.memory_space<vmem>>, %arg3: memref<64x1024xf32, #tpu.memory_space<vmem>>) attributes {dimension_semantics = [#tpu.dimension_semantics<parallel>], iteration_bounds = array<i64: 4>, scalar_prefetch = 0 : i64, scratch_operands = 0 : i64, tpu.core_type = #tpu.core_type<tc>, window_params = [{transform_indices = @transform_0, window_bounds = array<i64: 1, 1>}, {transform_indices = @transform_1, window_bounds = array<i64: 64, 1024>}, {transform_indices = @transform_2, window_bounds = array<i64: 64, 1024>}]} {
    %c0 = arith.constant 0 : index
    %c0_0 = arith.constant 0 : index
    %0 = memref.load %arg1[%c0, %c0_0] : memref<1x1xf32, #tpu.memory_space<smem>>
    %c0_1 = arith.constant 0 : index
    %c0_2 = arith.constant 0 : index
    %1 = vector.load %arg2[%c0_1, %c0_2] : memref<64x1024xf32, #tpu.memory_space<vmem>>, vector<64x1024xf32>
    %2 = arith.mulf %1, %1 : vector<64x1024xf32>
    %c1_i32 = arith.constant 1 : i32
    %3 = tpu.dynamic_rotate %2 by %c1_i32 dim 1 : vector<64x1024xf32>, i32 -> vector<64x1024xf32>
    %c1023_i32 = arith.constant 1023 : i32
    %4 = tpu.dynamic_rotate %2 by %c1023_i32 dim 1 : vector<64x1024xf32>, i32 -> vector<64x1024xf32>
    %5 = tpu.iota {dimensions = array<i32: 1>} : vector<64x1024xi32>
    %c1_i32_3 = arith.constant 1 : i32
    %6 = vector.broadcast %c1_i32_3 : i32 to vector<64x1024xi32>
    %7 = arith.andi %5, %6 : vector<64x1024xi32>
    %c0_i32 = arith.constant 0 : i32
    %8 = vector.broadcast %c0_i32 : i32 to vector<64x1024xi32>
    %9 = arith.cmpi eq, %7, %8 : vector<64x1024xi32>
    %10 = arith.select %9, %4, %3 : vector<64x1024xi1>, vector<64x1024xf32>
    %11 = arith.addf %2, %10 : vector<64x1024xf32>
    %12 = math.sqrt %11 : vector<64x1024xf32>
    %cst = arith.constant 9.99999997E-7 : f32
    %13 = vector.broadcast %cst : f32 to vector<64x1024xf32>
    %14 = arith.addf %12, %13 : vector<64x1024xf32>
    %cst_4 = arith.constant 1.000000e+00 : f32
    %15 = vector.broadcast %cst_4 : f32 to vector<64x1024xf32>
    %16 = arith.divf %15, %14 : vector<64x1024xf32>
    %17 = vector.broadcast %0 : f32 to vector<64x1024xf32>
    %18 = arith.addf %12, %17 : vector<64x1024xf32>
    %cst_5 = arith.constant 0.000000e+00 : f32
    %19 = vector.broadcast %cst_5 : f32 to vector<64x1024xf32>
    %20 = arith.maximumf %18, %19 : vector<64x1024xf32>
    %21 = arith.mulf %20, %16 : vector<64x1024xf32>
    %22 = arith.mulf %1, %21 : vector<64x1024xf32>
    %c0_6 = arith.constant 0 : index
    %c0_7 = arith.constant 0 : index
    %23 = vector.load %arg3[%c0_6, %c0_7] : memref<64x1024xf32, #tpu.memory_space<vmem>>, vector<64x1024xf32>
    tpu.vector_store %arg3[%c0_6, %c0_7], %22 {strides = array<i32>} : memref<64x1024xf32, #tpu.memory_space<vmem>>, vector<64x1024xf32>,
    return
  }
  func.func @transform_0(%arg0: i32) -> (i32, i32) {
    %c0_i32 = arith.constant 0 : i32
    %c0_i32_0 = arith.constant 0 : i32
    %c0_i32_1 = arith.constant 0 : i32
    return %c0_i32, %c0_i32_0 : i32, i32
  }
  func.func @transform_1(%arg0: i32) -> (i32, i32) {
    %c0_i32 = arith.constant 0 : i32
    %c0_i32_0 = arith.constant 0 : i32
    return %arg0, %c0_i32 : i32, i32
  }
  func.func @transform_2(%arg0: i32) -> (i32, i32) {
    %c0_i32 = arith.constant 0 : i32
    %c0_i32_0 = arith.constant 0 : i32
    return %arg0, %c0_i32 : i32, i32
  }
}

</mosaic_0001>

<bundles_post_ra>
// kernel: tpu_custom_call.1
= control target key start
LH: loop header
LB: loop body
LE: loop exit
PB: predicated region body
PF: predicated region fallthrough
CT: control target
= control target key end

     0   :  { %s5030_s0 = inlined_call_operand.<no memory space> [shape: f32[1,1], index: 0, kind: input, shape index: {}]   ;;  %s5031_s1 = inlined_call_operand.hbm [shape: f32[256,1024], index: 1, kind: input, shape index: {}]   ;;  %s5032_s2 = inlined_call_operand.hbm [shape: f32[256,1024], index: 2, kind: output, shape index: {}]  }
   0x1   :  { %7 = sst [smem:[#allocation2]] %s5030_s0 }
   0x2   :  { %8 = vsyncpa [#allocation4], 0 }
   0x3   :  { %10 = vsyncpa [#allocation4 + $0x1], 0 }
   0x4   :  { %11 = vsyncpa [#allocation5], 0 }
   0x5   :  { %13 = vsyncpa [#allocation5 + $0x1], 0  ;;  %s2399_s11 = smov 0   ;;  %s2401_s12 = smov 0  }
   0x6   :  { %s2403_s13 = smov 0   ;;  %s2405_s14 = smov 0  }
   0x7 LB: > { %s2420_s0 = sadd.s32 4294967295, %s2371_s14   ;;  %s1883_s15 = sadd.s32 4294967294, %s2371_s14   ;;  %s2371_s14 = sphi %s2405_s14, %s5376_s14   ;;  %s2367_s13 = sphi %s2403_s13, %s5375_s13   ;;  %s2363_s12 = sphi %s2401_s12, %s5374_s12   ;;  %s2359_s11 = sphi %s2399_s11, %s5373_s11  }
   0x8   : > { %s2424_s16 = sadd.s32 1, %s2371_s14   ;;  %s47_s17 = sadd.s32 1, %s2367_s13 }
   0x9   : > { %s44_s18 = ssub.s32 %s2371_s14, %s2424_s16  ;;  %p54_p0 = scmp.ne.s32.totalorder %s2367_s13, %s2363_s12 }
   0xa   : > { %p45_p1 = scmp.eq.s32.totalorder %s44_s18, 0  ;;  %p55_p2 = scmp.eq.s32.totalorder %s2371_s14, 0 }
   0xb   : > { %p60_p3 = scmp.ne.s32.totalorder %s2363_s12, %s2359_s11  ;;  %p61_p4 = scmp.eq.s32.totalorder %s2420_s0, 0 }
   0xc   : > { %s2436_s19 = scalar_select %p45_p1, %s2367_s13, %s47_s17  }
   0xd   : > { %p2438_p5 = por %p55_p2, %p54_p0  ;;  %p2442_p6 = por %p61_p4, %p60_p3 }
   0xe   : > { %p84_p7 = scmp.eq.s32.totalorder %s2420_s0, 3  ;;  %p90_p8 = scmp.eq.s32.totalorder %s1883_s15, 3 }
   0xf   : > { %p1915_p9 = scmp.lt.s32.totalorder %s2371_s14, 4  ;;  %s113_s24 = sand.u32 1, %s2367_s13  }
  0x10   : > { %p2448_p10 = por %p84_p7, %p54_p0  ;;  %p2452_p11 = por %p90_p8, %p60_p3 }
  0x11   : > { %s1900_s25 = sshll.u32 %s2371_s14, 13  ;;  %s1886_s26 = sshll.u32 %s113_s24, 9 }
  0x12   : > { %s5120_s22 = scalar_select %p2448_p10, 1, 0 }
  0x13   : > { %s5121_s23 = scalar_select %p2452_p11, 1, 0 }
  0x14   : > { %s2461_s29 = scalar_lea.hbm %s5031_s1, %s1900_s25  ;;  %s117_s30 = scalar_lea.vmem [#allocation3], %s1886_s26 }
  0x15   : > { %s125_s3 = sshll.u32 %s117_s30, 4  ;;  %p2465_p12 = pnand %p1915_p9, %p2438_p5  ;;  %s2469_s3 = int_to_ptr.vmem [resolvable:$true] %s125_s3 }
  0x16   : > { %s2471_s5 = scalar_lea.sflag [#allocation4], %s113_s24  ;;  %s2275_s6 = scalar_lea.hbm %s2461_s29, 8192 }
  0x17   : > { %p2276_p13 = scmp.ne.s32.totalorder %s2461_s29, %s2275_s6  ;;  %p2277_p0 = pneg %p2465_p12 }
  0x18   : > { %s2280_s9 = scalar_lea.hbm %s5031_s1, 32768  ;;  %p2281_p3 = scmp.lt.u32.totalorder %s2461_s29, %s5031_s1 }
  0x19   : > { %p2278_p1 = pnand %p2277_p0, %p2276_p13  ;;  %p2282_p4 = scmp.lt.u32.totalorder %s2280_s9, %s2275_s6 }
  0x1a   : > { %p2284_p7 = scmp.lt.u32.totalorder %s2275_s6, %s2461_s29 }
  0x1b   : > { %p2279_p2 = pneg %p2278_p1  ;;  %p2283_p5 = por %p2282_p4, %p2281_p3 }
  0x1d   : > { %p2285_p8 = por %p2284_p7, %p2283_p5 }
  0x1f   : > { %p2286_p9 = pnand %p2285_p8, %p2279_p2 }
  0x21   : > { %2289 = shalt.err (!%p2286_p9)
}
  0x22   : > { %s2290_s17 = scalar_lea.vmem %s2469_s3, 8192  ;;  %s2373_s18 = smov [#allocation3]  }
  0x23   : > { %p2291_p13 = scmp.ne.s32.totalorder %s2469_s3, %s2290_s17  ;;  %s2295_s20 = sshll.u32 %s2373_s18, 4  ;;  %s2296_s20 = int_to_ptr.vmem [resolvable:$false] %s2295_s20 }
  0x24   : > { %s2297_s24 = scalar_lea.vmem %s2296_s20, 16384  ;;  %p2298_p10 = scmp.lt.s32.totalorder %s2469_s3, %s2296_s20 }
  0x25   : > { %p2293_p1 = pnand %p2291_p13, %p2277_p0  ;;  %p2299_p3 = scmp.lt.s32.totalorder %s2297_s24, %s2290_s17 }
  0x27   : > { %p2294_p11 = pneg %p2293_p1  ;;  %p2300_p4 = por %p2299_p3, %p2298_p10 }
  0x29   : > { %p2301_p5 = pnand %p2300_p4, %p2294_p11 }
  0x2b   : > { %2304 = shalt.err (!%p2301_p5)
}
  0x2c   : > { %s2374_s25 = smov 1024   ;;  %s2375_s26 = smov 64  }
  0x2d   : > { %1910 = dma.hbm_to_vmem [thread:$0]  (!%p2465_p12), %s2461_s29, 8192, %s2469_s3, %s2471_s5, %s2374_s25, %s2374_s25, %s2375_s26  }
  0x2e   : > { %p1890_p0 = scmp.ge.s32.totalorder %s2371_s14, 1  ;;  %p133_p2 = scmp.lt.s32.totalorder %s2371_s14, 5 }
  0x30   : > { %p134_p7 = pnand %p1890_p0, %p133_p2 }
  0x32   : > { %137 = sbr.rel (%p134_p7) target bundleno = 623 (0x26f), region = 28 }
  0x39   : > { %s2502_s27 = sand.u32 1, %s2363_s12  }
  0x3a   : > { %s1891_s28 = sshll.u32 %s2502_s27, 9  ;;  %s140_s30 = scalar_lea.sflag [#allocation4], %s2502_s27 }
  0x3b   : > { %s2508_s6 = scalar_lea.vmem [#allocation3], %s1891_s28 }
  0x3c   : > { %2350 = dma.done.wait (%p2442_p6), %s140_s30, 8192  }
  0x3d   : > { %2352 = vsyncadd (%p2442_p6), %s140_s30, 4294959104  ;;  %v183_v0 = vld [vmem:[%s2508_s6 + $0x80] sm:$0xff]  ;;  %s2376_s29 = smov 1   ;;  %v176_v16 = vld [vmem:[%s2508_s6 + $0x48] sm:$0xff]  ;;  %s2377_s21 = smov 127  }
  0x3e   : > { %v167_v1 = vld [vmem:[%s2508_s6] sm:$0xff]  ;;  %v2517_v3 = vmul.f32 %v183_v0, %v183_v0  ;;  %v168_v17 = vld [vmem:[%s2508_s6 + $0x8] sm:$0xff]  ;;  %v2556_v18 = vmul.f32 %v176_v16, %v176_v16  ;;  %v177_v32 = vld [vmem:[%s2508_s6 + $0x50] sm:$0xff]  ;;  %s166_s3 = sld [smem:[#allocation2]]  ;;  %s3642_s4 = scalar_lea.vmem [#allocation6], %s1891_s28 }
  0x3f   : > { %v191_v2 = vld [vmem:[%s2508_s6 + $0xc0] sm:$0xff]  ;;  %v2519_v4 = vmul.f32 %v167_v1, %v167_v1  ;;  %v2558_v19 = vmul.f32 %v168_v17, %v168_v17  ;;  %v192_v20 = vld [vmem:[%s2508_s6 + $0xc8] sm:$0xff]  ;;  %v169_v33 = vld [vmem:[%s2508_s6 + $0x10] sm:$0xff]  ;;  %v2596_v34 = vmul.f32 %v177_v32, %v177_v32  ;;  %s1902_s5 = sshll.u32 %s2420_s0, 13  ;;  %s1810_s7 = sshll.u32 %s3642_s4, 4  ;;  %s4985_s7 = int_to_ptr.vmem [resolvable:$true] %s1810_s7 }
  0x40   : > { %5123 = vst [vmem:[#allocation9_spill] sm:$0xff] %v2517_v3  ;;  %v175_v5 = vld [vmem:[%s2508_s6 + $0x40] sm:$0xff]  ;;  %299 = vrot.lane.b32.xlu1 %v2517_v3, %s2376_s29  ;;  %v2526_v6 = vmul.f32 %v191_v2, %v191_v2  ;;  %5131 = vst [vmem:[#allocation17_spill] sm:$0xff] %v2556_v18  ;;  %v184_v21 = vld [vmem:[%s2508_s6 + $0x88] sm:$0xff]  ;;  %v2566_v22 = vmul.f32 %v192_v20, %v192_v20  ;;  %v2598_v35 = vmul.f32 %v169_v33, %v169_v33  ;;  %s4983_s10 = scalar_lea.hbm %s5032_s2, %s1902_s5  ;;  %s1796_s15 = scalar_lea.sflag [#allocation5], %s2502_s27 }
  0x41   : > { %5124 = vst [vmem:[#allocation10_spill] sm:$0xff] %v2519_v4  ;;  %295 = vrot.lane.b32.xlu0 %v2519_v4, %s2376_s29  ;;  %v2528_v7 = vmul.f32 %v175_v5, %v175_v5  ;;  %v207_v8 = vld [vmem:[%s2508_s6 + $0x140] sm:$0xff]  ;;  %5132 = vst [vmem:[#allocation18_spill] sm:$0xff] %v2558_v19  ;;  %v2568_v23 = vmul.f32 %v184_v21, %v184_v21  ;;  %v208_v24 = vld [vmem:[%s2508_s6 + $0x148] sm:$0xff]  ;;  %s2305_s17 = scalar_lea.vmem %s4985_s7, 8192  ;;  %p5371_p10 = scmp.ne.s32.totalorder %s5120_s22, 0 }
  0x42   : > { %5125 = vst [vmem:[#allocation11_spill] sm:$0xff] %v2526_v6  ;;  %v199_v9 = vld [vmem:[%s2508_s6 + $0x100] sm:$0xff]  ;;  %v2536_v10 = vmul.f32 %v207_v8, %v207_v8  ;;  %5133 = vst [vmem:[#allocation19_spill] sm:$0xff] %v2566_v22  ;;  %v200_v25 = vld [vmem:[%s2508_s6 + $0x108] sm:$0xff]  ;;  %v2576_v26 = vmul.f32 %v208_v24, %v208_v24  ;;  %p2306_p6 = scmp.ne.s32.totalorder %s4985_s7, %s2305_s17  ;;  %s2378_s0 = smov [#allocation6]  }
  0x43   : > { %5126 = vst [vmem:[#allocation12_spill] sm:$0xff] %v2528_v7  ;;  %v2538_v11 = vmul.f32 %v199_v9, %v199_v9  ;;  %v223_v12 = vld [vmem:[%s2508_s6 + $0x1c0] sm:$0xff]  ;;  %5134 = vst [vmem:[#allocation20_spill] sm:$0xff] %v2568_v23  ;;  %v2578_v27 = vmul.f32 %v200_v25, %v200_v25  ;;  %v224_v28 = vld [vmem:[%s2508_s6 + $0x1c8] sm:$0xff]  ;;  %s2309_s18 = sshll.u32 %s2378_s0, 4  ;;  %s2310_s18 = int_to_ptr.vmem [resolvable:$false] %s2309_s18 }
  0x44   : > { %301 = vrot.lane.b32.xlu1 %v2526_v6, %s2376_s29  ;;  %5127 = vst [vmem:[#allocation13_spill] sm:$0xff] %v2536_v10  ;;  %v215_v13 = vld [vmem:[%s2508_s6 + $0x180] sm:$0xff]  ;;  %v2546_v14 = vmul.f32 %v223_v12, %v223_v12  ;;  %5135 = vst [vmem:[#allocation21_spill] sm:$0xff] %v2576_v26  ;;  %v216_v29 = vld [vmem:[%s2508_s6 + $0x188] sm:$0xff]  ;;  %v2586_v30 = vmul.f32 %v224_v28, %v224_v28  ;;  %p2307_p11 = pnand %p2306_p6, %p5371_p10  ;;  %s2311_s20 = scalar_lea.vmem %s2310_s18, 16384 }
  0x45   : > { %297 = vrot.lane.b32.xlu0 %v2528_v7, %s2376_s29  ;;  %5128 = vst [vmem:[#allocation14_spill] sm:$0xff] %v2538_v11  ;;  %v2548_v15 = vmul.f32 %v215_v13, %v215_v13  ;;  %5136 = vst [vmem:[#allocation22_spill] sm:$0xff] %v2578_v27  ;;  %v2588_v31 = vmul.f32 %v216_v29, %v216_v29  ;;  %v193_v36 = vld [vmem:[%s2508_s6 + $0xd0] sm:$0xff]  ;;  %v178_v48 = vld [vmem:[%s2508_s6 + $0x58] sm:$0xff]  ;;  %p2312_p8 = scmp.lt.s32.totalorder %s4985_s7, %s2310_s18  ;;  %p2313_p9 = scmp.lt.s32.totalorder %s2311_s20, %s2305_s17 }
  0x46   : > { %5129 = vst [vmem:[#allocation15_spill] sm:$0xff] %v2546_v14  ;;  %5137 = vst [vmem:[#allocation23_spill] sm:$0xff] %v2586_v30  ;;  %v185_v37 = vld [vmem:[%s2508_s6 + $0x90] sm:$0xff]  ;;  %v2606_v38 = vmul.f32 %v193_v36, %v193_v36  ;;  %v170_v49 = vld [vmem:[%s2508_s6 + $0x18] sm:$0xff]  ;;  %v2636_v50 = vmul.f32 %v178_v48, %v178_v48  ;;  %p2308_p12 = pneg %p2307_p11 }
  0x47   : > { %5130 = vst [vmem:[#allocation16_spill] sm:$0xff] %v2548_v15  ;;  %5138 = vst [vmem:[#allocation24_spill] sm:$0xff] %v2588_v31  ;;  %v2608_v39 = vmul.f32 %v185_v37, %v185_v37  ;;  %v209_v40 = vld [vmem:[%s2508_s6 + $0x150] sm:$0xff]  ;;  %v2638_v51 = vmul.f32 %v170_v49, %v170_v49  ;;  %v194_v52 = vld [vmem:[%s2508_s6 + $0xd8] sm:$0xff]  ;;  %p2314_p13 = por %p2313_p9, %p2312_p8 }
  0x48   : > { %305 = vrot.lane.b32.xlu1 %v2536_v10, %s2376_s29  ;;  %5139 = vst [vmem:[#allocation25_spill] sm:$0xff] %v2596_v34  ;;  %5140 = vst [vmem:[#allocation26_spill] sm:$0xff] %v2598_v35  ;;  %v201_v41 = vld [vmem:[%s2508_s6 + $0x110] sm:$0xff]  ;;  %v2616_v42 = vmul.f32 %v209_v40, %v209_v40  ;;  %v186_v53 = vld [vmem:[%s2508_s6 + $0x98] sm:$0xff]  ;;  %v2646_v54 = vmul.f32 %v194_v52, %v194_v52 }
  0x49   : > { %303 = vrot.lane.b32.xlu0 %v2538_v11, %s2376_s29  ;;  %5141 = vst [vmem:[#allocation27_spill] sm:$0xff] %v2606_v38  ;;  %5142 = vst [vmem:[#allocation28_spill] sm:$0xff] %v2608_v39  ;;  %v2618_v43 = vmul.f32 %v201_v41, %v201_v41  ;;  %v225_v44 = vld [vmem:[%s2508_s6 + $0x1d0] sm:$0xff]  ;;  %v2648_v55 = vmul.f32 %v186_v53, %v186_v53  ;;  %v210_v56 = vld [vmem:[%s2508_s6 + $0x158] sm:$0xff]  ;;  %p2315_p1 = pnand %p2314_p13, %p2308_p12 }
  0x4a   : > { %5143 = vst [vmem:[#allocation29_spill] sm:$0xff] %v2616_v42  ;;  %v217_v45 = vld [vmem:[%s2508_s6 + $0x190] sm:$0xff]  ;;  %v2626_v46 = vmul.f32 %v225_v44, %v225_v44  ;;  %5147 = vst [vmem:[#allocation33_spill] sm:$0xff] %v2636_v50  ;;  %v202_v57 = vld [vmem:[%s2508_s6 + $0x118] sm:$0xff]  ;;  %v2656_v58 = vmul.f32 %v210_v56, %v210_v56 }
  0x4b   : > { %5144 = vst [vmem:[#allocation30_spill] sm:$0xff] %v2618_v43  ;;  %v2628_v47 = vmul.f32 %v217_v45, %v217_v45  ;;  %5148 = vst [vmem:[#allocation34_spill] sm:$0xff] %v2638_v51  ;;  %v2658_v59 = vmul.f32 %v202_v57, %v202_v57  ;;  %v226_v60 = vld [vmem:[%s2508_s6 + $0x1d8] sm:$0xff]  ;;  %v179_v0 = vld [vmem:[%s2508_s6 + $0x60] sm:$0xff] }
  0x4c   : > { %309 = vrot.lane.b32.xlu1 %v2546_v14, %s2376_s29  ;;  %5145 = vst [vmem:[#allocation31_spill] sm:$0xff] %v2626_v46  ;;  %5149 = vst [vmem:[#allocation35_spill] sm:$0xff] %v2646_v54  ;;  %v218_v61 = vld [vmem:[%s2508_s6 + $0x198] sm:$0xff]  ;;  %v2666_v62 = vmul.f32 %v226_v60, %v226_v60  ;;  %v171_v1 = vld [vmem:[%s2508_s6 + $0x20] sm:$0xff]  ;;  %v2676_v2 = vmul.f32 %v179_v0, %v179_v0 }
  0x4d   : > { %307 = vrot.lane.b32.xlu0 %v2548_v15, %s2376_s29  ;;  %5146 = vst [vmem:[#allocation32_spill] sm:$0xff] %v2628_v47  ;;  %5150 = vst [vmem:[#allocation36_spill] sm:$0xff] %v2648_v55  ;;  %v2668_v63 = vmul.f32 %v218_v61, %v218_v61  ;;  %v2678_v5 = vmul.f32 %v171_v1, %v171_v1  ;;  %v195_v8 = vld [vmem:[%s2508_s6 + $0xe0] sm:$0xff]  ;;  %v180_v32 = vld [vmem:[%s2508_s6 + $0x68] sm:$0xff] }
  0x4e   : > { %5151 = vst [vmem:[#allocation37_spill] sm:$0xff] %v2656_v58  ;;  %5152 = vst [vmem:[#allocation38_spill] sm:$0xff] %v2658_v59  ;;  %v187_v9 = vld [vmem:[%s2508_s6 + $0xa0] sm:$0xff]  ;;  %v2686_v12 = vmul.f32 %v195_v8, %v195_v8  ;;  %v172_v33 = vld [vmem:[%s2508_s6 + $0x28] sm:$0xff]  ;;  %v2716_v36 = vmul.f32 %v180_v32, %v180_v32 }
  0x4f   : > { %5153 = vst [vmem:[#allocation39_spill] sm:$0xff] %v2666_v62  ;;  %5154 = vst [vmem:[#allocation40_spill] sm:$0xff] %v2668_v63  ;;  %v2688_v13 = vmul.f32 %v187_v9, %v187_v9  ;;  %v211_v16 = vld [vmem:[%s2508_s6 + $0x160] sm:$0xff]  ;;  %v2718_v37 = vmul.f32 %v172_v33, %v172_v33  ;;  %v196_v40 = vld [vmem:[%s2508_s6 + $0xe8] sm:$0xff] }
  0x50   : > { %313 = vrot.lane.b32.xlu1 %v2556_v18, %s2376_s29  ;;  %5155 = vst [vmem:[#allocation41_spill] sm:$0xff] %v2676_v2  ;;  %5156 = vst [vmem:[#allocation42_spill] sm:$0xff] %v2678_v5  ;;  %v203_v17 = vld [vmem:[%s2508_s6 + $0x120] sm:$0xff]  ;;  %v2696_v20 = vmul.f32 %v211_v16, %v211_v16  ;;  %v188_v41 = vld [vmem:[%s2508_s6 + $0xa8] sm:$0xff]  ;;  %v2726_v44 = vmul.f32 %v196_v40, %v196_v40 }
  0x51   : > { %311 = vrot.lane.b32.xlu0 %v2558_v19, %s2376_s29  ;;  %5157 = vst [vmem:[#allocation43_spill] sm:$0xff] %v2686_v12  ;;  %5158 = vst [vmem:[#allocation44_spill] sm:$0xff] %v2688_v13  ;;  %v2698_v21 = vmul.f32 %v203_v17, %v203_v17  ;;  %v227_v24 = vld [vmem:[%s2508_s6 + $0x1e0] sm:$0xff]  ;;  %v2728_v45 = vmul.f32 %v188_v41, %v188_v41  ;;  %v212_v48 = vld [vmem:[%s2508_s6 + $0x168] sm:$0xff] }
  0x52   : > { %5159 = vst [vmem:[#allocation45_spill] sm:$0xff] %v2696_v20  ;;  %v219_v25 = vld [vmem:[%s2508_s6 + $0x1a0] sm:$0xff]  ;;  %v2706_v28 = vmul.f32 %v227_v24, %v227_v24  ;;  %5163 = vst [vmem:[#allocation49_spill] sm:$0xff] %v2716_v36  ;;  %v204_v49 = vld [vmem:[%s2508_s6 + $0x128] sm:$0xff]  ;;  %v2736_v52 = vmul.f32 %v212_v48, %v212_v48 }
  0x53   : > { %5160 = vst [vmem:[#allocation46_spill] sm:$0xff] %v2698_v21  ;;  %v2708_v29 = vmul.f32 %v219_v25, %v219_v25  ;;  %5164 = vst [vmem:[#allocation50_spill] sm:$0xff] %v2718_v37  ;;  %v2738_v53 = vmul.f32 %v204_v49, %v204_v49  ;;  %v228_v56 = vld [vmem:[%s2508_s6 + $0x1e8] sm:$0xff]  ;;  %v181_v0 = vld [vmem:[%s2508_s6 + $0x70] sm:$0xff] }
  0x54   : > { %317 = vrot.lane.b32.xlu1 %v2566_v22, %s2376_s29  ;;  %5161 = vst [vmem:[#allocation47_spill] sm:$0xff] %v2706_v28  ;;  %5165 = vst [vmem:[#allocation51_spill] sm:$0xff] %v2726_v44  ;;  %v220_v57 = vld [vmem:[%s2508_s6 + $0x1a8] sm:$0xff]  ;;  %v2746_v60 = vmul.f32 %v228_v56, %v228_v56  ;;  %v173_v1 = vld [vmem:[%s2508_s6 + $0x30] sm:$0xff]  ;;  %v2756_v8 = vmul.f32 %v181_v0, %v181_v0 }
  0x55   : > { %315 = vrot.lane.b32.xlu0 %v2568_v23, %s2376_s29  ;;  %5162 = vst [vmem:[#allocation48_spill] sm:$0xff] %v2708_v29  ;;  %5166 = vst [vmem:[#allocation52_spill] sm:$0xff] %v2728_v45  ;;  %v2748_v61 = vmul.f32 %v220_v57, %v220_v57  ;;  %v2758_v9 = vmul.f32 %v173_v1, %v173_v1  ;;  %v197_v16 = vld [vmem:[%s2508_s6 + $0xf0] sm:$0xff]  ;;  %v182_v0 = vld [vmem:[%s2508_s6 + $0x78] sm:$0xff] }
  0x56   : > { %5167 = vst [vmem:[#allocation53_spill] sm:$0xff] %v2736_v52  ;;  %5168 = vst [vmem:[#allocation54_spill] sm:$0xff] %v2738_v53  ;;  %v189_v17 = vld [vmem:[%s2508_s6 + $0xb0] sm:$0xff]  ;;  %v2766_v24 = vmul.f32 %v197_v16, %v197_v16  ;;  %v174_v1 = vld [vmem:[%s2508_s6 + $0x38] sm:$0xff]  ;;  %v2796_v16 = vmul.f32 %v182_v0, %v182_v0 }
  0x57   : > { %5169 = vst [vmem:[#allocation55_spill] sm:$0xff] %v2746_v60  ;;  %5170 = vst [vmem:[#allocation56_spill] sm:$0xff] %v2748_v61  ;;  %v2768_v25 = vmul.f32 %v189_v17, %v189_v17  ;;  %v213_v32 = vld [vmem:[%s2508_s6 + $0x170] sm:$0xff]  ;;  %v2798_v17 = vmul.f32 %v174_v1, %v174_v1 }
  0x58   : > { %321 = vrot.lane.b32.xlu1 %v2576_v26, %s2376_s29  ;;  %5171 = vst [vmem:[#allocation57_spill] sm:$0xff] %v2756_v8  ;;  %5172 = vst [vmem:[#allocation58_spill] sm:$0xff] %v2758_v9  ;;  %v205_v33 = vld [vmem:[%s2508_s6 + $0x130] sm:$0xff]  ;;  %v2776_v40 = vmul.f32 %v213_v32, %v213_v32  ;;  %v198_v32 = vld [vmem:[%s2508_s6 + $0xf8] sm:$0xff] }
  0x59   : > { %319 = vrot.lane.b32.xlu0 %v2578_v27, %s2376_s29  ;;  %5173 = vst [vmem:[#allocation59_spill] sm:$0xff] %v2766_v24  ;;  %5174 = vst [vmem:[#allocation60_spill] sm:$0xff] %v2768_v25  ;;  %v2778_v41 = vmul.f32 %v205_v33, %v205_v33  ;;  %v229_v48 = vld [vmem:[%s2508_s6 + $0x1f0] sm:$0xff]  ;;  %v190_v33 = vld [vmem:[%s2508_s6 + $0xb8] sm:$0xff] }
  0x5a   : > { %5175 = vst [vmem:[#allocation61_spill] sm:$0xff] %v2776_v40  ;;  %v221_v49 = vld [vmem:[%s2508_s6 + $0x1b0] sm:$0xff]  ;;  %v2786_v56 = vmul.f32 %v229_v48, %v229_v48  ;;  %5179 = vst [vmem:[#allocation65_spill] sm:$0xff] %v2796_v16  ;;  %v2806_v48 = vmul.f32 %v198_v32, %v198_v32  ;;  %v230_v32 = vld [vmem:[%s2508_s6 + $0x1f8] sm:$0xff] }
  0x5b   : > { %5176 = vst [vmem:[#allocation62_spill] sm:$0xff] %v2778_v41  ;;  %v2788_v57 = vmul.f32 %v221_v49, %v221_v49  ;;  %5180 = vst [vmem:[#allocation66_spill] sm:$0xff] %v2798_v17  ;;  %v2808_v49 = vmul.f32 %v190_v33, %v190_v33 }
  0x5c   : > { %325 = vrot.lane.b32.xlu1 %v2586_v30, %s2376_s29  ;;  %5177 = vst [vmem:[#allocation63_spill] sm:$0xff] %v2786_v56  ;;  %5181 = vst [vmem:[#allocation67_spill] sm:$0xff] %v2806_v48 }
  0x5d   : > { %323 = vrot.lane.b32.xlu0 %v2588_v31, %s2376_s29  ;;  %5178 = vst [vmem:[#allocation64_spill] sm:$0xff] %v2788_v57  ;;  %5182 = vst [vmem:[#allocation68_spill] sm:$0xff] %v2808_v49 }
  0x60   : > { %329 = vrot.lane.b32.xlu1 %v2596_v34, %s2376_s29 }
  0x61   : > { %327 = vrot.lane.b32.xlu0 %v2598_v35, %s2376_s29 }
  0x64   : > { %333 = vrot.lane.b32.xlu1 %v2606_v38, %s2376_s29 }
  0x65   : > { %331 = vrot.lane.b32.xlu0 %v2608_v39, %s2376_s29 }
  0x68   : > { %337 = vrot.lane.b32.xlu1 %v2616_v42, %s2376_s29 }
  0x69   : > { %335 = vrot.lane.b32.xlu0 %v2618_v43, %s2376_s29 }
  0x6c   : > { %341 = vrot.lane.b32.xlu1 %v2626_v46, %s2376_s29 }
  0x6d   : > { %339 = vrot.lane.b32.xlu0 %v2628_v47, %s2376_s29 }
  0x70   : > { %345 = vrot.lane.b32.xlu1 %v2636_v50, %s2376_s29 }
  0x71   : > { %343 = vrot.lane.b32.xlu0 %v2638_v51, %s2376_s29 }
  0x74   : > { %349 = vrot.lane.b32.xlu1 %v2646_v54, %s2376_s29 }
  0x75   : > { %347 = vrot.lane.b32.xlu0 %v2648_v55, %s2376_s29 }
  0x78   : > { %353 = vrot.lane.b32.xlu1 %v2656_v58, %s2376_s29 }
  0x79   : > { %351 = vrot.lane.b32.xlu0 %v2658_v59, %s2376_s29 }
  0x7c   : > { %357 = vrot.lane.b32.xlu1 %v2666_v62, %s2376_s29 }
  0x7d   : > { %355 = vrot.lane.b32.xlu0 %v2668_v63, %s2376_s29 }
  0x80   : > { %361 = vrot.lane.b32.xlu1 %v2676_v2, %s2376_s29 }
  0x81   : > { %359 = vrot.lane.b32.xlu0 %v2678_v5, %s2376_s29 }
  0x84   : > { %365 = vrot.lane.b32.xlu1 %v2686_v12, %s2376_s29 }
  0x85   : > { %363 = vrot.lane.b32.xlu0 %v2688_v13, %s2376_s29 }
  0x88   : > { %369 = vrot.lane.b32.xlu1 %v2696_v20, %s2376_s29 }
  0x89   : > { %367 = vrot.lane.b32.xlu0 %v2698_v21, %s2376_s29 }
  0x8c   : > { %373 = vrot.lane.b32.xlu1 %v2706_v28, %s2376_s29 }
  0x8d   : > { %371 = vrot.lane.b32.xlu0 %v2708_v29, %s2376_s29 }
  0x90   : > { %377 = vrot.lane.b32.xlu1 %v2716_v36, %s2376_s29 }
  0x91   : > { %375 = vrot.lane.b32.xlu0 %v2718_v37, %s2376_s29 }
  0x94   : > { %381 = vrot.lane.b32.xlu1 %v2726_v44, %s2376_s29 }
  0x95   : > { %379 = vrot.lane.b32.xlu0 %v2728_v45, %s2376_s29 }
  0x98   : > { %385 = vrot.lane.b32.xlu1 %v2736_v52, %s2376_s29 }
  0x99   : > { %383 = vrot.lane.b32.xlu0 %v2738_v53, %s2376_s29 }
  0x9c   : > { %389 = vrot.lane.b32.xlu1 %v2746_v60, %s2376_s29 }
  0x9d   : > { %387 = vrot.lane.b32.xlu0 %v2748_v61, %s2376_s29 }
  0xa0   : > { %393 = vrot.lane.b32.xlu1 %v2756_v8, %s2376_s29 }
  0xa1   : > { %391 = vrot.lane.b32.xlu0 %v2758_v9, %s2376_s29 }
  0xa4   : > { %397 = vrot.lane.b32.xlu1 %v2766_v24, %s2376_s29 }
  0xa5   : > { %395 = vrot.lane.b32.xlu0 %v2768_v25, %s2376_s29 }
  0xa8   : > { %401 = vrot.lane.b32.xlu1 %v2776_v40, %s2376_s29 }
  0xa9   : > { %399 = vrot.lane.b32.xlu0 %v2778_v41, %s2376_s29 }
  0xac   : > { %405 = vrot.lane.b32.xlu1 %v2786_v56, %s2376_s29  ;;  %v214_v56 = vld [vmem:[%s2508_s6 + $0x178] sm:$0xff] }
  0xad   : > { %403 = vrot.lane.b32.xlu0 %v2788_v57, %s2376_s29  ;;  %v206_v57 = vld [vmem:[%s2508_s6 + $0x138] sm:$0xff]  ;;  %v2820_v1 = vmul.f32 %v214_v56, %v214_v56 }
  0xaf   : > { %5185 = vst [vmem:[#allocation71_spill] sm:$0xff] %v2820_v1 }
  0xb0   : > { %409 = vrot.lane.b32.xlu1 %v2796_v16, %s2376_s29  ;;  %v2822_v16 = vmul.f32 %v206_v57, %v206_v57 }
  0xb1   : > { %407 = vrot.lane.b32.xlu0 %v2798_v17, %s2376_s29  ;;  %v222_v17 = vld [vmem:[%s2508_s6 + $0x1b8] sm:$0xff] }
  0xb2   : > { %v2812_v0 = vpop.permute.xlu1 %299  ;;  %5186 = vst [vmem:[#allocation72_spill] sm:$0xff] %v2822_v16 }
  0xb3   : > { %5183 = vst [vmem:[#allocation69_spill] sm:$0xff] %v2812_v0  ;;  %v2814_v41 = vpop.permute.xlu0 %295  ;;  %v2834_v0 = vmul.f32 %v230_v32, %v230_v32 }
  0xb4   : > { %5184 = vst [vmem:[#allocation70_spill] sm:$0xff] %v2814_v41  ;;  %413 = vrot.lane.b32.xlu1 %v2806_v48, %s2376_s29  ;;  %v2836_v41 = vmul.f32 %v222_v17, %v222_v17 }
  0xb5   : > { %411 = vrot.lane.b32.xlu0 %v2808_v49, %s2376_s29  ;;  %5189 = vst [vmem:[#allocation75_spill] sm:$0xff] %v2834_v0 }
  0xb6   : > { %v2826_v33 = vpop.permute.xlu1 %301  ;;  %5190 = vst [vmem:[#allocation76_spill] sm:$0xff] %v2836_v41 }
  0xb7   : > { %5187 = vst [vmem:[#allocation73_spill] sm:$0xff] %v2826_v33  ;;  %v2828_v40 = vpop.permute.xlu0 %297 }
  0xb8   : > { %5188 = vst [vmem:[#allocation74_spill] sm:$0xff] %v2828_v40  ;;  %417 = vrot.lane.b32.xlu1 %v2820_v1, %s2376_s29 }
  0xb9   : > { %415 = vrot.lane.b32.xlu0 %v2822_v16, %s2376_s29 }
  0xba   : > { %v2838_v56 = vpop.permute.xlu1 %305 }
  0xbb   : > { %v2840_v57 = vpop.permute.xlu0 %303 }
  0xbc   : > { %421 = vrot.lane.b32.xlu1 %v2834_v0, %s2376_s29 }
  0xbd   : > { %419 = vrot.lane.b32.xlu0 %v2836_v41, %s2376_s29 }
  0xbe   : > { %v2846_v33 = vpop.permute.xlu1 %309 }
  0xbf   : > { %5191 = vst [vmem:[#allocation77_spill] sm:$0xff] %v2846_v33  ;;  %v2848_v40 = vpop.permute.xlu0 %307 }
  0xc0   : > { %5192 = vst [vmem:[#allocation78_spill] sm:$0xff] %v2848_v40  ;;  %492 = vrot.lane.b32.xlu1 %v2528_v7, %s2377_s21 }
  0xc1   : > { %490 = vrot.lane.b32.xlu0 %v2519_v4, %s2377_s21 }
  0xc2   : > { %v2854_v17 = vpop.permute.xlu1 %313 }
  0xc3   : > { %v2856_v32 = vpop.permute.xlu0 %311 }
  0xc4   : > { %496 = vrot.lane.b32.xlu1 %v2526_v6, %s2377_s21 }
  0xc5   : > { %494 = vrot.lane.b32.xlu0 %v2517_v3, %s2377_s21 }
  0xc6   : > { %v2862_v33 = vpop.permute.xlu1 %317 }
  0xc7   : > { %v2864_v40 = vpop.permute.xlu0 %315 }
  0xc8   : > { %500 = vrot.lane.b32.xlu1 %v2536_v10, %s2377_s21 }
  0xc9   : > { %498 = vrot.lane.b32.xlu0 %v2538_v11, %s2377_s21 }
  0xca   : > { %v2870_v4 = vpop.permute.xlu1 %321 }
  0xcb   : > { %v2872_v7 = vpop.permute.xlu0 %319 }
  0xcc   : > { %504 = vrot.lane.b32.xlu1 %v2546_v14, %s2377_s21 }
  0xcd   : > { %502 = vrot.lane.b32.xlu0 %v2548_v15, %s2377_s21 }
  0xce   : > { %v2878_v3 = vpop.permute.xlu1 %325 }
  0xcf   : > { %v2880_v6 = vpop.permute.xlu0 %323 }
  0xd0   : > { %508 = vrot.lane.b32.xlu1 %v2556_v18, %s2377_s21 }
  0xd1   : > { %506 = vrot.lane.b32.xlu0 %v2558_v19, %s2377_s21 }
  0xd2   : > { %v2886_v11 = vpop.permute.xlu1 %329 }
  0xd3   : > { %v2888_v10 = vpop.permute.xlu0 %327 }
  0xd4   : > { %512 = vrot.lane.b32.xlu1 %v2566_v22, %s2377_s21 }
  0xd5   : > { %510 = vrot.lane.b32.xlu0 %v2568_v23, %s2377_s21 }
  0xd6   : > { %v2894_v15 = vpop.permute.xlu1 %333 }
  0xd7   : > { %v2896_v14 = vpop.permute.xlu0 %331 }
  0xd8   : > { %516 = vrot.lane.b32.xlu1 %v2576_v26, %s2377_s21 }
  0xd9   : > { %514 = vrot.lane.b32.xlu0 %v2578_v27, %s2377_s21 }
  0xda   : > { %v2902_v19 = vpop.permute.xlu1 %337 }
  0xdb   : > { %v2904_v18 = vpop.permute.xlu0 %335 }
  0xdc   : > { %520 = vrot.lane.b32.xlu1 %v2586_v30, %s2377_s21 }
  0xdd   : > { %518 = vrot.lane.b32.xlu0 %v2588_v31, %s2377_s21 }
  0xde   : > { %v2910_v23 = vpop.permute.xlu1 %341 }
  0xdf   : > { %v2912_v22 = vpop.permute.xlu0 %339 }
  0xe0   : > { %524 = vrot.lane.b32.xlu1 %v2596_v34, %s2377_s21 }
  0xe1   : > { %522 = vrot.lane.b32.xlu0 %v2598_v35, %s2377_s21 }
  0xe2   : > { %v2918_v27 = vpop.permute.xlu1 %345 }
  0xe3   : > { %v2920_v26 = vpop.permute.xlu0 %343 }
  0xe4   : > { %528 = vrot.lane.b32.xlu1 %v2606_v38, %s2377_s21 }
  0xe5   : > { %526 = vrot.lane.b32.xlu0 %v2608_v39, %s2377_s21 }
  0xe6   : > { %v2926_v31 = vpop.permute.xlu1 %349 }
  0xe7   : > { %v2928_v30 = vpop.permute.xlu0 %347 }
  0xe8   : > { %532 = vrot.lane.b32.xlu1 %v2616_v42, %s2377_s21 }
  0xe9   : > { %530 = vrot.lane.b32.xlu0 %v2618_v43, %s2377_s21 }
  0xea   : > { %v2934_v35 = vpop.permute.xlu1 %353 }
  0xeb   : > { %5193 = vst [vmem:[#allocation79_spill] sm:$0xff] %v2934_v35  ;;  %v2936_v34 = vpop.permute.xlu0 %351 }
  0xec   : > { %5194 = vst [vmem:[#allocation80_spill] sm:$0xff] %v2936_v34  ;;  %536 = vrot.lane.b32.xlu1 %v2626_v46, %s2377_s21 }
  0xed   : > { %534 = vrot.lane.b32.xlu0 %v2628_v47, %s2377_s21  ;;  %v423_v47 = vlaneseq }
  0xee   : > { %v2942_v39 = vpop.permute.xlu1 %357 }
  0xef   : > { %v2944_v38 = vpop.permute.xlu0 %355 }
  0xf0   : > { %540 = vrot.lane.b32.xlu1 %v2636_v50, %s2377_s21 }
  0xf1   : > { %538 = vrot.lane.b32.xlu0 %v2638_v51, %s2377_s21  ;;  %v2966_v51 = vand.u32 127, %v423_v47 }
  0xf2   : > { %v2950_v43 = vpop.permute.xlu1 %361 }
  0xf3   : > { %v2952_v42 = vpop.permute.xlu0 %359  ;;  %vm425_vm0 = vcmp.lt.s32.totalorder %v2966_v51, 1  ;;  %vm618_vm1 = vcmp.lt.s32.totalorder %v2966_v51, 127 }
  0xf4   : > { %544 = vrot.lane.b32.xlu1 %v2646_v54, %s2377_s21 }
  0xf5   : > { %542 = vrot.lane.b32.xlu0 %v2648_v55, %s2377_s21 }
  0xf6   : > { %v2958_v46 = vpop.permute.xlu1 %365 }
  0xf7   : > { %v2960_v34 = vpop.permute.xlu0 %363 }
  0xf8   : > { %548 = vrot.lane.b32.xlu1 %v2656_v58, %s2377_s21 }
  0xf9   : > { %546 = vrot.lane.b32.xlu0 %v2658_v59, %s2377_s21 }
  0xfa   : > { %v2968_v50 = vpop.permute.xlu1 %369 }
  0xfb   : > { %v2970_v35 = vpop.permute.xlu0 %367 }
  0xfc   : > { %552 = vrot.lane.b32.xlu1 %v2666_v62, %s2377_s21 }
  0xfd   : > { %550 = vrot.lane.b32.xlu0 %v2668_v63, %s2377_s21 }
  0xfe   : > { %v374_v55 = vpop.permute.xlu1 %373 }
  0xff   : > { %v372_v54 = vpop.permute.xlu0 %371  ;;  %v2980_v59 = vsel %vm425_vm0, %v2942_v39, %v374_v55 }
 0x100   : > { %5195 = vst [vmem:[#allocation81_spill] sm:$0xff] %v2980_v59  ;;  %v2985_v47 = vsel %vm425_vm0, %v2944_v38, %v372_v54  ;;  %556 = vrot.lane.b32.xlu1 %v2676_v2, %s2377_s21 }
 0x101   : > { %5196 = vst [vmem:[#allocation82_spill] sm:$0xff] %v2985_v47  ;;  %554 = vrot.lane.b32.xlu0 %v2678_v5, %s2377_s21 }
 0x102   : > { %v378_v63 = vpop.permute.xlu1 %377 }
 0x103   : > { %v376_v62 = vpop.permute.xlu0 %375  ;;  %v2994_v58 = vsel %vm425_vm0, %v2950_v43, %v378_v63 }
 0x104   : > { %5197 = vst [vmem:[#allocation83_spill] sm:$0xff] %v2994_v58  ;;  %v2999_v59 = vsel %vm425_vm0, %v2952_v42, %v376_v62  ;;  %560 = vrot.lane.b32.xlu1 %v2686_v12, %s2377_s21 }
 0x105   : > { %5198 = vst [vmem:[#allocation84_spill] sm:$0xff] %v2999_v59  ;;  %558 = vrot.lane.b32.xlu0 %v2688_v13, %s2377_s21 }
 0x106   : > { %v382_v47 = vpop.permute.xlu1 %381 }
 0x107   : > { %v380_v5 = vpop.permute.xlu0 %379  ;;  %v3008_v2 = vsel %vm425_vm0, %v2958_v46, %v382_v47 }
 0x108   : > { %5199 = vst [vmem:[#allocation85_spill] sm:$0xff] %v3008_v2  ;;  %v3013_v58 = vsel %vm425_vm0, %v2960_v34, %v380_v5  ;;  %564 = vrot.lane.b32.xlu1 %v2696_v20, %s2377_s21 }
 0x109   : > { %5200 = vst [vmem:[#allocation86_spill] sm:$0xff] %v3013_v58  ;;  %562 = vrot.lane.b32.xlu0 %v2698_v21, %s2377_s21 }
 0x10a   : > { %v386_v59 = vpop.permute.xlu1 %385 }
 0x10b   : > { %v384_v13 = vpop.permute.xlu0 %383  ;;  %v3022_v12 = vsel %vm425_vm0, %v2968_v50, %v386_v59 }
 0x10c   : > { %5201 = vst [vmem:[#allocation87_spill] sm:$0xff] %v3022_v12  ;;  %v3027_v2 = vsel %vm425_vm0, %v2970_v35, %v384_v13  ;;  %568 = vrot.lane.b32.xlu1 %v2706_v28, %s2377_s21 }
 0x10d   : > { %5202 = vst [vmem:[#allocation88_spill] sm:$0xff] %v3027_v2  ;;  %566 = vrot.lane.b32.xlu0 %v2708_v29, %s2377_s21 }
 0x10e   : > { %v390_v58 = vpop.permute.xlu1 %389 }
 0x10f   : > { %v388_v21 = vpop.permute.xlu0 %387  ;;  %v3035_v20 = vsel %vm425_vm0, %v374_v55, %v390_v58 }
 0x110   : > { %5203 = vst [vmem:[#allocation89_spill] sm:$0xff] %v3035_v20  ;;  %v3039_v12 = vsel %vm425_vm0, %v372_v54, %v388_v21  ;;  %572 = vrot.lane.b32.xlu1 %v2716_v36, %s2377_s21  ;;  %v3254_v36 = vsel %vm425_vm0, %v2854_v17, %v2886_v11 }
 0x111   : > { %5204 = vst [vmem:[#allocation90_spill] sm:$0xff] %v3039_v12  ;;  %570 = vrot.lane.b32.xlu0 %v2718_v37, %s2377_s21 }
 0x112   : > { %v394_v2 = vpop.permute.xlu1 %393 }
 0x113   : > { %v392_v28 = vpop.permute.xlu0 %391  ;;  %v3047_v29 = vsel %vm425_vm0, %v378_v63, %v394_v2 }
 0x114   : > { %5205 = vst [vmem:[#allocation91_spill] sm:$0xff] %v3047_v29  ;;  %v3051_v55 = vsel %vm425_vm0, %v376_v62, %v392_v28  ;;  %576 = vrot.lane.b32.xlu1 %v2726_v44, %s2377_s21  ;;  %v5242_v44 = vld [vmem:[#allocation78_spill] sm:$0xff] }
 0x115   : > { %5206 = vst [vmem:[#allocation92_spill] sm:$0xff] %v3051_v55  ;;  %574 = vrot.lane.b32.xlu0 %v2728_v45, %s2377_s21  ;;  %v3248_v37 = vsel %vm425_vm0, %v5242_v44, %v2880_v6  ;;  %5244 = vst [vmem:[#allocation78_spill] sm:$0xff] %v3254_v36  ;;  %v3299_v36 = vsel %vm425_vm0, %v2880_v6, %v2912_v22 }
 0x116   : > { %v398_v54 = vpop.permute.xlu1 %397  ;;  %5246 = vst [vmem:[#allocation112_spill] sm:$0xff] %v3299_v36 }
 0x117   : > { %v396_v12 = vpop.permute.xlu0 %395  ;;  %v3059_v20 = vsel %vm425_vm0, %v382_v47, %v398_v54 }
 0x118   : > { %5207 = vst [vmem:[#allocation93_spill] sm:$0xff] %v3059_v20  ;;  %v3063_v63 = vsel %vm425_vm0, %v380_v5, %v396_v12  ;;  %580 = vrot.lane.b32.xlu1 %v2736_v52, %s2377_s21  ;;  %v5240_v52 = vld [vmem:[#allocation77_spill] sm:$0xff] }
 0x119   : > { %5208 = vst [vmem:[#allocation94_spill] sm:$0xff] %v3063_v63  ;;  %578 = vrot.lane.b32.xlu0 %v2738_v53, %s2377_s21  ;;  %v3236_v53 = vsel %vm425_vm0, %v2840_v57, %v2872_v7  ;;  %v3242_v45 = vsel %vm425_vm0, %v5240_v52, %v2878_v3  ;;  %5243 = vst [vmem:[#allocation77_spill] sm:$0xff] %v3248_v37  ;;  %v3272_v37 = vsel %vm425_vm0, %v2864_v40, %v2896_v14 }
 0x11a   : > { %v402_v62 = vpop.permute.xlu1 %401 }
 0x11b   : > { %v400_v55 = vpop.permute.xlu0 %399  ;;  %v3071_v29 = vsel %vm425_vm0, %v386_v59, %v402_v62 }
 0x11c   : > { %5209 = vst [vmem:[#allocation95_spill] sm:$0xff] %v3071_v29  ;;  %v3075_v47 = vsel %vm425_vm0, %v384_v13, %v400_v55  ;;  %584 = vrot.lane.b32.xlu1 %v2746_v60, %s2377_s21 }
 0x11d   : > { %5210 = vst [vmem:[#allocation96_spill] sm:$0xff] %v3075_v47  ;;  %582 = vrot.lane.b32.xlu0 %v2748_v61, %s2377_s21  ;;  %v5238_v61 = vld [vmem:[#allocation69_spill] sm:$0xff] }
 0x11e   : > { %v406_v5 = vpop.permute.xlu1 %405  ;;  %v3224_v60 = vsel %vm425_vm0, %v5238_v61, %v2864_v40  ;;  %5241 = vst [vmem:[#allocation69_spill] sm:$0xff] %v3242_v45  ;;  %v3266_v45 = vsel %vm425_vm0, %v2862_v33, %v2894_v15  ;;  %v3293_v40 = vsel %vm425_vm0, %v2878_v3, %v2910_v23 }
 0x11f   : > { %v404_v63 = vpop.permute.xlu0 %403  ;;  %v3083_v20 = vsel %vm425_vm0, %v390_v58, %v406_v5 }
 0x120   : > { %5211 = vst [vmem:[#allocation97_spill] sm:$0xff] %v3083_v20  ;;  %v3087_v59 = vsel %vm425_vm0, %v388_v21, %v404_v63  ;;  %588 = vrot.lane.b32.xlu1 %v2756_v8, %s2377_s21  ;;  %v5217_v20 = vld [vmem:[#allocation61_spill] sm:$0xff] }
 0x121   : > { %5212 = vst [vmem:[#allocation98_spill] sm:$0xff] %v3087_v59  ;;  %586 = vrot.lane.b32.xlu0 %v2758_v9, %s2377_s21  ;;  %v5237_v8 = vld [vmem:[#allocation73_spill] sm:$0xff] }
 0x122   : > { %v3093_v13 = vpop.permute.xlu1 %409  ;;  %5239 = vst [vmem:[#allocation73_spill] sm:$0xff] %v3236_v53  ;;  %v3260_v53 = vsel %vm425_vm0, %v2856_v32, %v2888_v10 }
 0x123   : > { %v3095_v47 = vpop.permute.xlu0 %407  ;;  %v3100_v29 = vsel %vm425_vm0, %v394_v2, %v3093_v13 }
 0x124   : > { %5213 = vst [vmem:[#allocation99_spill] sm:$0xff] %v3100_v29  ;;  %v3105_v58 = vsel %vm425_vm0, %v392_v28, %v3095_v47  ;;  %592 = vrot.lane.b32.xlu1 %v2766_v24, %s2377_s21  ;;  %v5218_v24 = vld [vmem:[#allocation62_spill] sm:$0xff]  ;;  %v3218_v29 = vsel %vm425_vm0, %v5237_v8, %v2862_v33  ;;  %v3287_v33 = vsel %vm425_vm0, %v2872_v7, %v2904_v18 }
 0x125   : > { %5214 = vst [vmem:[#allocation100_spill] sm:$0xff] %v3105_v58  ;;  %590 = vrot.lane.b32.xlu0 %v2768_v25, %s2377_s21 }
 0x126   : > { %v3111_v21 = vpop.permute.xlu1 %413 }
 0x127   : > { %v3113_v59 = vpop.permute.xlu0 %411  ;;  %v3118_v2 = vsel %vm425_vm0, %v398_v54, %v3111_v21 }
 0x128   : > { %5215 = vst [vmem:[#allocation101_spill] sm:$0xff] %v3118_v2  ;;  %v3123_v28 = vsel %vm425_vm0, %v396_v12, %v3113_v59  ;;  %596 = vrot.lane.b32.xlu1 %v5217_v20, %s2377_s21  ;;  %v5222_v20 = vld [vmem:[#allocation64_spill] sm:$0xff] }
 0x129   : > { %5216 = vst [vmem:[#allocation102_spill] sm:$0xff] %v3123_v28  ;;  %594 = vrot.lane.b32.xlu0 %v5218_v24, %s2377_s21  ;;  %v5221_v28 = vld [vmem:[#allocation63_spill] sm:$0xff] }
 0x12a   : > { %v3129_v25 = vpop.permute.xlu1 %417 }
 0x12b   : > { %v3131_v9 = vpop.permute.xlu0 %415  ;;  %v3136_v54 = vsel %vm425_vm0, %v402_v62, %v3129_v25 }
 0x12c   : > { %5219 = vst [vmem:[#allocation103_spill] sm:$0xff] %v3136_v54  ;;  %v3141_v12 = vsel %vm425_vm0, %v400_v55, %v3131_v9  ;;  %600 = vrot.lane.b32.xlu1 %v5221_v28, %s2377_s21  ;;  %v5226_v28 = vld [vmem:[#allocation66_spill] sm:$0xff] }
 0x12d   : > { %5220 = vst [vmem:[#allocation104_spill] sm:$0xff] %v3141_v12  ;;  %598 = vrot.lane.b32.xlu0 %v5222_v20, %s2377_s21  ;;  %v5225_v12 = vld [vmem:[#allocation65_spill] sm:$0xff] }
 0x12e   : > { %v3147_v24 = vpop.permute.xlu1 %421 }
 0x12f   : > { %v3149_v2 = vpop.permute.xlu0 %419  ;;  %v3154_v62 = vsel %vm425_vm0, %v406_v5, %v3147_v24 }
 0x130   : > { %5223 = vst [vmem:[#allocation105_spill] sm:$0xff] %v3154_v62  ;;  %v3159_v55 = vsel %vm425_vm0, %v404_v63, %v3149_v2  ;;  %604 = vrot.lane.b32.xlu1 %v5225_v12, %s2377_s21 }
 0x131   : > { %5224 = vst [vmem:[#allocation106_spill] sm:$0xff] %v3159_v55  ;;  %602 = vrot.lane.b32.xlu0 %v5226_v28, %s2377_s21  ;;  %v5232_v28 = vld [vmem:[#allocation70_spill] sm:$0xff] }
 0x132   : > { %v3165_v20 = vpop.permute.xlu1 %492  ;;  %v3203_v58 = vsel %vm425_vm0, %v5232_v28, %v2856_v32  ;;  %v3281_v32 = vsel %vm425_vm0, %v2870_v4, %v2902_v19  ;;  %v482_v3 = vsel %vm425_vm0, %v3095_v47, %v5232_v28  ;;  %v3331_v47 = vsel %vm425_vm0, %v2888_v10, %v2920_v26  ;;  %v5248_v10 = vld [vmem:[#allocation12_spill] sm:$0xff] }
 0x133   : > { %5227 = vst [vmem:[#allocation107_spill] sm:$0xff] %v3165_v20  ;;  %v3167_v54 = vpop.permute.xlu0 %490  ;;  %5245 = vst [vmem:[#allocation111_spill] sm:$0xff] %v3281_v32 }
 0x134   : > { %5228 = vst [vmem:[#allocation108_spill] sm:$0xff] %v3167_v54  ;;  %608 = vrot.lane.b32.xlu1 %v2806_v48, %s2377_s21  ;;  %v690_v48 = vand.u32 1, %v2966_v51  ;;  %5247 = vst [vmem:[#allocation113_spill] sm:$0xff] %v3331_v47  ;;  %v5249_v47 = vld [vmem:[#allocation10_spill] sm:$0xff] }
 0x135   : > { %606 = vrot.lane.b32.xlu0 %v2808_v49, %s2377_s21  ;;  %v3191_v49 = vadd.s32 128, %v2966_v51 }
 0x136   : > { %v3173_v5 = vpop.permute.xlu1 %496  ;;  %vm3210_vm2 = vcmp.eq.s32.totalorder %v690_v48, 0  ;;  %v3230_v48 = vsel %vm425_vm0, %v2838_v56, %v2870_v4 }
 0x137   : > { %v3175_v63 = vpop.permute.xlu0 %494 }
 0x138   : > { %5229 = vst [vmem:[#allocation109_spill] sm:$0xff] %v3175_v63  ;;  %612 = vrot.lane.b32.xlu1 %v2820_v1, %s2377_s21  ;;  %v5231_v1 = vld [vmem:[#allocation74_spill] sm:$0xff] }
 0x139   : > { %610 = vrot.lane.b32.xlu0 %v2822_v16, %s2377_s21  ;;  %v3197_v16 = vsel %vm425_vm0, %v5231_v1, %v2854_v17  ;;  %v3274_v17 = vstv %s166_s3  ;;  %v483_v7 = vsel %vm425_vm0, %v3093_v13, %v5231_v1  ;;  %v3325_v1 = vsel %vm425_vm0, %v2886_v11, %v2918_v27 }
 0x13a   : > { %v3181_v55 = vpop.permute.xlu1 %500  ;;  %v3347_v11 = vsel %vm425_vm0, %v2896_v14, %v2928_v30  ;;  %v3371_v14 = vsel %vm425_vm0, %v2910_v23, %v2942_v39  ;;  %v3393_v23 = vsel %vm425_vm0, %v2920_v26, %v2952_v42  ;;  %v3411_v26 = vadd.s32 384, %v2966_v51 }
 0x13b   : > { %v3183_v62 = vpop.permute.xlu0 %498  ;;  %v487_v39 = vsel %vm425_vm0, %v3129_v25, %v2838_v56 }
 0x13c   : > { %5230 = vst [vmem:[#allocation110_spill] sm:$0xff] %v3183_v62  ;;  %616 = vrot.lane.b32.xlu1 %v2834_v0, %s2377_s21 }
 0x13d   : > { %614 = vrot.lane.b32.xlu0 %v2836_v41, %s2377_s21 }
 0x13e   : > { %v3205_v12 = vpop.permute.xlu1 %504 }
 0x13f   : > { %5233 = vst [vmem:[#allocation74_spill] sm:$0xff] %v3205_v12  ;;  %v3207_v0 = vpop.permute.xlu0 %502 }
 0x140   : > { %5234 = vst [vmem:[#allocation70_spill] sm:$0xff] %v3207_v0 }
 0x142   : > { %v3301_v4 = vpop.permute.xlu1 %508 }
 0x143   : > { %v3303_v32 = vpop.permute.xlu0 %506  ;;  %v668_v6 = vsel %vm618_vm1, %v3165_v20, %v3301_v4 }
 0x144   : > { %v667_v36 = vsel %vm618_vm1, %v3167_v54, %v3303_v32  ;;  %v714_v13 = vsel %vm3210_vm2, %v668_v6, %v483_v7  ;;  %v3341_v54 = vsel %vm425_vm0, %v2894_v15, %v2926_v31  ;;  %v5250_v6 = vld [vmem:[#allocation79_spill] sm:$0xff]  ;;  %v5251_v15 = vld [vmem:[#allocation80_spill] sm:$0xff] }
 0x145   : > { %v706_v28 = vsel %vm3210_vm2, %v667_v36, %v482_v3  ;;  %v3350_v20 = vadd.f32 %v714_v13, %v5248_v10  ;;  %v3359_v36 = vsel %vm425_vm0, %v2902_v19, %v5250_v6  ;;  %v3365_v3 = vsel %vm425_vm0, %v2904_v18, %v5251_v15  ;;  %v5253_v10 = vld [vmem:[#allocation9_spill] sm:$0xff] }
 0x146   : > { %v3353_v7 = vadd.f32 %v706_v28, %v5249_v47  ;;  %v3377_v47 = vsel %vm425_vm0, %v2912_v22, %v2944_v38  ;;  %v3379_v19 = vpop.permute.xlu1 %512  ;;  %v3387_v18 = vsel %vm425_vm0, %v2918_v27, %v2950_v43  ;;  %v3399_v22 = vsel %vm425_vm0, %v2926_v31, %v2958_v46 }
 0x147   : > { %v3381_v13 = vpop.permute.xlu0 %510  ;;  %1955 = vrsqrt.f32 %v3350_v20  ;;  %v485_v27 = vsel %vm425_vm0, %v3111_v21, %v5237_v8  ;;  %v3408_v38 = vadd.s32 256, %v2966_v51  ;;  %v484_v31 = vsel %vm425_vm0, %v3113_v59, %v5238_v61  ;;  %v5252_v21 = vld [vmem:[#allocation11_spill] sm:$0xff] }
 0x148   : > { %1957 = vrsqrt.f32 %v3353_v7  ;;  %v670_v42 = vsel %vm618_vm1, %v3173_v5, %v3379_v19  ;;  %v669_v43 = vsel %vm618_vm1, %v3175_v63, %v3381_v13  ;;  %v486_v46 = vsel %vm425_vm0, %v3131_v9, %v2840_v57 }
 0x149   : > { %v730_v61 = vsel %vm3210_vm2, %v670_v42, %v485_v27  ;;  %v722_v8 = vsel %vm3210_vm2, %v669_v43, %v484_v31  ;;  %v3442_v59 = vadd.s32 512, %v2966_v51  ;;  %v3462_v27 = vsel %vm425_vm0, %v2928_v30, %v2960_v34 }
 0x14a   : > { %v3437_v25 = vpop.permute.xlu1 %516  ;;  %v3445_v28 = vadd.f32 %v730_v61, %v5252_v21  ;;  %v3448_v63 = vadd.f32 %v722_v8, %v5253_v10  ;;  %v3468_v31 = vsel %vm425_vm0, %v5250_v6, %v2968_v50  ;;  %v3478_v61 = vsel %vm425_vm0, %v5251_v15, %v2970_v35  ;;  %v5255_v21 = vld [vmem:[#allocation14_spill] sm:$0xff] }
 0x14b   : > { %v3439_v56 = vpop.permute.xlu0 %514  ;;  %v672_v9 = vsel %vm618_vm1, %v3181_v55, %v3437_v25  ;;  %v489_v50 = vsel %vm425_vm0, %v3147_v24, %v5240_v52  ;;  %v488_v6 = vsel %vm425_vm0, %v3149_v2, %v5242_v44  ;;  %v5256_v24 = vand.u32 1, %v3191_v49 }
 0x14c   : > { %v671_v57 = vsel %vm618_vm1, %v3183_v62, %v3439_v56  ;;  %v746_v42 = vsel %vm3210_vm2, %v672_v9, %v487_v39  ;;  %1959 = vrsqrt.f32 %v3445_v28  ;;  %vm892_vm4 = vcmp.eq.f32.partialorder %v3350_v20, inf }
 0x14d   : > { %v738_v43 = vsel %vm3210_vm2, %v671_v57, %v486_v46  ;;  %1961 = vrsqrt.f32 %v3448_v63  ;;  %v5254_v46 = vld [vmem:[#allocation13_spill] sm:$0xff]  ;;  %vm3513_vm3 = vcmp.eq.s32.totalorder %v5256_v24, 0  ;;  %vm894_vm5 = vcmp.eq.f32.partialorder %v3350_v20, 0.0 }
 0x14e   : > { %v3492_v35 = vpop.permute.xlu1 %520  ;;  %v3498_v8 = vadd.f32 %v746_v42, %v5254_v46  ;;  %v3501_v10 = vadd.f32 %v738_v43, %v5255_v21  ;;  %v895_v43 = vand.u32 2147483648, %v3350_v20  ;;  %vm836_vm6 = vcmp.eq.f32.partialorder %v3353_v7, inf }
 0x14f   : > { %v3494_v15 = vpop.permute.xlu0 %518  ;;  %v674_v52 = vsel %vm618_vm1, %v3205_v12, %v3492_v35  ;;  %vm838_vm7 = vcmp.eq.f32.partialorder %v3353_v7, 0.0  ;;  %v839_v21 = vand.u32 2147483648, %v3353_v7  ;;  %vm1004_vm8 = vcmp.eq.f32.partialorder %v3445_v28, inf }
 0x150   : > { %v673_v44 = vsel %vm618_vm1, %v3207_v0, %v3494_v15  ;;  %v762_v9 = vsel %vm3210_vm2, %v674_v52, %v489_v50  ;;  %1963 = vrsqrt.f32 %v3498_v8  ;;  %vm1006_vm9 = vcmp.eq.f32.partialorder %v3445_v28, 0.0  ;;  %v5259_v50 = vld [vmem:[#allocation15_spill] sm:$0xff]  ;;  %v5260_v52 = vld [vmem:[#allocation16_spill] sm:$0xff] }
 0x151   : > { %v754_v57 = vsel %vm3210_vm2, %v673_v44, %v488_v6  ;;  %v1956_v42 = vpop.eup %1955  ;;  %1965 = vrsqrt.f32 %v3501_v10  ;;  %v3534_v6 = vadd.f32 %v762_v9, %v5259_v50  ;;  %vm948_vm10 = vcmp.eq.f32.partialorder %v3448_v63, inf }
 0x152   : > { %v1958_v49 = vpop.eup %1957  ;;  %v891_v46 = vmul.f32 %v1956_v42, %v3350_v20  ;;  %v3537_v44 = vadd.f32 %v754_v57, %v5260_v52  ;;  %v1007_v42 = vand.u32 2147483648, %v3445_v28  ;;  %vm950_vm11 = vcmp.eq.f32.partialorder %v3448_v63, 0.0  ;;  %v3545_v39 = vpop.permute.xlu1 %524 }
 0x153   : > { %v835_v41 = vmul.f32 %v1958_v49, %v3353_v7  ;;  %v951_v57 = vand.u32 2147483648, %v3448_v63  ;;  %1967 = vrsqrt.f32 %v3534_v6  ;;  %vm1116_vm12 = vcmp.eq.f32.partialorder %v3498_v8, inf  ;;  %v3558_v52 = vpop.permute.xlu0 %522 }
 0x154   : > { %v893_v24 = vsel %vm892_vm4, %v3350_v20, %v891_v46  ;;  %vm1118_vm13 = vcmp.eq.f32.partialorder %v3498_v8, 0.0  ;;  %1969 = vrsqrt.f32 %v3537_v44  ;;  %vm1060_vm14 = vcmp.eq.f32.partialorder %v3501_v10, inf }
 0x155   : > { %v896_v49 = vsel %vm894_vm5, %v895_v43, %v893_v24  ;;  %v837_v9 = vsel %vm836_vm6, %v3353_v7, %v835_v41  ;;  %v1119_v24 = vand.u32 2147483648, %v3498_v8  ;;  %v660_v41 = vsel %vm618_vm1, %v3301_v4, %v3545_v39 }
 0x156   : > { %v1290_v46 = vadd.f32 1e-06, %v896_v49  ;;  %v840_v50 = vsel %vm838_vm7, %v839_v21, %v837_v9  ;;  %v1960_v20 = vpop.eup %1959  ;;  %vm1062_vm15 = vcmp.eq.f32.partialorder %v3501_v10, 0.0  ;;  %v1063_v9 = vand.u32 2147483648, %v3501_v10 }
 0x157   : > { %v1282_v43 = vadd.f32 1e-06, %v840_v50  ;;  %v1962_v34 = vpop.eup %1961  ;;  %v1003_v7 = vmul.f32 %v1960_v20, %v3445_v28  ;;  %v659_v30 = vsel %vm618_vm1, %v3303_v32, %v3558_v52  ;;  %v1483_v4 = vadd.f32 %v3274_v17, %v896_v49  ;;  %v5261_v49 = vld [vmem:[#allocation17_spill] sm:$0xff] }
 0x158   : > { %1971 = vrcp.f32 %v1290_v46  ;;  %v947_v21 = vmul.f32 %v1962_v34, %v3448_v63  ;;  %vm1228_vm0 = vcmp.eq.f32.partialorder %v3534_v6, inf  ;;  %v715_v20 = vsel %vm3513_vm3, %v660_v41, %v3197_v16 }
 0x159   : > { %1973 = vrcp.f32 %v1282_v43  ;;  %v1005_v46 = vsel %vm1004_vm8, %v3445_v28, %v1003_v7  ;;  %vm1230_vm2 = vcmp.eq.f32.partialorder %v3534_v6, 0.0  ;;  %v3590_v0 = vadd.f32 %v715_v20, %v5261_v49 }
 0x15a   : > { %v1964_v34 = vpop.eup %1963  ;;  %v1008_v43 = vsel %vm1006_vm9, %v1007_v42, %v1005_v46  ;;  %v949_v32 = vsel %vm948_vm10, %v3448_v63, %v947_v21  ;;  %v1475_v12 = vadd.f32 %v3274_v17, %v840_v50  ;;  %v1231_v46 = vand.u32 2147483648, %v3534_v6 }
 0x15b   : > { %v1966_v7 = vpop.eup %1965  ;;  %v1306_v62 = vadd.f32 1e-06, %v1008_v43  ;;  %v952_v16 = vsel %vm950_vm11, %v951_v57, %v949_v32  ;;  %v1115_v41 = vmul.f32 %v1964_v34, %v3498_v8  ;;  %1975 = vrsqrt.f32 %v3590_v0 }
 0x15c   : > { %v1298_v28 = vadd.f32 1e-06, %v952_v16  ;;  %v1059_v42 = vmul.f32 %v1966_v7, %v3501_v10  ;;  %v1547_v21 = vmax.f32 %v1483_v4, 0.0  ;;  %v707_v63 = vsel %vm3513_vm3, %v659_v30, %v3203_v58 }
 0x15d   : > { %1977 = vrcp.f32 %v1306_v62  ;;  %v1117_v20 = vsel %vm1116_vm12, %v3498_v8, %v1115_v41  ;;  %v1968_v57 = vpop.eup %1967  ;;  %vm1172_vm4 = vcmp.eq.f32.partialorder %v3537_v44, inf  ;;  %v1499_v62 = vadd.f32 %v3274_v17, %v1008_v43  ;;  %v5262_v8 = vld [vmem:[#allocation18_spill] sm:$0xff] }
 0x15e   : > { %1979 = vrcp.f32 %v1298_v28  ;;  %v1120_v50 = vsel %vm1118_vm13, %v1119_v24, %v1117_v20  ;;  %v1061_v34 = vsel %vm1060_vm14, %v3501_v10, %v1059_v42  ;;  %v1227_v49 = vmul.f32 %v1968_v57, %v3534_v6  ;;  %v1970_v58 = vpop.eup %1969 }
 0x15f   : > { %v1322_v4 = vadd.f32 1e-06, %v1120_v50  ;;  %v1064_v32 = vsel %vm1062_vm15, %v1063_v9, %v1061_v34  ;;  %v1539_v30 = vmax.f32 %v1475_v12, 0.0  ;;  %vm1174_vm5 = vcmp.eq.f32.partialorder %v3537_v44, 0.0 }
 0x160   : > { %v1314_v7 = vadd.f32 1e-06, %v1064_v32  ;;  %v3617_v24 = vadd.f32 %v707_v63, %v5262_v8  ;;  %v1491_v28 = vadd.f32 %v3274_v17, %v952_v16  ;;  %v1229_v10 = vsel %vm1228_vm0, %v3534_v6, %v1227_v49  ;;  %v3627_v63 = vpop.permute.xlu1 %528  ;;  %v3632_v49 = vpop.permute.xlu0 %526 }
 0x161   : > { %1981 = vrcp.f32 %v1322_v4  ;;  %v1171_v9 = vmul.f32 %v1970_v58, %v3537_v44  ;;  %v1232_v42 = vsel %vm1230_vm2, %v1231_v46, %v1229_v10  ;;  %v1175_v20 = vand.u32 2147483648, %v3537_v44  ;;  %v2211_v58 = vld [vmem:[%s2508_s6 + $0x40] sm:$0xff] }
 0x162   : > { %v1972_v41 = vpop.eup %1971  ;;  %1983 = vrcp.f32 %v1314_v7  ;;  %v1563_v16 = vmax.f32 %v1499_v62, 0.0  ;;  %v1338_v34 = vadd.f32 1e-06, %v1232_v42  ;;  %vm899_vm6 = vcmp.eq.f32.partialorder %v3590_v0, inf  ;;  %v2212_v46 = vld [vmem:[%s2508_s6] sm:$0xff] }
 0x163   : > { %v1974_v43 = vpop.eup %1973  ;;  %v1611_v12 = vmul.f32 %v1972_v41, %v1547_v21  ;;  %v1173_v4 = vsel %vm1172_vm4, %v3537_v44, %v1171_v9  ;;  %1985 = vrsqrt.f32 %v3617_v24  ;;  %v1555_v7 = vmax.f32 %v1491_v28, 0.0 }
 0x164   : > { %v1603_v57 = vmul.f32 %v1974_v43, %v1539_v30  ;;  %v1176_v6 = vsel %vm1174_vm5, %v1175_v20, %v1173_v4  ;;  %1987 = vrcp.f32 %v1338_v34  ;;  %v1515_v41 = vadd.f32 %v3274_v17, %v1120_v50  ;;  %v5263_v20 = vld [vmem:[#allocation19_spill] sm:$0xff]  ;;  %v3668_v4 = vpop.permute.xlu1 %532 }
 0x165   : > { %v1675_v21 = vmul.f32 %v2211_v58, %v1611_v12  ;;  %v1330_v62 = vadd.f32 1e-06, %v1176_v6  ;;  %v1976_v8 = vpop.eup %1975  ;;  %v1507_v44 = vadd.f32 %v3274_v17, %v1064_v32  ;;  %vm901_vm7 = vcmp.eq.f32.partialorder %v3590_v0, 0.0 }
 0x166   : > { %v1667_v30 = vmul.f32 %v2212_v46, %v1603_v57  ;;  %v662_v28 = vsel %vm618_vm1, %v3379_v19, %v3627_v63  ;;  %v898_v9 = vmul.f32 %v1976_v8, %v3590_v0  ;;  %v661_v50 = vsel %vm618_vm1, %v3381_v13, %v3632_v49  ;;  %v3677_v46 = vpop.permute.xlu0 %530 }
 0x167   : > { %1739 = vst [vmem:[%s3642_s4 + $0x40] sm:$0xff] %v1675_v21  ;;  %v1978_v10 = vpop.eup %1977  ;;  %1989 = vrcp.f32 %v1330_v62  ;;  %v731_v43 = vsel %vm3513_vm3, %v662_v28, %v3218_v29  ;;  %v902_v19 = vand.u32 2147483648, %v3590_v0  ;;  %v723_v34 = vsel %vm3513_vm3, %v661_v50, %v3224_v60 }
 0x168   : > { %1731 = vst [vmem:[%s3642_s4] sm:$0xff] %v1667_v30  ;;  %v1980_v32 = vpop.eup %1979  ;;  %v1627_v12 = vmul.f32 %v1978_v10, %v1563_v16  ;;  %v3663_v57 = vadd.f32 %v731_v43, %v5263_v20  ;;  %v1531_v58 = vadd.f32 %v3274_v17, %v1232_v42  ;;  %v900_v13 = vsel %vm899_vm6, %v3590_v0, %v898_v9  ;;  %v5264_v16 = vld [vmem:[#allocation20_spill] sm:$0xff]  ;;  %v2213_v30 = vld [vmem:[%s2508_s6 + $0xc0] sm:$0xff] }
 0x169   : > { %v1619_v29 = vmul.f32 %v1980_v32, %v1555_v7  ;;  %v3675_v21 = vadd.f32 %v723_v34, %v5264_v16  ;;  %v1579_v8 = vmax.f32 %v1515_v41, 0.0  ;;  %v903_v60 = vsel %vm901_vm7, %v902_v19, %v900_v13  ;;  %v2214_v7 = vld [vmem:[%s2508_s6 + $0x80] sm:$0xff] }
 0x16a   : > { %v1691_v62 = vmul.f32 %v2213_v30, %v1627_v12  ;;  %1991 = vrsqrt.f32 %v3663_v57  ;;  %v1571_v10 = vmax.f32 %v1507_v44, 0.0  ;;  %v1291_v9 = vadd.f32 1e-06, %v903_v60  ;;  %v2215_v19 = vld [vmem:[%s2508_s6 + $0x140] sm:$0xff] }
 0x16b   : > { %v1982_v42 = vpop.eup %1981  ;;  %v1683_v28 = vmul.f32 %v2214_v7, %v1619_v29  ;;  %v664_v43 = vsel %vm618_vm1, %v3437_v25, %v3668_v4  ;;  %v1523_v41 = vadd.f32 %v3274_v17, %v1176_v6  ;;  %vm843_vm8 = vcmp.eq.f32.partialorder %v3617_v24, inf  ;;  %v3703_v29 = vpop.permute.xlu1 %536  ;;  %v2216_v13 = vld [vmem:[%s2508_s6 + $0x100] sm:$0xff] }
 0x16c   : > { %v1984_v50 = vpop.eup %1983  ;;  %1755 = vst [vmem:[%s3642_s4 + $0xc0] sm:$0xff] %v1691_v62  ;;  %v1643_v32 = vmul.f32 %v1982_v42, %v1579_v8  ;;  %1993 = vrsqrt.f32 %v3675_v21  ;;  %v1595_v12 = vmax.f32 %v1531_v58, 0.0  ;;  %vm845_vm9 = vcmp.eq.f32.partialorder %v3617_v24, 0.0  ;;  %v5265_v62 = vld [vmem:[#allocation21_spill] sm:$0xff]  ;;  %v3713_v7 = vpop.permute.xlu0 %534 }
 0x16d   : > { %1747 = vst [vmem:[%s3642_s4 + $0x80] sm:$0xff] %v1683_v28  ;;  %v1635_v0 = vmul.f32 %v1984_v50, %v1571_v10  ;;  %1995 = vrcp.f32 %v1291_v9  ;;  %v1986_v44 = vpop.eup %1985  ;;  %v846_v20 = vand.u32 2147483648, %v3617_v24  ;;  %v747_v6 = vsel %vm3513_vm3, %v664_v43, %v3230_v48  ;;  %v5266_v42 = vld [vmem:[#allocation73_spill] sm:$0xff]  ;;  %v5270_v50 = vld [vmem:[#allocation22_spill] sm:$0xff] }
 0x16e   : > { %v1707_v25 = vmul.f32 %v2215_v19, %v1643_v32  ;;  %v663_v34 = vsel %vm618_vm1, %v3439_v56, %v3677_v46  ;;  %v1988_v58 = vpop.eup %1987  ;;  %v842_v30 = vmul.f32 %v1986_v44, %v3617_v24  ;;  %v3708_v8 = vadd.f32 %v747_v6, %v5265_v62 }
 0x16f   : > { %v1699_v16 = vmul.f32 %v2216_v13, %v1635_v0  ;;  %v739_v48 = vsel %vm3513_vm3, %v663_v34, %v5266_v42  ;;  %v5267_v56 = vand.u32 1, %v3408_v38  ;;  %v1659_v10 = vmul.f32 %v1988_v58, %v1595_v12  ;;  %v2218_v58 = vld [vmem:[%s2508_s6 + $0x180] sm:$0xff]  ;;  %v5272_v42 = vld [vmem:[#allocation23_spill] sm:$0xff] }
 0x170   : > { %1771 = vst [vmem:[%s3642_s4 + $0x140] sm:$0xff] %v1707_v25  ;;  %v1587_v9 = vmax.f32 %v1523_v41, 0.0  ;;  %v1484_v43 = vadd.f32 %v3274_v17, %v903_v60  ;;  %v3724_v32 = vadd.f32 %v739_v48, %v5270_v50  ;;  %v844_v38 = vsel %vm843_vm8, %v3617_v24, %v842_v30  ;;  %v2217_v41 = vld [vmem:[%s2508_s6 + $0x1c0] sm:$0xff]  ;;  %v3752_v30 = vpop.permute.xlu1 %540  ;;  %v3759_v48 = vpop.permute.xlu0 %538 }
 0x171   : > { %vm3717_vm10 = vcmp.eq.s32.totalorder %v5267_v56, 0  ;;  %v1990_v0 = vpop.eup %1989  ;;  %1763 = vst [vmem:[%s3642_s4 + $0x100] sm:$0xff] %v1699_v16  ;;  %vm1011_vm11 = vcmp.eq.f32.partialorder %v3663_v57, inf  ;;  %1997 = vrsqrt.f32 %v3708_v8  ;;  %v666_v60 = vsel %vm618_vm1, %v3492_v35, %v3703_v29  ;;  %v5271_v24 = vld [vmem:[#allocation69_spill] sm:$0xff] }
 0x172   : > { %v1723_v12 = vmul.f32 %v2217_v41, %v1659_v10  ;;  %v1651_v44 = vmul.f32 %v1990_v0, %v1587_v9  ;;  %v847_v19 = vsel %vm845_vm9, %v846_v20, %v844_v38  ;;  %vm1013_vm12 = vcmp.eq.f32.partialorder %v3663_v57, 0.0  ;;  %v5273_v9 = vld [vmem:[#allocation77_spill] sm:$0xff] }
 0x173   : > { %v1283_v25 = vadd.f32 1e-06, %v847_v19  ;;  %v1014_v6 = vand.u32 2147483648, %v3663_v57  ;;  %1999 = vrsqrt.f32 %v3724_v32  ;;  %v665_v34 = vsel %vm618_vm1, %v3494_v15, %v3713_v7 }
 0x174   : > { %v1992_v35 = vpop.eup %1991  ;;  %1787 = vst [vmem:[%s3642_s4 + $0x1c0] sm:$0xff] %v1723_v12  ;;  %v1715_v13 = vmul.f32 %v2218_v58, %v1651_v44  ;;  %v1548_v16 = vmax.f32 %v1484_v43, 0.0  ;;  %vm955_vm13 = vcmp.eq.f32.partialorder %v3675_v21, inf  ;;  %v763_v20 = vsel %vm3513_vm3, %v666_v60, %v5271_v24 }
 0x175   : > { %2001 = vrcp.f32 %v1283_v25  ;;  %v1010_v62 = vmul.f32 %v1992_v35, %v3663_v57  ;;  %vm957_vm14 = vcmp.eq.f32.partialorder %v3675_v21, 0.0  ;;  %v3757_v15 = vadd.f32 %v763_v20, %v5272_v42 }
 0x176   : > { %v1994_v56 = vpop.eup %1993  ;;  %1779 = vst [vmem:[%s3642_s4 + $0x180] sm:$0xff] %v1715_v13  ;;  %v958_v10 = vand.u32 2147483648, %v3675_v21  ;;  %vm1123_vm15 = vcmp.eq.f32.partialorder %v3708_v8, inf  ;;  %vm1125_vm0 = vcmp.eq.f32.partialorder %v3708_v8, 0.0  ;;  %v755_v43 = vsel %vm3513_vm3, %v665_v34, %v5273_v9 }
 0x177   : > { %v1996_v50 = vpop.eup %1995  ;;  %v1012_v0 = vsel %vm1011_vm11, %v3663_v57, %v1010_v62  ;;  %v954_v38 = vmul.f32 %v1994_v56, %v3675_v21  ;;  %2003 = vrsqrt.f32 %v3757_v15  ;;  %v652_v60 = vsel %vm618_vm1, %v3545_v39, %v3752_v30  ;;  %v5274_v39 = vld [vmem:[#allocation24_spill] sm:$0xff] }
 0x178   : > { %v1612_v41 = vmul.f32 %v1996_v50, %v1548_v16  ;;  %v1476_v12 = vadd.f32 %v3274_v17, %v847_v19  ;;  %v1015_v2 = vsel %vm1013_vm12, %v1014_v6, %v1012_v0  ;;  %v651_v44 = vsel %vm618_vm1, %v3558_v52, %v3759_v48  ;;  %v2219_v19 = vld [vmem:[%s2508_s6 + $0x48] sm:$0xff]  ;;  %v3798_v16 = vpop.permute.xlu1 %544 }
 0x179   : > { %v1307_v25 = vadd.f32 1e-06, %v1015_v2  ;;  %v956_v34 = vsel %vm955_vm13, %v3675_v21, %v954_v38  ;;  %v1126_v35 = vand.u32 2147483648, %v3708_v8  ;;  %v3789_v58 = vadd.f32 %v755_v43, %v5274_v39  ;;  %v5275_v6 = vld [vmem:[#allocation78_spill] sm:$0xff]  ;;  %v5276_v43 = vld [vmem:[#allocation25_spill] sm:$0xff] }
 0x17a   : > { %v1676_v13 = vmul.f32 %v2219_v19, %v1612_v41  ;;  %v959_v57 = vsel %vm957_vm14, %v958_v10, %v956_v34  ;;  %vm1067_vm3 = vcmp.eq.f32.partialorder %v3724_v32, inf  ;;  %v716_v52 = vsel %vm3717_vm10, %v652_v60, %v5275_v6  ;;  %v5277_v60 = vld [vmem:[#allocation26_spill] sm:$0xff] }
 0x17b   : > { %v1998_v24 = vpop.eup %1997  ;;  %2005 = vrcp.f32 %v1307_v25  ;;  %v1299_v20 = vadd.f32 1e-06, %v959_v57  ;;  %vm1069_vm2 = vcmp.eq.f32.partialorder %v3724_v32, 0.0  ;;  %v708_v62 = vsel %vm3717_vm10, %v651_v44, %v3260_v53 }
 0x17c   : > { %1740 = vst [vmem:[%s3642_s4 + $0x48] sm:$0xff] %v1676_v13  ;;  %v1540_v21 = vmax.f32 %v1476_v12, 0.0  ;;  %v1122_v42 = vmul.f32 %v1998_v24, %v3708_v8  ;;  %v1070_v56 = vand.u32 2147483648, %v3724_v32  ;;  %2007 = vrsqrt.f32 %v3789_v58  ;;  %v3841_v6 = vpop.permute.xlu1 %548 }
 0x17d   : > { %v2000_v10 = vpop.eup %1999  ;;  %v1500_v9 = vadd.f32 %v3274_v17, %v1015_v2  ;;  %2009 = vrcp.f32 %v1299_v20  ;;  %v3810_v50 = vadd.f32 %v716_v52, %v5276_v43  ;;  %v654_v53 = vsel %vm618_vm1, %v3627_v63, %v3798_v16  ;;  %v2220_v52 = vld [vmem:[%s2508_s6 + $0x8] sm:$0xff] }
 0x17e   : > { %v1124_v0 = vsel %vm1123_vm15, %v3708_v8, %v1122_v42  ;;  %v1066_v38 = vmul.f32 %v2000_v10, %v3724_v32  ;;  %vm1235_vm4 = vcmp.eq.f32.partialorder %v3757_v15, inf  ;;  %v3822_v41 = vadd.f32 %v708_v62, %v5277_v60 }
 0x17f   : > { %v2002_v12 = vpop.eup %2001  ;;  %v1492_v2 = vadd.f32 %v3274_v17, %v959_v57  ;;  %v1127_v44 = vsel %vm1125_vm0, %v1126_v35, %v1124_v0  ;;  %vm1237_vm5 = vcmp.eq.f32.partialorder %v3757_v15, 0.0  ;;  %2011 = vrsqrt.f32 %v3810_v50  ;;  %v3839_v35 = vpop.permute.xlu0 %542 }
 0x180   : > { %v1604_v63 = vmul.f32 %v2002_v12, %v1540_v21  ;;  %v1323_v25 = vadd.f32 1e-06, %v1127_v44  ;;  %v1068_v34 = vsel %vm1067_vm3, %v3724_v32, %v1066_v38  ;;  %v1238_v39 = vand.u32 2147483648, %v3757_v15 }
 0x181   : > { %v2004_v19 = vpop.eup %2003  ;;  %v1564_v13 = vmax.f32 %v1500_v9, 0.0  ;;  %v1071_v57 = vsel %vm1069_vm2, %v1070_v56, %v1068_v34  ;;  %2013 = vrsqrt.f32 %v3822_v41  ;;  %v732_v8 = vsel %vm3717_vm10, %v654_v53, %v3266_v45  ;;  %v5278_v45 = vld [vmem:[#allocation27_spill] sm:$0xff]  ;;  %v2221_v34 = vld [vmem:[%s2508_s6 + $0xc8] sm:$0xff] }
 0x182   : > { %v1668_v24 = vmul.f32 %v2220_v52, %v1604_v63  ;;  %2015 = vrcp.f32 %v1323_v25  ;;  %v1315_v20 = vadd.f32 1e-06, %v1071_v57  ;;  %vm1179_vm6 = vcmp.eq.f32.partialorder %v3789_v58, inf }
 0x183   : > { %v1556_v62 = vmax.f32 %v1492_v2, 0.0  ;;  %v1234_v32 = vmul.f32 %v2004_v19, %v3757_v15  ;;  %vm1181_vm7 = vcmp.eq.f32.partialorder %v3789_v58, 0.0  ;;  %v1182_v21 = vand.u32 2147483648, %v3789_v58 }
 0x184   : > { %1732 = vst [vmem:[%s3642_s4 + $0x8] sm:$0xff] %v1668_v24  ;;  %2017 = vrcp.f32 %v1315_v20  ;;  %v3850_v42 = vadd.f32 %v732_v8, %v5278_v45  ;;  %v653_v56 = vsel %vm618_vm1, %v3632_v49, %v3839_v35  ;;  %v656_v10 = vsel %vm618_vm1, %v3668_v4, %v3841_v6  ;;  %v5279_v4 = vld [vmem:[#allocation111_spill] sm:$0xff]  ;;  %v5281_v24 = vld [vmem:[#allocation29_spill] sm:$0xff] }
 0x185   : > { %v2006_v9 = vpop.eup %2005  ;;  %v1236_v43 = vsel %vm1235_vm4, %v3757_v15, %v1234_v32  ;;  %vm906_vm8 = vcmp.eq.f32.partialorder %v3810_v50, inf  ;;  %vm908_vm9 = vcmp.eq.f32.partialorder %v3810_v50, 0.0  ;;  %v724_v53 = vsel %vm3717_vm10, %v653_v56, %v3272_v37  ;;  %v2222_v32 = vld [vmem:[%s2508_s6 + $0x88] sm:$0xff] }
 0x186   : > { %v2008_v49 = vpop.eup %2007  ;;  %v1628_v0 = vmul.f32 %v2006_v9, %v1564_v13  ;;  %v1239_v38 = vsel %vm1237_vm5, %v1238_v39, %v1236_v43  ;;  %2019 = vrsqrt.f32 %v3850_v42  ;;  %v748_v60 = vsel %vm3717_vm10, %v656_v10, %v5279_v4  ;;  %v5280_v39 = vld [vmem:[#allocation28_spill] sm:$0xff]  ;;  %v3906_v4 = vpop.permute.xlu1 %552 }
 0x187   : > { %v2010_v12 = vpop.eup %2009  ;;  %v1516_v2 = vadd.f32 %v3274_v17, %v1127_v44  ;;  %v1339_v63 = vadd.f32 1e-06, %v1239_v38  ;;  %v1178_v25 = vmul.f32 %v2008_v49, %v3789_v58  ;;  %v909_v37 = vand.u32 2147483648, %v3810_v50 }
 0x188   : > { %v1692_v19 = vmul.f32 %v2221_v34, %v1628_v0  ;;  %v1620_v15 = vmul.f32 %v2010_v12, %v1556_v62  ;;  %vm850_vm11 = vcmp.eq.f32.partialorder %v3822_v41, inf  ;;  %v3880_v13 = vadd.f32 %v724_v53, %v5280_v39  ;;  %v3897_v53 = vpop.permute.xlu0 %546  ;;  %v2223_v34 = vld [vmem:[%s2508_s6 + $0x148] sm:$0xff] }
 0x189   : > { %v2012_v8 = vpop.eup %2011  ;;  %v1508_v52 = vadd.f32 %v3274_v17, %v1071_v57  ;;  %2021 = vrcp.f32 %v1339_v63  ;;  %v1180_v44 = vsel %vm1179_vm6, %v3789_v58, %v1178_v25  ;;  %v3887_v20 = vadd.f32 %v748_v60, %v5281_v24  ;;  %v2224_v24 = vld [vmem:[%s2508_s6 + $0x108] sm:$0xff] }
 0x18a   : > { %1756 = vst [vmem:[%s3642_s4 + $0xc8] sm:$0xff] %v1692_v19  ;;  %v1684_v62 = vmul.f32 %v2222_v32, %v1620_v15  ;;  %v1183_v45 = vsel %vm1181_vm7, %v1182_v21, %v1180_v44  ;;  %v905_v56 = vmul.f32 %v2012_v8, %v3810_v50  ;;  %2023 = vrsqrt.f32 %v3880_v13 }
 0x18b   : > { %v2014_v57 = vpop.eup %2013  ;;  %v1580_v10 = vmax.f32 %v1516_v2, 0.0  ;;  %v1331_v9 = vadd.f32 1e-06, %v1183_v45  ;;  %vm852_vm12 = vcmp.eq.f32.partialorder %v3822_v41, 0.0  ;;  %v853_v43 = vand.u32 2147483648, %v3822_v41 }
 0x18c   : > { %v2016_v49 = vpop.eup %2015  ;;  %1748 = vst [vmem:[%s3642_s4 + $0x88] sm:$0xff] %v1684_v62  ;;  %v1532_v0 = vadd.f32 %v3274_v17, %v1239_v38  ;;  %v907_v58 = vsel %vm906_vm8, %v3810_v50, %v905_v56  ;;  %v849_v21 = vmul.f32 %v2014_v57, %v3822_v41  ;;  %2025 = vrsqrt.f32 %v3887_v20  ;;  %v3928_v56 = vpop.permute.xlu0 %550 }
 0x18d   : > { %v1644_v60 = vmul.f32 %v2016_v49, %v1580_v10  ;;  %v1572_v12 = vmax.f32 %v1508_v52, 0.0  ;;  %2027 = vrcp.f32 %v1331_v9  ;;  %v910_v2 = vsel %vm908_vm9, %v909_v37, %v907_v58  ;;  %v3938_v10 = vpop.permute.xlu1 %556  ;;  %v5282_v49 = vld [vmem:[#allocation30_spill] sm:$0xff] }
 0x18e   : > { %v2018_v63 = vpop.eup %2017  ;;  %v1292_v38 = vadd.f32 1e-06, %v910_v2  ;;  %v851_v25 = vsel %vm850_vm11, %v3822_v41, %v849_v21  ;;  %vm1018_vm13 = vcmp.eq.f32.partialorder %v3850_v42, inf  ;;  %vm1020_vm14 = vcmp.eq.f32.partialorder %v3850_v42, 0.0 }
 0x18f   : > { %v1708_v19 = vmul.f32 %v2223_v34, %v1644_v60  ;;  %v1636_v15 = vmul.f32 %v2018_v63, %v1572_v12  ;;  %v854_v39 = vsel %vm852_vm12, %v853_v43, %v851_v25  ;;  %v1021_v50 = vand.u32 2147483648, %v3850_v42  ;;  %v5283_v60 = vld [vmem:[#allocation31_spill] sm:$0xff] }
 0x190   : > { %v2020_v37 = vpop.eup %2019  ;;  %v1596_v8 = vmax.f32 %v1532_v0, 0.0  ;;  %v1524_v52 = vadd.f32 %v3274_v17, %v1183_v45  ;;  %2029 = vrcp.f32 %v1292_v38  ;;  %v1284_v44 = vadd.f32 1e-06, %v854_v39  ;;  %v2234_v25 = vld [vmem:[%s2508_s6 + $0x190] sm:$0xff] }
 0x191   : > { %1772 = vst [vmem:[%s3642_s4 + $0x148] sm:$0xff] %v1708_v19  ;;  %v1700_v32 = vmul.f32 %v2224_v24, %v1636_v15  ;;  %v1017_v62 = vmul.f32 %v2020_v37, %v3850_v42  ;;  %vm962_vm15 = vcmp.eq.f32.partialorder %v3880_v13, inf  ;;  %v655_v41 = vsel %vm618_vm1, %v3677_v46, %v3897_v53  ;;  %v2225_v15 = vld [vmem:[%s2508_s6 + $0x1c8] sm:$0xff] }
 0x192   : > { %2031 = vrcp.f32 %v1284_v44  ;;  %vm964_vm0 = vcmp.eq.f32.partialorder %v3880_v13, 0.0  ;;  %v740_v45 = vsel %vm3717_vm10, %v655_v41, %v3287_v33  ;;  %v658_v57 = vsel %vm618_vm1, %v3703_v29, %v3906_v4  ;;  %v5287_v44 = vld [vmem:[#allocation112_spill] sm:$0xff]  ;;  %v3986_v41 = vpop.permute.xlu1 %560 }
 0x193   : > { %v2022_v9 = vpop.eup %2021  ;;  %1764 = vst [vmem:[%s3642_s4 + $0x108] sm:$0xff] %v1700_v32  ;;  %v1019_v46 = vsel %vm1018_vm13, %v3850_v42, %v1017_v62  ;;  %v965_v43 = vand.u32 2147483648, %v3880_v13  ;;  %v3946_v0 = vadd.f32 %v740_v45, %v5282_v49  ;;  %v764_v33 = vsel %vm3717_vm10, %v658_v57, %v3293_v40  ;;  %v3979_v32 = vpop.permute.xlu0 %554 }
 0x194   : > { %v2024_v58 = vpop.eup %2023  ;;  %v1660_v29 = vmul.f32 %v2022_v9, %v1596_v8  ;;  %v1022_v21 = vsel %vm1020_vm14, %v1021_v50, %v1019_v46  ;;  %v3954_v12 = vadd.f32 %v764_v33, %v5283_v60  ;;  %v657_v63 = vsel %vm618_vm1, %v3713_v7, %v3928_v56  ;;  %v2226_v46 = vld [vmem:[%s2508_s6 + $0x188] sm:$0xff]  ;;  %v5288_v33 = vld [vmem:[#allocation32_spill] sm:$0xff] }
 0x195   : > { %v5284_v38 = vand.u32 1, %v3411_v26  ;;  %v1485_v40 = vadd.f32 %v3274_v17, %v910_v2  ;;  %v1308_v34 = vadd.f32 1e-06, %v1022_v21  ;;  %v961_v42 = vmul.f32 %v2024_v58, %v3880_v13 }
 0x196   : > { %2033 = vrsqrt.f32 %v3946_v0  ;;  %v2026_v19 = vpop.eup %2025  ;;  %v1724_v50 = vmul.f32 %v2225_v15, %v1660_v29  ;;  %v1588_v37 = vmax.f32 %v1524_v52, 0.0  ;;  %v1477_v7 = vadd.f32 %v3274_v17, %v854_v39 }
 0x197   : > { %vm3962_vm3 = vcmp.eq.s32.totalorder %v5284_v38, 0  ;;  %vm1130_vm2 = vcmp.eq.f32.partialorder %v3887_v20, inf  ;;  %v2028_v26 = vpop.eup %2027  ;;  %2035 = vrcp.f32 %v1308_v34  ;;  %v963_v2 = vsel %vm962_vm15, %v3880_v13, %v961_v42 }
 0x198   : > { %v1129_v8 = vmul.f32 %v2026_v19, %v3887_v20  ;;  %v756_v24 = vsel %vm3717_vm10, %v657_v63, %v5287_v44  ;;  %1788 = vst [vmem:[%s3642_s4 + $0x1c8] sm:$0xff] %v1724_v50  ;;  %v1652_v52 = vmul.f32 %v2028_v26, %v1588_v37  ;;  %v966_v39 = vsel %vm964_vm0, %v965_v43, %v963_v2  ;;  %v4002_v19 = vpop.permute.xlu0 %558  ;;  %v4016_v26 = vpop.permute.xlu1 %564 }
 0x199   : > { %v1133_v62 = vand.u32 2147483648, %v3887_v20  ;;  %2037 = vrsqrt.f32 %v3954_v12  ;;  %v1549_v45 = vmax.f32 %v1485_v40, 0.0  ;;  %v1300_v57 = vadd.f32 1e-06, %v966_v39 }
 0x19a   : > { %v1131_v9 = vsel %vm1130_vm2, %v3887_v20, %v1129_v8  ;;  %vm1132_vm10 = vcmp.eq.f32.partialorder %v3887_v20, 0.0  ;;  %v2030_v28 = vpop.eup %2029  ;;  %v1716_v49 = vmul.f32 %v2226_v46, %v1652_v52  ;;  %v1501_v13 = vadd.f32 %v3274_v17, %v1022_v21  ;;  %v2227_v21 = vld [vmem:[%s2508_s6 + $0x50] sm:$0xff] }
 0x19b   : > { %v1134_v43 = vsel %vm1132_vm10, %v1133_v62, %v1131_v9  ;;  %v3993_v58 = vadd.f32 %v756_v24, %v5288_v33  ;;  %v1613_v29 = vmul.f32 %v2030_v28, %v1549_v45  ;;  %v1541_v60 = vmax.f32 %v1477_v7, 0.0  ;;  %v2228_v8 = vld [vmem:[%s2508_s6 + $0x10] sm:$0xff]  ;;  %v5289_v24 = vld [vmem:[#allocation113_spill] sm:$0xff]  ;;  %v5291_v62 = vld [vmem:[#allocation34_spill] sm:$0xff] }
 0x19c   : > { %2039 = vrcp.f32 %v1300_v57  ;;  %v1324_v63 = vadd.f32 1e-06, %v1134_v43  ;;  %v2032_v38 = vpop.eup %2031  ;;  %1780 = vst [vmem:[%s3642_s4 + $0x188] sm:$0xff] %v1716_v49  ;;  %vm1074_vm4 = vcmp.eq.f32.partialorder %v3946_v0, inf  ;;  %vm1076_vm5 = vcmp.eq.f32.partialorder %v3946_v0, 0.0 }
 0x19d   : > { %v1077_v20 = vand.u32 2147483648, %v3946_v0  ;;  %2041 = vrsqrt.f32 %v3993_v58  ;;  %v1677_v40 = vmul.f32 %v2227_v21, %v1613_v29  ;;  %v1605_v34 = vmul.f32 %v2032_v38, %v1541_v60  ;;  %v2229_v38 = vld [vmem:[%s2508_s6 + $0xd0] sm:$0xff] }
 0x19e   : > { %v1493_v42 = vadd.f32 %v3274_v17, %v966_v39  ;;  %2043 = vrcp.f32 %v1324_v63  ;;  %v1565_v15 = vmax.f32 %v1501_v13, 0.0  ;;  %v644_v50 = vsel %vm618_vm1, %v3752_v30, %v3938_v10  ;;  %v5290_v39 = vld [vmem:[#allocation33_spill] sm:$0xff]  ;;  %v4053_v63 = vpop.permute.xlu0 %562 }
 0x19f   : > { %v643_v37 = vsel %vm618_vm1, %v3759_v48, %v3979_v32  ;;  %v646_v7 = vsel %vm618_vm1, %v3798_v16, %v3986_v41  ;;  %1741 = vst [vmem:[%s3642_s4 + $0x50] sm:$0xff] %v1677_v40  ;;  %v1669_v44 = vmul.f32 %v2228_v8, %v1605_v34  ;;  %vm1242_vm6 = vcmp.eq.f32.partialorder %v3954_v12, inf }
 0x1a0   : > { %v2034_v2 = vpop.eup %2033  ;;  %v717_v30 = vsel %vm3962_vm3, %v644_v50, %v3325_v1  ;;  %v709_v48 = vsel %vm3962_vm3, %v643_v37, %v5289_v24  ;;  %v733_v57 = vsel %vm3962_vm3, %v646_v7, %v3341_v54  ;;  %v1557_v1 = vmax.f32 %v1493_v42, 0.0  ;;  %v4058_v42 = vpop.permute.xlu1 %568 }
 0x1a1   : > { %v1073_v52 = vmul.f32 %v2034_v2, %v3946_v0  ;;  %v4029_v16 = vadd.f32 %v717_v30, %v5290_v39  ;;  %v4032_v45 = vadd.f32 %v709_v48, %v5291_v62  ;;  %v2036_v9 = vpop.eup %2035  ;;  %1733 = vst [vmem:[%s3642_s4 + $0x10] sm:$0xff] %v1669_v44  ;;  %v1517_v28 = vadd.f32 %v3274_v17, %v1134_v43  ;;  %v5292_v43 = vld [vmem:[#allocation35_spill] sm:$0xff] }
 0x1a2   : > { %vm1244_vm7 = vcmp.eq.f32.partialorder %v3954_v12, 0.0  ;;  %v1245_v46 = vand.u32 2147483648, %v3954_v12  ;;  %v1629_v13 = vmul.f32 %v2036_v9, %v1565_v15  ;;  %vm1186_vm8 = vcmp.eq.f32.partialorder %v3993_v58, inf }
 0x1a3   : > { %v2038_v49 = vpop.eup %2037  ;;  %v1075_v33 = vsel %vm1074_vm4, %v3946_v0, %v1073_v52  ;;  %2045 = vrsqrt.f32 %v4029_v16  ;;  %vm1188_vm9 = vcmp.eq.f32.partialorder %v3993_v58, 0.0  ;;  %v4051_v60 = vadd.f32 %v733_v57, %v5292_v43  ;;  %v2231_v57 = vld [vmem:[%s2508_s6 + $0x150] sm:$0xff] }
 0x1a4   : > { %v1078_v54 = vsel %vm1076_vm5, %v1077_v20, %v1075_v33  ;;  %v1241_v29 = vmul.f32 %v2038_v49, %v3954_v12  ;;  %v1693_v21 = vmul.f32 %v2229_v38, %v1629_v13  ;;  %v1189_v34 = vand.u32 2147483648, %v3993_v58  ;;  %v5293_v13 = vld [vmem:[#allocation36_spill] sm:$0xff] }
 0x1a5   : > { %v1316_v40 = vadd.f32 1e-06, %v1078_v54  ;;  %2047 = vrsqrt.f32 %v4032_v45  ;;  %v1581_v20 = vmax.f32 %v1517_v28, 0.0  ;;  %v645_v50 = vsel %vm618_vm1, %v3839_v35, %v4002_v19 }
 0x1a6   : > { %v2040_v0 = vpop.eup %2039  ;;  %v1243_v15 = vsel %vm1242_vm6, %v3954_v12, %v1241_v29  ;;  %v648_v37 = vsel %vm618_vm1, %v3841_v6, %v4016_v26  ;;  %1757 = vst [vmem:[%s3642_s4 + $0xd0] sm:$0xff] %v1693_v21  ;;  %v647_v44 = vsel %vm618_vm1, %v3897_v53, %v4053_v63  ;;  %v650_v6 = vsel %vm618_vm1, %v3906_v4, %v4058_v42  ;;  %v2230_v12 = vld [vmem:[%s2508_s6 + $0x90] sm:$0xff]  ;;  %v4118_v21 = vpop.permute.xlu0 %566 }
 0x1a7   : > { %v2042_v7 = vpop.eup %2041  ;;  %v1621_v2 = vmul.f32 %v2040_v0, %v1557_v1  ;;  %2049 = vrcp.f32 %v1316_v40  ;;  %v1246_v8 = vsel %vm1244_vm7, %v1245_v46, %v1243_v15  ;;  %v1509_v39 = vadd.f32 %v3274_v17, %v1078_v54  ;;  %v5294_v54 = vld [vmem:[#allocation37_spill] sm:$0xff] }
 0x1a8   : > { %v2044_v35 = vpop.eup %2043  ;;  %v1340_v30 = vadd.f32 1e-06, %v1246_v8  ;;  %v1185_v24 = vmul.f32 %v2042_v7, %v3993_v58  ;;  %2051 = vrsqrt.f32 %v4051_v60  ;;  %vm913_vm11 = vcmp.eq.f32.partialorder %v4029_v16, inf }
 0x1a9   : > { %v1685_v48 = vmul.f32 %v2230_v12, %v1621_v2  ;;  %v1645_v52 = vmul.f32 %v2044_v35, %v1581_v20  ;;  %v1533_v53 = vadd.f32 %v3274_v17, %v1246_v8  ;;  %vm915_vm12 = vcmp.eq.f32.partialorder %v4029_v16, 0.0  ;;  %v5298_v8 = vld [vmem:[#allocation38_spill] sm:$0xff] }
 0x1aa   : > { %2053 = vrcp.f32 %v1340_v30  ;;  %v1187_v62 = vsel %vm1186_vm8, %v3993_v58, %v1185_v24  ;;  %v725_v1 = vsel %vm3962_vm3, %v645_v50, %v3347_v11  ;;  %v749_v28 = vsel %vm3962_vm3, %v648_v37, %v3359_v36  ;;  %v4129_v50 = vpop.permute.xlu1 %572 }
 0x1ab   : > { %1749 = vst [vmem:[%s3642_s4 + $0x90] sm:$0xff] %v1685_v48  ;;  %v1709_v4 = vmul.f32 %v2231_v57, %v1645_v52  ;;  %v1190_v9 = vsel %vm1188_vm9, %v1189_v34, %v1187_v62  ;;  %v916_v49 = vand.u32 2147483648, %v4029_v16  ;;  %v4104_v33 = vadd.f32 %v725_v1, %v5293_v13 }
 0x1ac   : > { %v1332_v46 = vadd.f32 1e-06, %v1190_v9  ;;  %v4107_v29 = vadd.f32 %v749_v28, %v5294_v54  ;;  %v1573_v58 = vmax.f32 %v1509_v39, 0.0  ;;  %vm857_vm13 = vcmp.eq.f32.partialorder %v4032_v45, inf }
 0x1ad   : > { %v2046_v43 = vpop.eup %2045  ;;  %1773 = vst [vmem:[%s3642_s4 + $0x150] sm:$0xff] %v1709_v4  ;;  %vm859_vm14 = vcmp.eq.f32.partialorder %v4032_v45, 0.0  ;;  %v860_v11 = vand.u32 2147483648, %v4032_v45  ;;  %vm1025_vm15 = vcmp.eq.f32.partialorder %v4051_v60, inf  ;;  %v741_v38 = vsel %vm3962_vm3, %v647_v44, %v3365_v3  ;;  %v5299_v4 = vld [vmem:[#allocation39_spill] sm:$0xff] }
 0x1ae   : > { %2055 = vrcp.f32 %v1332_v46  ;;  %v912_v36 = vmul.f32 %v2046_v43, %v4029_v16  ;;  %v1597_v34 = vmax.f32 %v1533_v53, 0.0  ;;  %v1525_v0 = vadd.f32 %v3274_v17, %v1190_v9  ;;  %v2232_v53 = vld [vmem:[%s2508_s6 + $0x110] sm:$0xff] }
 0x1af   : > { %v2048_v40 = vpop.eup %2047  ;;  %vm1027_vm0 = vcmp.eq.f32.partialorder %v4051_v60, 0.0  ;;  %2057 = vrsqrt.f32 %v4104_v33  ;;  %v5295_v20 = vand.u32 1, %v3442_v59  ;;  %v1028_v7 = vand.u32 2147483648, %v4051_v60 }
 0x1b0   : > { %v914_v3 = vsel %vm913_vm11, %v4029_v16, %v912_v36  ;;  %v856_v37 = vmul.f32 %v2048_v40, %v4032_v45  ;;  %2059 = vrsqrt.f32 %v4107_v29  ;;  %v4140_v44 = vadd.f32 %v741_v38, %v5298_v8  ;;  %v5300_v40 = vld [vmem:[#allocation40_spill] sm:$0xff]  ;;  %v4199_v8 = vpop.permute.xlu1 %576 }
 0x1b1   : > { %vm4125_vm2 = vcmp.eq.s32.totalorder %v5295_v20, 0  ;;  %v2050_v2 = vpop.eup %2049  ;;  %v917_v59 = vsel %vm915_vm12, %v916_v49, %v914_v3  ;;  %v765_v35 = vsel %vm3962_vm3, %v650_v6, %v3371_v14  ;;  %v649_v30 = vsel %vm618_vm1, %v3928_v56, %v4118_v21  ;;  %v2233_v49 = vld [vmem:[%s2508_s6 + $0x1d0] sm:$0xff] }
 0x1b2   : > { %v2052_v24 = vpop.eup %2051  ;;  %v1637_v12 = vmul.f32 %v2050_v2, %v1573_v58  ;;  %v1293_v48 = vadd.f32 1e-06, %v917_v59  ;;  %v858_v16 = vsel %vm857_vm13, %v4032_v45, %v856_v37  ;;  %v636_v52 = vsel %vm618_vm1, %v3938_v10, %v4129_v50 }
 0x1b3   : > { %v1589_v39 = vmax.f32 %v1525_v0, 0.0  ;;  %v861_v14 = vsel %vm859_vm14, %v860_v11, %v858_v16  ;;  %v1024_v6 = vmul.f32 %v2052_v24, %v4051_v60  ;;  %2061 = vrsqrt.f32 %v4140_v44  ;;  %v4188_v0 = vpop.permute.xlu0 %570 }
 0x1b4   : > { %v2054_v56 = vpop.eup %2053  ;;  %v1701_v62 = vmul.f32 %v2232_v53, %v1637_v12  ;;  %2063 = vrcp.f32 %v1293_v48  ;;  %v1285_v57 = vadd.f32 1e-06, %v861_v14  ;;  %v4162_v9 = vadd.f32 %v765_v35, %v5299_v4 }
 0x1b5   : > { %v1661_v1 = vmul.f32 %v2054_v56, %v1597_v34  ;;  %v1026_v10 = vsel %vm1025_vm15, %v4051_v60, %v1024_v6  ;;  %vm969_vm10 = vcmp.eq.f32.partialorder %v4104_v33, inf  ;;  %vm971_vm4 = vcmp.eq.f32.partialorder %v4104_v33, 0.0 }
 0x1b6   : > { %1765 = vst [vmem:[%s3642_s4 + $0x110] sm:$0xff] %v1701_v62  ;;  %v1486_v45 = vadd.f32 %v3274_v17, %v917_v59  ;;  %2065 = vrcp.f32 %v1285_v57  ;;  %v1029_v28 = vsel %vm1027_vm0, %v1028_v7, %v1026_v10  ;;  %v972_v46 = vand.u32 2147483648, %v4104_v33 }
 0x1b7   : > { %v1725_v13 = vmul.f32 %v2233_v49, %v1661_v1  ;;  %v1309_v54 = vadd.f32 1e-06, %v1029_v28  ;;  %vm1137_vm5 = vcmp.eq.f32.partialorder %v4107_v29, inf  ;;  %vm1139_vm6 = vcmp.eq.f32.partialorder %v4107_v29, 0.0  ;;  %v2235_v1 = vld [vmem:[%s2508_s6 + $0x58] sm:$0xff] }
 0x1b8   : > { %v2056_v43 = vpop.eup %2055  ;;  %v1140_v58 = vand.u32 2147483648, %v4107_v29  ;;  %vm1081_vm7 = vcmp.eq.f32.partialorder %v4140_v44, inf  ;;  %2067 = vrsqrt.f32 %v4162_v9  ;;  %v757_v60 = vsel %vm3962_vm3, %v649_v30, %v3377_v47  ;;  %v5301_v30 = vld [vmem:[#allocation41_spill] sm:$0xff] }
 0x1b9   : > { %v2058_v11 = vpop.eup %2057  ;;  %1789 = vst [vmem:[%s3642_s4 + $0x1d0] sm:$0xff] %v1725_v13  ;;  %v1653_v36 = vmul.f32 %v2056_v43, %v1589_v39  ;;  %v1478_v38 = vadd.f32 %v3274_v17, %v861_v14  ;;  %2069 = vrcp.f32 %v1309_v54  ;;  %v4186_v34 = vadd.f32 %v757_v60, %v5300_v40  ;;  %v5302_v13 = vld [vmem:[#allocation42_spill] sm:$0xff]  ;;  %v2236_v60 = vld [vmem:[%s2508_s6 + $0x18] sm:$0xff] }
 0x1ba   : > { %v2060_v20 = vpop.eup %2059  ;;  %v1550_v3 = vmax.f32 %v1486_v45, 0.0  ;;  %v968_v37 = vmul.f32 %v2058_v11, %v4104_v33  ;;  %vm1083_vm8 = vcmp.eq.f32.partialorder %v4140_v44, 0.0  ;;  %v718_v47 = vsel %vm4125_vm2, %v636_v52, %v3387_v18 }
 0x1bb   : > { %v1717_v7 = vmul.f32 %v2234_v25, %v1653_v36  ;;  %v1136_v2 = vmul.f32 %v2060_v20, %v4107_v29  ;;  %v1084_v59 = vand.u32 2147483648, %v4140_v44  ;;  %2071 = vrsqrt.f32 %v4186_v34  ;;  %v4259_v25 = vpop.permute.xlu1 %580 }
 0x1bc   : > { %v970_v35 = vsel %vm969_vm10, %v4104_v33, %v968_v37  ;;  %vm1249_vm3 = vcmp.eq.f32.partialorder %v4162_v9, inf  ;;  %v4206_v24 = vadd.f32 %v718_v47, %v5301_v30  ;;  %v635_v18 = vsel %vm618_vm1, %v3979_v32, %v4188_v0  ;;  %v5303_v30 = vld [vmem:[#allocation43_spill] sm:$0xff] }
 0x1bd   : > { %v2062_v12 = vpop.eup %2061  ;;  %1781 = vst [vmem:[%s3642_s4 + $0x190] sm:$0xff] %v1717_v7  ;;  %v1542_v48 = vmax.f32 %v1478_v38, 0.0  ;;  %v1502_v16 = vadd.f32 %v3274_v17, %v1029_v28  ;;  %v973_v52 = vsel %vm971_vm4, %v972_v46, %v970_v35  ;;  %v1138_v39 = vsel %vm1137_vm5, %v4107_v29, %v1136_v2  ;;  %v2237_v7 = vld [vmem:[%s2508_s6 + $0xd8] sm:$0xff] }
 0x1be   : > { %v2064_v14 = vpop.eup %2063  ;;  %v1301_v6 = vadd.f32 1e-06, %v973_v52  ;;  %v1141_v56 = vsel %vm1139_vm6, %v1140_v58, %v1138_v39  ;;  %v1080_v32 = vmul.f32 %v2062_v12, %v4140_v44  ;;  %v638_v53 = vsel %vm618_vm1, %v3986_v41, %v4199_v8 }
 0x1bf   : > { %v1614_v62 = vmul.f32 %v2064_v14, %v1550_v3  ;;  %v1325_v33 = vadd.f32 1e-06, %v1141_v56  ;;  %2073 = vrsqrt.f32 %v4206_v24  ;;  %v710_v57 = vsel %vm4125_vm2, %v635_v18, %v3393_v23 }
 0x1c0   : > { %v2066_v4 = vpop.eup %2065  ;;  %2075 = vrcp.f32 %v1301_v6  ;;  %v1082_v29 = vsel %vm1081_vm7, %v4140_v44, %v1080_v32  ;;  %vm1251_vm9 = vcmp.eq.f32.partialorder %v4162_v9, 0.0  ;;  %v1252_v41 = vand.u32 2147483648, %v4162_v9  ;;  %v4249_v44 = vpop.permute.xlu0 %574 }
 0x1c1   : > { %v1678_v10 = vmul.f32 %v2235_v1, %v1614_v62  ;;  %v1606_v45 = vmul.f32 %v2066_v4, %v1542_v48  ;;  %v1494_v28 = vadd.f32 %v3274_v17, %v973_v52  ;;  %2077 = vrcp.f32 %v1325_v33 }
 0x1c2   : > { %v2068_v46 = vpop.eup %2067  ;;  %v1566_v23 = vmax.f32 %v1502_v16, 0.0  ;;  %v1085_v49 = vsel %vm1083_vm8, %v1084_v59, %v1082_v29  ;;  %v4240_v54 = vadd.f32 %v710_v57, %v5302_v13  ;;  %v734_v43 = vsel %vm4125_vm2, %v638_v53, %v3399_v22 }
 0x1c3   : > { %v2070_v58 = vpop.eup %2069  ;;  %1742 = vst [vmem:[%s3642_s4 + $0x58] sm:$0xff] %v1678_v10  ;;  %v1670_v11 = vmul.f32 %v2236_v60, %v1606_v45  ;;  %v1518_v36 = vadd.f32 %v3274_v17, %v1141_v56  ;;  %v1317_v38 = vadd.f32 1e-06, %v1085_v49  ;;  %v1248_v40 = vmul.f32 %v2068_v46, %v4162_v9  ;;  %v2238_v10 = vld [vmem:[%s2508_s6 + $0x98] sm:$0xff] }
 0x1c4   : > { %v1630_v20 = vmul.f32 %v2070_v58, %v1566_v23  ;;  %vm1193_vm11 = vcmp.eq.f32.partialorder %v4186_v34, inf  ;;  %vm1195_vm12 = vcmp.eq.f32.partialorder %v4186_v34, 0.0  ;;  %2079 = vrsqrt.f32 %v4240_v54  ;;  %v4287_v56 = vpop.permute.xlu0 %578  ;;  %v2239_v23 = vld [vmem:[%s2508_s6 + $0x158] sm:$0xff] }
 0x1c5   : > { %v2072_v22 = vpop.eup %2071  ;;  %1734 = vst [vmem:[%s3642_s4 + $0x18] sm:$0xff] %v1670_v11  ;;  %v1558_v3 = vmax.f32 %v1494_v28, 0.0  ;;  %2081 = vrcp.f32 %v1317_v38  ;;  %v1250_v37 = vsel %vm1249_vm3, %v4162_v9, %v1248_v40  ;;  %v1196_v47 = vand.u32 2147483648, %v4186_v34 }
 0x1c6   : > { %v1694_v2 = vmul.f32 %v2237_v7, %v1630_v20  ;;  %v1253_v59 = vsel %vm1251_vm9, %v1252_v41, %v1250_v37  ;;  %v1192_v35 = vmul.f32 %v2072_v22, %v4186_v34  ;;  %v4266_v18 = vadd.f32 %v734_v43, %v5303_v30  ;;  %v5306_v20 = vld [vmem:[#allocation46_spill] sm:$0xff]  ;;  %v2240_v7 = vld [vmem:[%s2508_s6 + $0x118] sm:$0xff] }
 0x1c7   : > { %v1582_v12 = vmax.f32 %v1518_v36, 0.0  ;;  %v1341_v48 = vadd.f32 1e-06, %v1253_v59  ;;  %vm920_vm13 = vcmp.eq.f32.partialorder %v4206_v24, inf  ;;  %v637_v16 = vsel %vm618_vm1, %v4002_v19, %v4249_v44  ;;  %v5305_v36 = vld [vmem:[#allocation45_spill] sm:$0xff] }
 0x1c8   : > { %1758 = vst [vmem:[%s3642_s4 + $0xd8] sm:$0xff] %v1694_v2  ;;  %v1194_v9 = vsel %vm1193_vm11, %v4186_v34, %v1192_v35  ;;  %vm922_vm14 = vcmp.eq.f32.partialorder %v4206_v24, 0.0  ;;  %2083 = vrsqrt.f32 %v4266_v18  ;;  %v640_v52 = vsel %vm618_vm1, %v4016_v26, %v4259_v25  ;;  %v5304_v34 = vld [vmem:[#allocation44_spill] sm:$0xff] }
 0x1c9   : > { %v2074_v39 = vpop.eup %2073  ;;  %v1510_v14 = vadd.f32 %v3274_v17, %v1085_v49  ;;  %2085 = vrcp.f32 %v1341_v48  ;;  %v1197_v19 = vsel %vm1195_vm12, %v1196_v47, %v1194_v9  ;;  %v923_v6 = vand.u32 2147483648, %v4206_v24  ;;  %v4334_v47 = vpop.permute.xlu1 %584 }
 0x1ca   : > { %v2076_v32 = vpop.eup %2075  ;;  %v1333_v53 = vadd.f32 1e-06, %v1197_v19  ;;  %v919_v62 = vmul.f32 %v2074_v39, %v4206_v24  ;;  %vm864_vm15 = vcmp.eq.f32.partialorder %v4240_v54, inf  ;;  %v726_v26 = vsel %vm4125_vm2, %v637_v16, %v3462_v27 }
 0x1cb   : > { %v2078_v33 = vpop.eup %2077  ;;  %v1622_v57 = vmul.f32 %v2076_v32, %v1558_v3  ;;  %vm866_vm0 = vcmp.eq.f32.partialorder %v4240_v54, 0.0  ;;  %v4296_v4 = vadd.f32 %v726_v26, %v5304_v34  ;;  %v750_v29 = vsel %vm4125_vm2, %v640_v52, %v3468_v31  ;;  %v4343_v52 = vpop.permute.xlu0 %582 }
 0x1cc   : > { %v1646_v41 = vmul.f32 %v2078_v33, %v1582_v12  ;;  %2087 = vrcp.f32 %v1333_v53  ;;  %v921_v1 = vsel %vm920_vm13, %v4206_v24, %v919_v62  ;;  %v639_v27 = vsel %vm618_vm1, %v4053_v63, %v4287_v56  ;;  %v2241_v62 = vld [vmem:[%s2508_s6 + $0x1d8] sm:$0xff] }
 0x1cd   : > { %v1686_v45 = vmul.f32 %v2238_v10, %v1622_v57  ;;  %v1534_v28 = vadd.f32 %v3274_v17, %v1253_v59  ;;  %v924_v31 = vsel %vm922_vm14, %v923_v6, %v921_v1  ;;  %2089 = vrsqrt.f32 %v4296_v4  ;;  %v5307_v6 = vld [vmem:[#allocation81_spill] sm:$0xff]  ;;  %v5309_v10 = vld [vmem:[#allocation82_spill] sm:$0xff] }
 0x1ce   : > { %v2080_v46 = vpop.eup %2079  ;;  %v1710_v49 = vmul.f32 %v2239_v23, %v1646_v41  ;;  %v1574_v13 = vmax.f32 %v1510_v14, 0.0  ;;  %v1294_v43 = vadd.f32 1e-06, %v924_v31  ;;  %v867_v58 = vand.u32 2147483648, %v4240_v54 }
 0x1cf   : > { %v2082_v60 = vpop.eup %2081  ;;  %1750 = vst [vmem:[%s3642_s4 + $0x98] sm:$0xff] %v1686_v45  ;;  %v1526_v63 = vadd.f32 %v3274_v17, %v1197_v19  ;;  %v863_v11 = vmul.f32 %v2080_v46, %v4240_v54  ;;  %v4319_v38 = vadd.f32 %v750_v29, %v5305_v36  ;;  %v742_v24 = vsel %vm4125_vm2, %v639_v27, %v3478_v61 }
 0x1d0   : > { %1774 = vst [vmem:[%s3642_s4 + $0x158] sm:$0xff] %v1710_v49  ;;  %v1638_v40 = vmul.f32 %v2082_v60, %v1574_v13  ;;  %2091 = vrcp.f32 %v1294_v43  ;;  %vm1032_vm10 = vcmp.eq.f32.partialorder %v4266_v18, inf  ;;  %v4327_v22 = vadd.f32 %v742_v24, %v5306_v20  ;;  %v5310_v43 = vld [vmem:[#allocation48_spill] sm:$0xff] }
 0x1d1   : > { %v1598_v3 = vmax.f32 %v1534_v28, 0.0  ;;  %v865_v37 = vsel %vm864_vm15, %v4240_v54, %v863_v11  ;;  %vm1034_vm4 = vcmp.eq.f32.partialorder %v4266_v18, 0.0  ;;  %2093 = vrsqrt.f32 %v4319_v38  ;;  %v4377_v28 = vpop.permute.xlu1 %588 }
 0x1d2   : > { %v2084_v61 = vpop.eup %2083  ;;  %v1702_v2 = vmul.f32 %v2240_v7, %v1638_v40  ;;  %v868_v59 = vsel %vm866_vm0, %v867_v58, %v865_v37  ;;  %v1035_v35 = vand.u32 2147483648, %v4266_v18  ;;  %2095 = vrsqrt.f32 %v4327_v22  ;;  %v4398_v37 = vpop.permute.xlu0 %586 }
 0x1d3   : > { %v2086_v30 = vpop.eup %2085  ;;  %v1590_v12 = vmax.f32 %v1526_v63, 0.0  ;;  %v1487_v48 = vadd.f32 %v3274_v17, %v924_v31  ;;  %v1286_v16 = vadd.f32 1e-06, %v868_v59  ;;  %v1031_v9 = vmul.f32 %v2084_v61, %v4266_v18  ;;  %v2243_v61 = vld [vmem:[%s2508_s6 + $0x60] sm:$0xff] }
 0x1d4   : > { %1766 = vst [vmem:[%s3642_s4 + $0x118] sm:$0xff] %v1702_v2  ;;  %v1662_v39 = vmul.f32 %v2086_v30, %v1598_v3  ;;  %vm976_vm5 = vcmp.eq.f32.partialorder %v4296_v4, inf  ;;  %vm978_vm6 = vcmp.eq.f32.partialorder %v4296_v4, 0.0  ;;  %v642_v54 = vsel %vm618_vm1, %v4058_v42, %v4334_v47  ;;  %v5308_v42 = vld [vmem:[#allocation47_spill] sm:$0xff] }
 0x1d5   : > { %2097 = vrcp.f32 %v1286_v16  ;;  %v1033_v14 = vsel %vm1032_vm10, %v4266_v18, %v1031_v9  ;;  %v979_v19 = vand.u32 2147483648, %v4296_v4  ;;  %v766_v32 = vsel %vm4125_vm2, %v642_v54, %v5307_v6  ;;  %v4407_v30 = vpop.permute.xlu1 %592 }
 0x1d6   : > { %v2088_v53 = vpop.eup %2087  ;;  %v1726_v26 = vmul.f32 %v2241_v62, %v1662_v39  ;;  %v1036_v33 = vsel %vm1034_vm4, %v1035_v35, %v1033_v14  ;;  %v4363_v57 = vadd.f32 %v766_v32, %v5308_v42  ;;  %v641_v34 = vsel %vm618_vm1, %v4118_v21, %v4343_v52  ;;  %v2242_v21 = vld [vmem:[%s2508_s6 + $0x198] sm:$0xff]  ;;  %v2244_v62 = vld [vmem:[%s2508_s6 + $0x20] sm:$0xff]  ;;  %v5313_v42 = vld [vmem:[#allocation83_spill] sm:$0xff] }
 0x1d7   : > { %v2090_v29 = vpop.eup %2089  ;;  %v1654_v41 = vmul.f32 %v2088_v53, %v1590_v12  ;;  %v1551_v1 = vmax.f32 %v1487_v48, 0.0  ;;  %v1310_v27 = vadd.f32 1e-06, %v1036_v33  ;;  %v758_v45 = vsel %vm4125_vm2, %v641_v34, %v5309_v10 }
 0x1d8   : > { %1790 = vst [vmem:[%s3642_s4 + $0x1d8] sm:$0xff] %v1726_v26  ;;  %v975_v18 = vmul.f32 %v2090_v29, %v4296_v4  ;;  %vm1144_vm7 = vcmp.eq.f32.partialorder %v4319_v38, inf  ;;  %vm1146_vm8 = vcmp.eq.f32.partialorder %v4319_v38, 0.0  ;;  %2099 = vrsqrt.f32 %v4363_v57  ;;  %v4439_v29 = vpop.permute.xlu0 %590 }
 0x1d9   : > { %v1718_v31 = vmul.f32 %v2242_v21, %v1654_v41  ;;  %v1479_v46 = vadd.f32 %v3274_v17, %v868_v59  ;;  %2101 = vrcp.f32 %v1310_v27  ;;  %v1147_v15 = vand.u32 2147483648, %v4319_v38  ;;  %v5316_v21 = vld [vmem:[#allocation85_spill] sm:$0xff] }
 0x1da   : > { %v2092_v23 = vpop.eup %2091  ;;  %v1503_v49 = vadd.f32 %v3274_v17, %v1036_v33  ;;  %v977_v13 = vsel %vm976_vm5, %v4296_v4, %v975_v18  ;;  %vm1088_vm2 = vcmp.eq.f32.partialorder %v4327_v22, inf  ;;  %v4388_v58 = vadd.f32 %v758_v45, %v5310_v43  ;;  %v5315_v45 = vld [vmem:[#allocation84_spill] sm:$0xff] }
 0x1db   : > { %v2094_v60 = vpop.eup %2093  ;;  %1782 = vst [vmem:[%s3642_s4 + $0x198] sm:$0xff] %v1718_v31  ;;  %v1615_v63 = vmul.f32 %v2092_v23, %v1551_v1  ;;  %v980_v11 = vsel %vm978_vm6, %v979_v19, %v977_v13  ;;  %vm1090_vm3 = vcmp.eq.f32.partialorder %v4327_v22, 0.0  ;;  %v687_v36 = vadd.s32 640, %v2966_v51  ;;  %v4463_v23 = vpop.permute.xlu1 %596  ;;  %v2245_v13 = vld [vmem:[%s2508_s6 + $0xe0] sm:$0xff] }
 0x1dc   : > { %v2096_v24 = vpop.eup %2095  ;;  %v1302_v40 = vadd.f32 1e-06, %v980_v11  ;;  %v1143_v20 = vmul.f32 %v2094_v60, %v4319_v38  ;;  %v1091_v3 = vand.u32 2147483648, %v4327_v22  ;;  %2103 = vrsqrt.f32 %v4388_v58 }
 0x1dd   : > { %v1679_v7 = vmul.f32 %v2243_v61, %v1615_v63  ;;  %v1543_v2 = vmax.f32 %v1479_v46, 0.0  ;;  %v1087_v4 = vmul.f32 %v2096_v24, %v4327_v22  ;;  %vm1256_vm9 = vcmp.eq.f32.partialorder %v4363_v57, inf }
 0x1de   : > { %v1567_v59 = vmax.f32 %v1503_v49, 0.0  ;;  %2105 = vrcp.f32 %v1302_v40  ;;  %v1145_v35 = vsel %vm1144_vm7, %v4319_v38, %v1143_v20  ;;  %vm1258_vm11 = vcmp.eq.f32.partialorder %v4363_v57, 0.0 }
 0x1df   : > { %v2098_v12 = vpop.eup %2097  ;;  %1743 = vst [vmem:[%s3642_s4 + $0x60] sm:$0xff] %v1679_v7  ;;  %v1148_v48 = vsel %vm1146_vm8, %v1147_v15, %v1145_v35  ;;  %v1089_v16 = vsel %vm1088_vm2, %v4327_v22, %v1087_v4  ;;  %v695_v9 = vand.u32 1, %v687_v36  ;;  %v628_v39 = vsel %vm618_vm1, %v4129_v50, %v4377_v28  ;;  %v5319_v35 = vld [vmem:[#allocation86_spill] sm:$0xff] }
 0x1e0   : > { %v1607_v54 = vmul.f32 %v2098_v12, %v1543_v2  ;;  %v1326_v14 = vadd.f32 1e-06, %v1148_v48  ;;  %v1092_v19 = vsel %vm1090_vm3, %v1091_v3, %v1089_v16  ;;  %v1259_v6 = vand.u32 2147483648, %v4363_v57  ;;  %v5318_v3 = vld [vmem:[#allocation51_spill] sm:$0xff] }
 0x1e1   : > { %v1318_v32 = vadd.f32 1e-06, %v1092_v19  ;;  %vm4422_vm12 = vcmp.eq.s32.totalorder %v695_v9, 0  ;;  %v627_v53 = vsel %vm618_vm1, %v4188_v0, %v4398_v37  ;;  %v630_v50 = vsel %vm618_vm1, %v4199_v8, %v4407_v30  ;;  %v5314_v8 = vld [vmem:[#allocation49_spill] sm:$0xff] }
 0x1e2   : > { %v2100_v22 = vpop.eup %2099  ;;  %v1671_v26 = vmul.f32 %v2244_v62, %v1607_v54  ;;  %v1495_v33 = vadd.f32 %v3274_v17, %v980_v11  ;;  %2107 = vrcp.f32 %v1326_v14  ;;  %v719_v34 = vsel %vm4422_vm12, %v628_v39, %v5313_v42  ;;  %v5317_v11 = vld [vmem:[#allocation50_spill] sm:$0xff]  ;;  %v5322_v42 = vld [vmem:[#allocation53_spill] sm:$0xff] }
 0x1e3   : > { %v2102_v41 = vpop.eup %2101  ;;  %2109 = vrcp.f32 %v1318_v32  ;;  %v1255_v0 = vmul.f32 %v2100_v22, %v4363_v57  ;;  %vm1200_vm13 = vcmp.eq.f32.partialorder %v4388_v58, inf  ;;  %v4444_v1 = vadd.f32 %v719_v34, %v5314_v8 }
 0x1e4   : > { %1735 = vst [vmem:[%s3642_s4 + $0x20] sm:$0xff] %v1671_v26  ;;  %v1631_v27 = vmul.f32 %v2102_v41, %v1567_v59  ;;  %v1519_v10 = vadd.f32 %v3274_v17, %v1148_v48  ;;  %v711_v18 = vsel %vm4422_vm12, %v627_v53, %v5315_v45  ;;  %v735_v31 = vsel %vm4422_vm12, %v630_v50, %v5316_v21  ;;  %v4489_v48 = vpop.permute.xlu0 %594  ;;  %v5321_v50 = vld [vmem:[#allocation87_spill] sm:$0xff] }
 0x1e5   : > { %v1257_v46 = vsel %vm1256_vm9, %v4363_v57, %v1255_v0  ;;  %vm1202_vm14 = vcmp.eq.f32.partialorder %v4388_v58, 0.0  ;;  %2111 = vrsqrt.f32 %v4444_v1  ;;  %v629_v15 = vsel %vm618_vm1, %v4249_v44, %v4439_v29 }
 0x1e6   : > { %v2104_v49 = vpop.eup %2103  ;;  %v1695_v43 = vmul.f32 %v2245_v13, %v1631_v27  ;;  %v1511_v60 = vadd.f32 %v3274_v17, %v1092_v19  ;;  %v1260_v63 = vsel %vm1258_vm11, %v1259_v6, %v1257_v46  ;;  %v4470_v36 = vadd.f32 %v711_v18, %v5317_v11  ;;  %v4498_v19 = vpop.permute.xlu1 %600 }
 0x1e7   : > { %v1559_v24 = vmax.f32 %v1495_v33, 0.0  ;;  %v1342_v40 = vadd.f32 1e-06, %v1260_v63  ;;  %v1199_v20 = vmul.f32 %v2104_v49, %v4388_v58  ;;  %v4474_v61 = vadd.f32 %v735_v31, %v5318_v3  ;;  %v2248_v31 = vld [vmem:[%s2508_s6 + $0x120] sm:$0xff]  ;;  %v5323_v49 = vld [vmem:[#allocation88_spill] sm:$0xff] }
 0x1e8   : > { %v2106_v44 = vpop.eup %2105  ;;  %1759 = vst [vmem:[%s3642_s4 + $0xe0] sm:$0xff] %v1695_v43  ;;  %v1583_v7 = vmax.f32 %v1519_v10, 0.0  ;;  %v1203_v2 = vand.u32 2147483648, %v4388_v58  ;;  %2113 = vrsqrt.f32 %v4470_v36  ;;  %v632_v57 = vsel %vm618_vm1, %v4259_v25, %v4463_v23  ;;  %v2246_v25 = vld [vmem:[%s2508_s6 + $0xa0] sm:$0xff]  ;;  %v4526_v21 = vpop.permute.xlu0 %598 }
 0x1e9   : > { %v1623_v4 = vmul.f32 %v2106_v44, %v1559_v24  ;;  %2115 = vrcp.f32 %v1342_v40  ;;  %v1201_v59 = vsel %vm1200_vm13, %v4388_v58, %v1199_v20  ;;  %v727_v12 = vsel %vm4422_vm12, %v629_v15, %v5319_v35  ;;  %v5320_v58 = vld [vmem:[#allocation52_spill] sm:$0xff]  ;;  %v2247_v10 = vld [vmem:[%s2508_s6 + $0x160] sm:$0xff]  ;;  %v5325_v40 = vld [vmem:[#allocation54_spill] sm:$0xff] }
 0x1ea   : > { %v1575_v16 = vmax.f32 %v1511_v60, 0.0  ;;  %v1204_v9 = vsel %vm1202_vm14, %v1203_v2, %v1201_v59  ;;  %vm927_vm15 = vcmp.eq.f32.partialorder %v4444_v1, inf  ;;  %2117 = vrsqrt.f32 %v4474_v61  ;;  %v5324_v43 = vld [vmem:[#allocation89_spill] sm:$0xff] }
 0x1eb   : > { %v1687_v39 = vmul.f32 %v2246_v25, %v1623_v4  ;;  %v1334_v54 = vadd.f32 1e-06, %v1204_v9  ;;  %vm929_vm0 = vcmp.eq.f32.partialorder %v4444_v1, 0.0  ;;  %v930_v14 = vand.u32 2147483648, %v4444_v1 }
 0x1ec   : > { %v2108_v6 = vpop.eup %2107  ;;  %v1535_v32 = vadd.f32 %v3274_v17, %v1260_v63  ;;  %vm871_vm10 = vcmp.eq.f32.partialorder %v4470_v36, inf  ;;  %v4503_v53 = vadd.f32 %v727_v12, %v5320_v58  ;;  %v751_v22 = vsel %vm4422_vm12, %v632_v57, %v5321_v50  ;;  %v5326_v12 = vld [vmem:[#allocation55_spill] sm:$0xff] }
 0x1ed   : > { %v2110_v62 = vpop.eup %2109  ;;  %1751 = vst [vmem:[%s3642_s4 + $0xa0] sm:$0xff] %v1687_v39  ;;  %v1647_v26 = vmul.f32 %v2108_v6, %v1583_v7  ;;  %2119 = vrcp.f32 %v1334_v54  ;;  %v1527_v33 = vadd.f32 %v3274_v17, %v1204_v9  ;;  %v4511_v34 = vadd.f32 %v751_v22, %v5322_v42  ;;  %v5327_v9 = vld [vmem:[#allocation90_spill] sm:$0xff]  ;;  %v2249_v39 = vld [vmem:[%s2508_s6 + $0x1e0] sm:$0xff] }
 0x1ee   : > { %v1639_v41 = vmul.f32 %v2110_v62, %v1575_v16  ;;  %2121 = vrsqrt.f32 %v4503_v53  ;;  %v631_v0 = vsel %vm618_vm1, %v4287_v56, %v4489_v48  ;;  %v634_v8 = vsel %vm618_vm1, %v4334_v47, %v4498_v19 }
 0x1ef   : > { %v2112_v27 = vpop.eup %2111  ;;  %v1711_v45 = vmul.f32 %v2247_v10, %v1647_v26  ;;  %vm873_vm4 = vcmp.eq.f32.partialorder %v4470_v36, 0.0  ;;  %v874_v18 = vand.u32 2147483648, %v4470_v36  ;;  %2123 = vrsqrt.f32 %v4511_v34  ;;  %v5328_v26 = vld [vmem:[#allocation56_spill] sm:$0xff] }
 0x1f0   : > { %v1703_v46 = vmul.f32 %v2248_v31, %v1639_v41  ;;  %v1599_v56 = vmax.f32 %v1535_v32, 0.0  ;;  %v926_v15 = vmul.f32 %v2112_v27, %v4444_v1  ;;  %vm1039_vm5 = vcmp.eq.f32.partialorder %v4474_v61, inf  ;;  %v2250_v27 = vld [vmem:[%s2508_s6 + $0x1a0] sm:$0xff] }
 0x1f1   : > { %1775 = vst [vmem:[%s3642_s4 + $0x160] sm:$0xff] %v1711_v45  ;;  %vm1041_vm6 = vcmp.eq.f32.partialorder %v4474_v61, 0.0  ;;  %v1042_v47 = vand.u32 2147483648, %v4474_v61  ;;  %v743_v13 = vsel %vm4422_vm12, %v631_v0, %v5323_v49  ;;  %v767_v60 = vsel %vm4422_vm12, %v634_v8, %v5324_v43 }
 0x1f2   : > { %v2114_v63 = vpop.eup %2113  ;;  %1767 = vst [vmem:[%s3642_s4 + $0x120] sm:$0xff] %v1703_v46  ;;  %v1591_v11 = vmax.f32 %v1527_v33, 0.0  ;;  %v928_v24 = vsel %vm927_vm15, %v4444_v1, %v926_v15  ;;  %v4545_v20 = vadd.f32 %v743_v13, %v5325_v40  ;;  %v633_v3 = vsel %vm618_vm1, %v4343_v52, %v4526_v21 }
 0x1f3   : > { %v2116_v44 = vpop.eup %2115  ;;  %v931_v7 = vsel %vm929_vm0, %v930_v14, %v928_v24  ;;  %v870_v2 = vmul.f32 %v2114_v63, %v4470_v36  ;;  %vm983_vm7 = vcmp.eq.f32.partialorder %v4503_v53, inf  ;;  %v986_v57 = vand.u32 2147483648, %v4503_v53 }
 0x1f4   : > { %v2118_v4 = vpop.eup %2117  ;;  %v1663_v59 = vmul.f32 %v2116_v44, %v1599_v56  ;;  %v1295_v35 = vadd.f32 1e-06, %v931_v7  ;;  %vm985_vm8 = vcmp.eq.f32.partialorder %v4503_v53, 0.0  ;;  %2125 = vrsqrt.f32 %v4545_v20 }
 0x1f5   : > { %v4559_v52 = vadd.f32 %v767_v60, %v5326_v12  ;;  %v872_v1 = vsel %vm871_vm10, %v4470_v36, %v870_v2  ;;  %v1038_v16 = vmul.f32 %v2118_v4, %v4474_v61  ;;  %vm1151_vm2 = vcmp.eq.f32.partialorder %v4511_v34, inf }
 0x1f6   : > { %v759_v25 = vsel %vm4422_vm12, %v633_v3, %v5327_v9  ;;  %v1727_v54 = vmul.f32 %v2249_v39, %v1663_v59  ;;  %2127 = vrcp.f32 %v1295_v35  ;;  %v875_v14 = vsel %vm873_vm4, %v874_v18, %v872_v1  ;;  %v5334_v9 = vld [vmem:[#allocation91_spill] sm:$0xff] }
 0x1f7   : > { %vm1153_vm3 = vcmp.eq.f32.partialorder %v4511_v34, 0.0  ;;  %v2120_v6 = vpop.eup %2119  ;;  %v1488_v32 = vadd.f32 %v3274_v17, %v931_v7  ;;  %v1287_v58 = vadd.f32 1e-06, %v875_v14  ;;  %v1040_v50 = vsel %vm1039_vm5, %v4474_v61, %v1038_v16  ;;  %v5335_v39 = vld [vmem:[#allocation99_spill] sm:$0xff] }
 0x1f8   : > { %v1154_v38 = vand.u32 2147483648, %v4511_v34  ;;  %v2122_v22 = vpop.eup %2121  ;;  %1791 = vst [vmem:[%s3642_s4 + $0x1e0] sm:$0xff] %v1727_v54  ;;  %v1655_v62 = vmul.f32 %v2120_v6, %v1591_v11  ;;  %v1043_v36 = vsel %vm1041_vm6, %v1042_v47, %v1040_v50  ;;  %2129 = vrsqrt.f32 %v4559_v52  ;;  %v605_v47 = vpop.permute.xlu1 %604 }
 0x1f9   : > { %v4583_v33 = vadd.f32 %v759_v25, %v5328_v26  ;;  %v2124_v42 = vpop.eup %2123  ;;  %2131 = vrcp.f32 %v1287_v58  ;;  %v1311_v41 = vadd.f32 1e-06, %v1043_v36  ;;  %v688_v0 = vadd.s32 768, %v2966_v51  ;;  %v5337_v26 = vld [vmem:[#allocation65_spill] sm:$0xff] }
 0x1fa   : > { %v689_v8 = vadd.s32 896, %v2966_v51  ;;  %v1719_v10 = vmul.f32 %v2250_v27, %v1655_v62  ;;  %v1480_v45 = vadd.f32 %v3274_v17, %v875_v14  ;;  %v982_v61 = vmul.f32 %v2122_v22, %v4503_v53  ;;  %v603_v14 = vpop.permute.xlu0 %602  ;;  %v5336_v62 = vld [vmem:[#allocation57_spill] sm:$0xff] }
 0x1fb   : > { %v1150_v18 = vmul.f32 %v2124_v42, %v4511_v34  ;;  %v1552_v31 = vmax.f32 %v1488_v32, 0.0  ;;  %2133 = vrcp.f32 %v1311_v41  ;;  %vm1095_vm9 = vcmp.eq.f32.partialorder %v4545_v20, inf  ;;  %v2251_v32 = vld [vmem:[%s2508_s6 + $0x68] sm:$0xff] }
 0x1fc   : > { %vm1097_vm11 = vcmp.eq.f32.partialorder %v4545_v20, 0.0  ;;  %1783 = vst [vmem:[%s3642_s4 + $0x1a0] sm:$0xff] %v1719_v10  ;;  %v1504_v46 = vadd.f32 %v3274_v17, %v1043_v36  ;;  %v984_v56 = vsel %vm983_vm7, %v4503_v53, %v982_v61  ;;  %2135 = vrsqrt.f32 %v4583_v33 }
 0x1fd   : > { %v1152_v15 = vsel %vm1151_vm2, %v4511_v34, %v1150_v18  ;;  %v987_v49 = vsel %vm985_vm8, %v986_v57, %v984_v56  ;;  %v1098_v43 = vand.u32 2147483648, %v4545_v20  ;;  %v696_v60 = vand.u32 1, %v688_v0  ;;  %v5331_v57 = vld [vmem:[#allocation107_spill] sm:$0xff] }
 0x1fe   : > { %v1155_v13 = vsel %vm1153_vm3, %v1154_v38, %v1152_v15  ;;  %v2126_v63 = vpop.eup %2125  ;;  %v1544_v11 = vmax.f32 %v1480_v45, 0.0  ;;  %v1303_v24 = vadd.f32 1e-06, %v987_v49  ;;  %vm1263_vm12 = vcmp.eq.f32.partialorder %v4559_v52, inf  ;;  %v2252_v45 = vld [vmem:[%s2508_s6 + $0x28] sm:$0xff] }
 0x1ff   : > { %v1327_v40 = vadd.f32 1e-06, %v1155_v13  ;;  %v1094_v3 = vmul.f32 %v2126_v63, %v4545_v20  ;;  %v697_v44 = vand.u32 1, %v689_v8  ;;  %vm4609_vm13 = vcmp.eq.s32.totalorder %v696_v60, 0 }
 0x200   : > { %v620_v53 = vsel %vm618_vm1, %v4377_v28, %v605_v47  ;;  %v2128_v34 = vpop.eup %2127  ;;  %v1568_v2 = vmax.f32 %v1504_v46, 0.0  ;;  %2137 = vrcp.f32 %v1303_v24  ;;  %vm1265_vm14 = vcmp.eq.f32.partialorder %v4559_v52, 0.0 }
 0x201   : > { %v676_v4 = vsel %vm618_vm1, %v605_v47, %v5331_v57  ;;  %v1616_v59 = vmul.f32 %v2128_v34, %v1552_v31  ;;  %2139 = vrcp.f32 %v1327_v40  ;;  %v1096_v35 = vsel %vm1095_vm9, %v4545_v20, %v1094_v3  ;;  %v5338_v47 = vld [vmem:[#allocation108_spill] sm:$0xff]  ;;  %v609_v34 = vpop.permute.xlu1 %608 }
 0x202   : > { %vm4623_vm15 = vcmp.eq.s32.totalorder %v697_v44, 0  ;;  %v2130_v28 = vpop.eup %2129  ;;  %v1099_v1 = vsel %vm1097_vm11, %v1098_v43, %v1096_v35  ;;  %v1266_v16 = vand.u32 2147483648, %v4559_v52  ;;  %v720_v25 = vsel %vm4609_vm13, %v620_v53, %v5334_v9  ;;  %v5340_v44 = vld [vmem:[#allocation100_spill] sm:$0xff]  ;;  %v5341_v35 = vld [vmem:[#allocation58_spill] sm:$0xff] }
 0x203   : > { %v721_v54 = vsel %vm4623_vm15, %v676_v4, %v5335_v39  ;;  %v2132_v6 = vpop.eup %2131  ;;  %v1680_v58 = vmul.f32 %v2251_v32, %v1616_v59  ;;  %v1319_v50 = vadd.f32 1e-06, %v1099_v1  ;;  %v1262_v20 = vmul.f32 %v2130_v28, %v4559_v52 }
 0x204   : > { %vm1207_vm0 = vcmp.eq.f32.partialorder %v4583_v33, inf  ;;  %v1608_v38 = vmul.f32 %v2132_v6, %v1544_v11  ;;  %v1496_v22 = vadd.f32 %v3274_v17, %v987_v49  ;;  %v4641_v36 = vadd.f32 %v720_v25, %v5336_v62  ;;  %v2254_v25 = vld [vmem:[%s2508_s6 + $0xa8] sm:$0xff]  ;;  %v5343_v62 = vld [vmem:[#allocation93_spill] sm:$0xff] }
 0x205   : > { %v4644_v42 = vadd.f32 %v721_v54, %v5337_v26  ;;  %v2134_v41 = vpop.eup %2133  ;;  %1744 = vst [vmem:[%s3642_s4 + $0x68] sm:$0xff] %v1680_v58  ;;  %v1520_v0 = vadd.f32 %v3274_v17, %v1155_v13  ;;  %2141 = vrcp.f32 %v1319_v50  ;;  %v1264_v8 = vsel %vm1263_vm12, %v4559_v52, %v1262_v20  ;;  %v5339_v52 = vld [vmem:[#allocation92_spill] sm:$0xff]  ;;  %v2255_v6 = vld [vmem:[%s2508_s6 + $0x168] sm:$0xff]  ;;  %v607_v50 = vpop.permute.xlu0 %606 }
 0x206   : > { %v619_v27 = vsel %vm618_vm1, %v4398_v37, %v603_v14  ;;  %v2136_v10 = vpop.eup %2135  ;;  %v1672_v61 = vmul.f32 %v2252_v45, %v1608_v38  ;;  %v1632_v18 = vmul.f32 %v2134_v41, %v1568_v2  ;;  %v1267_v31 = vsel %vm1265_vm14, %v1266_v16, %v1264_v8  ;;  %v2253_v37 = vld [vmem:[%s2508_s6 + $0xe8] sm:$0xff]  ;;  %v5344_v41 = vld [vmem:[#allocation101_spill] sm:$0xff]  ;;  %v5346_v45 = vld [vmem:[#allocation67_spill] sm:$0xff] }
 0x207   : > { %2143 = vrsqrt.f32 %v4641_v36  ;;  %v1343_v46 = vadd.f32 1e-06, %v1267_v31  ;;  %v1206_v56 = vmul.f32 %v2136_v10, %v4583_v33  ;;  %v1210_v15 = vand.u32 2147483648, %v4583_v33  ;;  %v5342_v16 = vld [vmem:[#allocation66_spill] sm:$0xff] }
 0x208   : > { %v675_v49 = vsel %vm618_vm1, %v603_v14, %v5338_v47  ;;  %1736 = vst [vmem:[%s3642_s4 + $0x28] sm:$0xff] %v1672_v61  ;;  %v1696_v13 = vmul.f32 %v2253_v37, %v1632_v18  ;;  %v1512_v43 = vadd.f32 %v3274_v17, %v1099_v1  ;;  %2145 = vrsqrt.f32 %v4644_v42 }
 0x209   : > { %v712_v60 = vsel %vm4609_vm13, %v619_v27, %v5339_v52  ;;  %v1560_v63 = vmax.f32 %v1496_v22, 0.0  ;;  %2147 = vrcp.f32 %v1343_v46  ;;  %v1208_v11 = vsel %vm1207_vm0, %v4583_v33, %v1206_v56  ;;  %v5345_v27 = vld [vmem:[#allocation59_spill] sm:$0xff]  ;;  %v2256_v46 = vld [vmem:[%s2508_s6 + $0x128] sm:$0xff] }
 0x20a   : > { %vm1209_vm10 = vcmp.eq.f32.partialorder %v4583_v33, 0.0  ;;  %v2138_v24 = vpop.eup %2137  ;;  %1760 = vst [vmem:[%s3642_s4 + $0xe8] sm:$0xff] %v1696_v13  ;;  %v1584_v40 = vmax.f32 %v1520_v0, 0.0  ;;  %v713_v53 = vsel %vm4623_vm15, %v675_v49, %v5340_v44  ;;  %v1536_v4 = vadd.f32 %v3274_v17, %v1267_v31  ;;  %v5347_v49 = vld [vmem:[#allocation109_spill] sm:$0xff] }
 0x20b   : > { %v1211_v3 = vsel %vm1209_vm10, %v1210_v15, %v1208_v11  ;;  %v2140_v2 = vpop.eup %2139  ;;  %v1624_v57 = vmul.f32 %v2138_v24, %v1560_v63  ;;  %v4680_v28 = vadd.f32 %v712_v60, %v5341_v35  ;;  %v1576_v1 = vmax.f32 %v1512_v43, 0.0  ;;  %v5348_v63 = vld [vmem:[#allocation94_spill] sm:$0xff] }
 0x20c   : > { %v1335_v59 = vadd.f32 1e-06, %v1211_v3  ;;  %v1648_v33 = vmul.f32 %v2140_v2, %v1584_v40  ;;  %vm934_vm4 = vcmp.eq.f32.partialorder %v4641_v36, inf  ;;  %v4684_v9 = vadd.f32 %v713_v53, %v5342_v16  ;;  %v2257_v53 = vld [vmem:[%s2508_s6 + $0x1e8] sm:$0xff]  ;;  %v5350_v16 = vld [vmem:[#allocation60_spill] sm:$0xff] }
 0x20d   : > { %v1688_v39 = vmul.f32 %v2254_v25, %v1624_v57  ;;  %v622_v54 = vsel %vm618_vm1, %v4407_v30, %v609_v34  ;;  %v678_v14 = vsel %vm618_vm1, %v609_v34, %v3173_v5  ;;  %v1528_v58 = vadd.f32 %v3274_v17, %v1211_v3  ;;  %v5349_v3 = vld [vmem:[#allocation102_spill] sm:$0xff] }
 0x20e   : > { %2149 = vrcp.f32 %v1335_v59  ;;  %v1712_v32 = vmul.f32 %v2255_v6, %v1648_v33  ;;  %vm936_vm5 = vcmp.eq.f32.partialorder %v4641_v36, 0.0  ;;  %v1600_v38 = vmax.f32 %v1536_v4, 0.0 }
 0x20f   : > { %2151 = vrsqrt.f32 %v4680_v28  ;;  %v2142_v20 = vpop.eup %2141  ;;  %1752 = vst [vmem:[%s3642_s4 + $0xa8] sm:$0xff] %v1688_v39  ;;  %v937_v22 = vand.u32 2147483648, %v4641_v36  ;;  %vm941_vm6 = vcmp.eq.f32.partialorder %v4644_v42, inf  ;;  %vm943_vm7 = vcmp.eq.f32.partialorder %v4644_v42, 0.0 }
 0x210   : > { %2153 = vrsqrt.f32 %v4684_v9  ;;  %1776 = vst [vmem:[%s3642_s4 + $0x168] sm:$0xff] %v1712_v32  ;;  %v1640_v30 = vmul.f32 %v2142_v20, %v1576_v1  ;;  %v736_v26 = vsel %vm4609_vm13, %v622_v54, %v5343_v62  ;;  %v737_v0 = vsel %vm4623_vm15, %v678_v14, %v5344_v41 }
 0x211   : > { %v2144_v5 = vpop.eup %2143  ;;  %v4711_v10 = vadd.f32 %v736_v26, %v5345_v27  ;;  %v4714_v61 = vadd.f32 %v737_v0, %v5346_v45  ;;  %v621_v18 = vsel %vm618_vm1, %v4439_v29, %v607_v50  ;;  %v1592_v15 = vmax.f32 %v1528_v58, 0.0  ;;  %v2258_v58 = vld [vmem:[%s2508_s6 + $0x1a8] sm:$0xff] }
 0x212   : > { %v933_v8 = vmul.f32 %v2144_v5, %v4641_v36  ;;  %v2146_v31 = vpop.eup %2145  ;;  %v1704_v56 = vmul.f32 %v2256_v46, %v1640_v30  ;;  %v944_v47 = vand.u32 2147483648, %v4644_v42  ;;  %v677_v37 = vsel %vm618_vm1, %v607_v50, %v5347_v49 }
 0x213   : > { %v2148_v13 = vpop.eup %2147  ;;  %v940_v52 = vmul.f32 %v2146_v31, %v4644_v42  ;;  %vm878_vm8 = vcmp.eq.f32.partialorder %v4680_v28, inf  ;;  %2155 = vrsqrt.f32 %v4711_v10  ;;  %vm880_vm2 = vcmp.eq.f32.partialorder %v4680_v28, 0.0 }
 0x214   : > { %v935_v43 = vsel %vm934_vm4, %v4641_v36, %v933_v8  ;;  %1768 = vst [vmem:[%s3642_s4 + $0x128] sm:$0xff] %v1704_v56  ;;  %v1664_v29 = vmul.f32 %v2148_v13, %v1600_v38  ;;  %v728_v11 = vsel %vm4609_vm13, %v621_v18, %v5348_v63  ;;  %2157 = vrsqrt.f32 %v4714_v61  ;;  %v613_v36 = vpop.permute.xlu1 %612  ;;  %v5352_v18 = vld [vmem:[#allocation95_spill] sm:$0xff] }
 0x215   : > { %v938_v60 = vsel %vm936_vm5, %v937_v22, %v935_v43  ;;  %v942_v24 = vsel %vm941_vm6, %v4644_v42, %v940_v52  ;;  %v729_v44 = vsel %vm4623_vm15, %v677_v37, %v5349_v3  ;;  %v881_v57 = vand.u32 2147483648, %v4680_v28  ;;  %v5351_v42 = vld [vmem:[#allocation68_spill] sm:$0xff]  ;;  %v5355_v52 = vld [vmem:[#allocation71_spill] sm:$0xff] }
 0x216   : > { %v1296_v40 = vadd.f32 1e-06, %v938_v60  ;;  %v1728_v34 = vmul.f32 %v2257_v53, %v1664_v29  ;;  %v945_v2 = vsel %vm943_vm7, %v944_v47, %v942_v24  ;;  %vm885_vm3 = vcmp.eq.f32.partialorder %v4684_v9, inf }
 0x217   : > { %v1297_v59 = vadd.f32 1e-06, %v945_v2  ;;  %vm887_vm9 = vcmp.eq.f32.partialorder %v4684_v9, 0.0  ;;  %v888_v35 = vand.u32 2147483648, %v4684_v9  ;;  %v4753_v25 = vadd.f32 %v728_v11, %v5350_v16 }
 0x218   : > { %v2150_v4 = vpop.eup %2149  ;;  %2159 = vrcp.f32 %v1296_v40  ;;  %1792 = vst [vmem:[%s3642_s4 + $0x1e8] sm:$0xff] %v1728_v34  ;;  %v4756_v39 = vadd.f32 %v729_v44, %v5351_v42  ;;  %v624_v54 = vsel %vm618_vm1, %v4463_v23, %v613_v36  ;;  %v1489_v6 = vadd.f32 %v3274_v17, %v938_v60  ;;  %v2259_v34 = vld [vmem:[%s2508_s6 + $0x70] sm:$0xff] }
 0x219   : > { %v2152_v33 = vpop.eup %2151  ;;  %v1656_v1 = vmul.f32 %v2150_v4, %v1592_v15  ;;  %2161 = vrcp.f32 %v1297_v59  ;;  %vm1046_vm11 = vcmp.eq.f32.partialorder %v4711_v10, inf  ;;  %vm1048_vm12 = vcmp.eq.f32.partialorder %v4711_v10, 0.0  ;;  %v5354_v15 = vld [vmem:[#allocation61_spill] sm:$0xff]  ;;  %v611_v4 = vpop.permute.xlu0 %610 }
 0x21a   : > { %v2154_v14 = vpop.eup %2153  ;;  %v877_v32 = vmul.f32 %v2152_v33, %v4680_v28  ;;  %2163 = vrsqrt.f32 %v4753_v25  ;;  %v1490_v38 = vadd.f32 %v3274_v17, %v945_v2  ;;  %v1049_v22 = vand.u32 2147483648, %v4711_v10  ;;  %v2260_v33 = vld [vmem:[%s2508_s6 + $0x78] sm:$0xff] }
 0x21b   : > { %v1720_v50 = vmul.f32 %v2258_v58, %v1656_v1  ;;  %v884_v20 = vmul.f32 %v2154_v14, %v4684_v9  ;;  %2165 = vrsqrt.f32 %v4756_v39  ;;  %vm1053_vm14 = vcmp.eq.f32.partialorder %v4714_v61, inf }
 0x21c   : > { %v879_v23 = vsel %vm878_vm8, %v4680_v28, %v877_v32  ;;  %v680_v62 = vsel %vm618_vm1, %v613_v36, %v3181_v55  ;;  %v1553_v41 = vmax.f32 %v1489_v6, 0.0  ;;  %vm1055_vm0 = vcmp.eq.f32.partialorder %v4714_v61, 0.0  ;;  %v5353_v55 = vld [vmem:[#allocation103_spill] sm:$0xff] }
 0x21d   : > { %1784 = vst [vmem:[%s3642_s4 + $0x1a8] sm:$0xff] %v1720_v50  ;;  %v882_v5 = vsel %vm880_vm2, %v881_v57, %v879_v23  ;;  %v886_v30 = vsel %vm885_vm3, %v4684_v9, %v884_v20  ;;  %v2156_v26 = vpop.eup %2155  ;;  %v1056_v45 = vand.u32 2147483648, %v4714_v61  ;;  %v752_v31 = vsel %vm4609_vm13, %v624_v54, %v5352_v18  ;;  %v5356_v50 = vld [vmem:[#allocation110_spill] sm:$0xff]  ;;  %v5360_v18 = vld [vmem:[#allocation72_spill] sm:$0xff] }
 0x21e   : > { %v889_v0 = vsel %vm887_vm9, %v888_v35, %v886_v30  ;;  %v1288_v8 = vadd.f32 1e-06, %v882_v5  ;;  %v1045_v27 = vmul.f32 %v2156_v26, %v4711_v10  ;;  %v2158_v46 = vpop.eup %2157  ;;  %v1554_v56 = vmax.f32 %v1490_v38, 0.0  ;;  %v5357_v38 = vld [vmem:[#allocation96_spill] sm:$0xff] }
 0x21f   : > { %v1289_v28 = vadd.f32 1e-06, %v889_v0  ;;  %v753_v9 = vsel %vm4623_vm15, %v680_v62, %v5353_v55  ;;  %v4796_v47 = vadd.f32 %v752_v31, %v5354_v15  ;;  %v1052_v37 = vmul.f32 %v2158_v46, %v4714_v61  ;;  %v2261_v46 = vld [vmem:[%s2508_s6 + $0x30] sm:$0xff] }
 0x220   : > { %2167 = vrcp.f32 %v1288_v8  ;;  %v1047_v49 = vsel %vm1046_vm11, %v4711_v10, %v1045_v27  ;;  %vm990_vm10 = vcmp.eq.f32.partialorder %v4753_v25, inf  ;;  %vm992_vm4 = vcmp.eq.f32.partialorder %v4753_v25, 0.0  ;;  %v5359_v8 = vld [vmem:[#allocation62_spill] sm:$0xff] }
 0x221   : > { %2169 = vrcp.f32 %v1289_v28  ;;  %v1050_v43 = vsel %vm1048_vm12, %v1049_v22, %v1047_v49  ;;  %v4807_v29 = vadd.f32 %v753_v9, %v5355_v52  ;;  %v1481_v63 = vadd.f32 %v3274_v17, %v882_v5  ;;  %v2262_v49 = vld [vmem:[%s2508_s6 + $0x38] sm:$0xff] }
 0x222   : > { %v2160_v13 = vpop.eup %2159  ;;  %2171 = vrsqrt.f32 %v4796_v47  ;;  %v1054_v11 = vsel %vm1053_vm14, %v4714_v61, %v1052_v37  ;;  %v1312_v24 = vadd.f32 1e-06, %v1050_v43  ;;  %v1482_v10 = vadd.f32 %v3274_v17, %v889_v0 }
 0x223   : > { %v1617_v60 = vmul.f32 %v2160_v13, %v1553_v41  ;;  %v2162_v40 = vpop.eup %2161  ;;  %v1057_v3 = vsel %vm1055_vm0, %v1056_v45, %v1054_v11  ;;  %v993_v44 = vand.u32 2147483648, %v4753_v25  ;;  %2173 = vrsqrt.f32 %v4807_v29 }
 0x224   : > { %v2164_v36 = vpop.eup %2163  ;;  %v1618_v53 = vmul.f32 %v2162_v40, %v1554_v56  ;;  %v1313_v57 = vadd.f32 1e-06, %v1057_v3  ;;  %2175 = vrcp.f32 %v1312_v24  ;;  %vm997_vm5 = vcmp.eq.f32.partialorder %v4756_v39, inf }
 0x225   : > { %v1681_v2 = vmul.f32 %v2259_v34, %v1617_v60  ;;  %v2166_v59 = vpop.eup %2165  ;;  %v989_v35 = vmul.f32 %v2164_v36, %v4753_v25  ;;  %vm999_vm6 = vcmp.eq.f32.partialorder %v4756_v39, 0.0  ;;  %v1000_v61 = vand.u32 2147483648, %v4756_v39 }
 0x226   : > { %v1682_v1 = vmul.f32 %v2260_v33, %v1618_v53  ;;  %v1545_v16 = vmax.f32 %v1481_v63, 0.0  ;;  %2177 = vrcp.f32 %v1313_v57  ;;  %v996_v42 = vmul.f32 %v2166_v59, %v4756_v39  ;;  %v617_v63 = vpop.permute.xlu1 %616  ;;  %v2264_v33 = vld [vmem:[%s2508_s6 + $0xf8] sm:$0xff] }
 0x227   : > { %1745 = vst [vmem:[%s3642_s4 + $0x70] sm:$0xff] %v1681_v2  ;;  %v1546_v54 = vmax.f32 %v1482_v10, 0.0  ;;  %v991_v14 = vsel %vm990_vm10, %v4753_v25, %v989_v35  ;;  %vm1158_vm7 = vcmp.eq.f32.partialorder %v4796_v47, inf  ;;  %v623_v6 = vsel %vm618_vm1, %v4489_v48, %v611_v4  ;;  %v5358_v25 = vld [vmem:[#allocation104_spill] sm:$0xff]  ;;  %v615_v2 = vpop.permute.xlu0 %614 }
 0x228   : > { %1746 = vst [vmem:[%s3642_s4 + $0x78] sm:$0xff] %v1682_v1  ;;  %v994_v32 = vsel %vm992_vm4, %v993_v44, %v991_v14  ;;  %v998_v58 = vsel %vm997_vm5, %v4756_v39, %v996_v42  ;;  %v679_v20 = vsel %vm618_vm1, %v611_v4, %v5356_v50  ;;  %v744_v23 = vsel %vm4609_vm13, %v623_v6, %v5357_v38  ;;  %v2263_v4 = vld [vmem:[%s2508_s6 + $0xf0] sm:$0xff] }
 0x229   : > { %v1505_v5 = vadd.f32 %v3274_v17, %v1050_v43  ;;  %v1001_v48 = vsel %vm999_vm6, %v1000_v61, %v998_v58  ;;  %v1304_v30 = vadd.f32 1e-06, %v994_v32  ;;  %v745_v62 = vsel %vm4623_vm15, %v679_v20, %v5358_v25  ;;  %v5364_v58 = vld [vmem:[#allocation63_spill] sm:$0xff]  ;;  %v5367_v25 = vld [vmem:[#allocation98_spill] sm:$0xff] }
 0x22a   : > { %v2168_v22 = vpop.eup %2167  ;;  %v1305_v0 = vadd.f32 1e-06, %v1001_v48  ;;  %vm1160_vm8 = vcmp.eq.f32.partialorder %v4796_v47, 0.0  ;;  %v4852_v28 = vadd.f32 %v744_v23, %v5359_v8  ;;  %v1506_v39 = vadd.f32 %v3274_v17, %v1057_v3  ;;  %v5365_v23 = vld [vmem:[#allocation75_spill] sm:$0xff] }
 0x22b   : > { %v2170_v26 = vpop.eup %2169  ;;  %v1609_v41 = vmul.f32 %v2168_v22, %v1545_v16  ;;  %2179 = vrcp.f32 %v1304_v30  ;;  %v4856_v31 = vadd.f32 %v745_v62, %v5360_v18  ;;  %v1161_v9 = vand.u32 2147483648, %v4796_v47  ;;  %v5361_v16 = vld [vmem:[#allocation74_spill] sm:$0xff]  ;;  %v2266_v18 = vld [vmem:[%s2508_s6 + $0xb8] sm:$0xff] }
 0x22c   : > { %v2172_v27 = vpop.eup %2171  ;;  %v1610_v45 = vmul.f32 %v2170_v26, %v1546_v54  ;;  %2181 = vrcp.f32 %v1305_v0  ;;  %v1569_v13 = vmax.f32 %v1505_v5, 0.0  ;;  %vm1165_vm2 = vcmp.eq.f32.partialorder %v4807_v29, inf  ;;  %v5362_v54 = vld [vmem:[#allocation97_spill] sm:$0xff] }
 0x22d   : > { %v1673_v56 = vmul.f32 %v2261_v46, %v1609_v41  ;;  %v1157_v55 = vmul.f32 %v2172_v27, %v4796_v47  ;;  %v2174_v15 = vpop.eup %2173  ;;  %2183 = vrsqrt.f32 %v4852_v28  ;;  %vm1167_vm3 = vcmp.eq.f32.partialorder %v4807_v29, 0.0  ;;  %v2265_v27 = vld [vmem:[%s2508_s6 + $0xb0] sm:$0xff] }
 0x22e   : > { %v1674_v37 = vmul.f32 %v2262_v49, %v1610_v45  ;;  %v2176_v43 = vpop.eup %2175  ;;  %v1164_v60 = vmul.f32 %v2174_v15, %v4807_v29  ;;  %2185 = vrsqrt.f32 %v4856_v31  ;;  %v1570_v11 = vmax.f32 %v1506_v39, 0.0  ;;  %v5369_v15 = vld [vmem:[#allocation64_spill] sm:$0xff] }
 0x22f   : > { %1737 = vst [vmem:[%s3642_s4 + $0x30] sm:$0xff] %v1673_v56  ;;  %v1159_v52 = vsel %vm1158_vm7, %v4796_v47, %v1157_v55  ;;  %v1633_v24 = vmul.f32 %v2176_v43, %v1569_v13  ;;  %v1168_v10 = vand.u32 2147483648, %v4807_v29  ;;  %v1497_v44 = vadd.f32 %v3274_v17, %v994_v32  ;;  %v5368_v55 = vld [vmem:[#allocation106_spill] sm:$0xff] }
 0x230   : > { %1738 = vst [vmem:[%s3642_s4 + $0x38] sm:$0xff] %v1674_v37  ;;  %v1162_v40 = vsel %vm1160_vm8, %v1161_v9, %v1159_v52  ;;  %v2178_v3 = vpop.eup %2177  ;;  %v1498_v36 = vadd.f32 %v3274_v17, %v1001_v48  ;;  %v1166_v53 = vsel %vm1165_vm2, %v4807_v29, %v1164_v60  ;;  %v626_v35 = vsel %vm618_vm1, %v4498_v19, %v617_v63  ;;  %v5363_v19 = vld [vmem:[#allocation105_spill] sm:$0xff]  ;;  %v5366_v48 = vld [vmem:[#allocation70_spill] sm:$0xff] }
 0x231   : > { %v1328_v34 = vadd.f32 1e-06, %v1162_v40  ;;  %v1634_v57 = vmul.f32 %v2178_v3, %v1570_v11  ;;  %v1697_v59 = vmul.f32 %v2263_v4, %v1633_v24  ;;  %v1169_v47 = vsel %vm1167_vm3, %v1168_v10, %v1166_v53  ;;  %v5370_v24 = vld [vmem:[#allocation76_spill] sm:$0xff] }
 0x232   : > { %v1329_v61 = vadd.f32 1e-06, %v1169_v47  ;;  %v682_v42 = vsel %vm618_vm1, %v617_v63, %v5361_v16  ;;  %v768_v14 = vsel %vm4609_vm13, %v626_v35, %v5362_v54  ;;  %v625_v29 = vsel %vm618_vm1, %v4526_v21, %v615_v2 }
 0x233   : > { %2187 = vrcp.f32 %v1328_v34  ;;  %v1698_v1 = vmul.f32 %v2264_v33, %v1634_v57  ;;  %1761 = vst [vmem:[%s3642_s4 + $0xf0] sm:$0xff] %v1697_v59  ;;  %v1561_v6 = vmax.f32 %v1497_v44, 0.0  ;;  %v769_v32 = vsel %vm4623_vm15, %v682_v42, %v5363_v19  ;;  %v2268_v57 = vld [vmem:[%s2508_s6 + $0x178] sm:$0xff] }
 0x234   : > { %2189 = vrcp.f32 %v1329_v61  ;;  %v4901_v50 = vadd.f32 %v768_v14, %v5364_v58  ;;  %v1562_v38 = vmax.f32 %v1498_v36, 0.0  ;;  %vm1102_vm9 = vcmp.eq.f32.partialorder %v4852_v28, inf }
 0x235   : > { %v2180_v20 = vpop.eup %2179  ;;  %1762 = vst [vmem:[%s3642_s4 + $0xf8] sm:$0xff] %v1698_v1  ;;  %v4906_v22 = vadd.f32 %v769_v32, %v5365_v23  ;;  %v681_v30 = vsel %vm618_vm1, %v615_v2, %v5366_v48  ;;  %v760_v62 = vsel %vm4609_vm13, %v625_v29, %v5367_v25  ;;  %v1521_v0 = vadd.f32 %v3274_v17, %v1162_v40 }
 0x236   : > { %v2182_v5 = vpop.eup %2181  ;;  %v1625_v21 = vmul.f32 %v2180_v20, %v1561_v6  ;;  %2191 = vrsqrt.f32 %v4901_v50  ;;  %vm1104_vm11 = vcmp.eq.f32.partialorder %v4852_v28, 0.0  ;;  %v1522_v51 = vadd.f32 %v3274_v17, %v1169_v47 }
 0x237   : > { %v2184_v26 = vpop.eup %2183  ;;  %v1626_v41 = vmul.f32 %v2182_v5, %v1562_v38  ;;  %2193 = vrsqrt.f32 %v4906_v22  ;;  %v1105_v7 = vand.u32 2147483648, %v4852_v28  ;;  %v761_v9 = vsel %vm4623_vm15, %v681_v30, %v5368_v55 }
 0x238   : > { %v2186_v8 = vpop.eup %2185  ;;  %v1689_v45 = vmul.f32 %v2265_v27, %v1625_v21  ;;  %v1101_v39 = vmul.f32 %v2184_v26, %v4852_v28  ;;  %v824_v49 = vadd.f32 %v760_v62, %v5369_v15  ;;  %vm1109_vm1 = vcmp.eq.f32.partialorder %v4856_v31, inf  ;;  %v2269_v62 = vld [vmem:[%s2508_s6 + $0x130] sm:$0xff] }
 0x239   : > { %v1690_v46 = vmul.f32 %v2266_v18, %v1626_v41  ;;  %v1108_v56 = vmul.f32 %v2186_v8, %v4856_v31  ;;  %vm1111_vm13 = vcmp.eq.f32.partialorder %v4856_v31, 0.0  ;;  %v1112_v13 = vand.u32 2147483648, %v4856_v31 }
 0x23a   : > { %1753 = vst [vmem:[%s3642_s4 + $0xb0] sm:$0xff] %v1689_v45  ;;  %v1103_v37 = vsel %vm1102_vm9, %v4852_v28, %v1101_v39  ;;  %v1585_v43 = vmax.f32 %v1521_v0, 0.0  ;;  %2195 = vrsqrt.f32 %v824_v49  ;;  %v4940_v40 = vadd.f32 %v761_v9, %v5370_v24  ;;  %v2267_v28 = vld [vmem:[%s2508_s6 + $0x170] sm:$0xff]  ;;  %v2270_v0 = vld [vmem:[%s2508_s6 + $0x138] sm:$0xff] }
 0x23b   : > { %1754 = vst [vmem:[%s3642_s4 + $0xb8] sm:$0xff] %v1690_v46  ;;  %v1106_v12 = vsel %vm1104_vm11, %v1105_v7, %v1103_v37  ;;  %v1110_v52 = vsel %vm1109_vm1, %v4856_v31, %v1108_v56  ;;  %v1586_v10 = vmax.f32 %v1522_v51, 0.0  ;;  %vm1270_vm15 = vcmp.eq.f32.partialorder %v4901_v50, inf }
 0x23c   : > { %v1113_v63 = vsel %vm1111_vm13, %v1112_v13, %v1110_v52  ;;  %v1320_v11 = vadd.f32 1e-06, %v1106_v12  ;;  %vm1272_vm12 = vcmp.eq.f32.partialorder %v4901_v50, 0.0  ;;  %v1273_v47 = vand.u32 2147483648, %v4901_v50  ;;  %v2271_v13 = vld [vmem:[%s2508_s6 + $0x1f0] sm:$0xff] }
 0x23d   : > { %v2188_v60 = vpop.eup %2187  ;;  %v1321_v44 = vadd.f32 1e-06, %v1113_v63  ;;  %v1513_v61 = vadd.f32 %v3274_v17, %v1106_v12  ;;  %vm1277_vm14 = vcmp.eq.f32.partialorder %v4906_v22, inf  ;;  %v1280_v1 = vand.u32 2147483648, %v4906_v22  ;;  %v2272_v12 = vld [vmem:[%s2508_s6 + $0x1f8] sm:$0xff] }
 0x23e   : > { %v1649_v3 = vmul.f32 %v2188_v60, %v1585_v43  ;;  %v2190_v36 = vpop.eup %2189  ;;  %2197 = vrcp.f32 %v1320_v11  ;;  %v1514_v16 = vadd.f32 %v3274_v17, %v1113_v63  ;;  %vm1279_vm0 = vcmp.eq.f32.partialorder %v4906_v22, 0.0 }
 0x23f   : > { %v1650_v53 = vmul.f32 %v2190_v36, %v1586_v10  ;;  %2199 = vrcp.f32 %v1321_v44  ;;  %v1577_v58 = vmax.f32 %v1513_v61, 0.0  ;;  %vm1214_vm10 = vcmp.eq.f32.partialorder %v824_v49, inf }
 0x240   : > { %v1713_v34 = vmul.f32 %v2267_v28, %v1649_v3  ;;  %v2192_v31 = vpop.eup %2191  ;;  %2201 = vrsqrt.f32 %v4940_v40  ;;  %v1578_v38 = vmax.f32 %v1514_v16, 0.0  ;;  %vm1216_vm4 = vcmp.eq.f32.partialorder %v824_v49, 0.0 }
 0x241   : > { %v2194_v2 = vpop.eup %2193  ;;  %v1714_v4 = vmul.f32 %v2268_v57, %v1650_v53  ;;  %v1269_v59 = vmul.f32 %v2192_v31, %v4901_v50  ;;  %vm1221_vm5 = vcmp.eq.f32.partialorder %v4940_v40, inf  ;;  %v1224_v45 = vand.u32 2147483648, %v4940_v40 }
 0x242   : > { %1777 = vst [vmem:[%s3642_s4 + $0x170] sm:$0xff] %v1713_v34  ;;  %v1276_v35 = vmul.f32 %v2194_v2, %v4906_v22  ;;  %vm1223_vm6 = vcmp.eq.f32.partialorder %v4940_v40, 0.0 }
 0x243   : > { %1778 = vst [vmem:[%s3642_s4 + $0x178] sm:$0xff] %v1714_v4  ;;  %v1271_v33 = vsel %vm1270_vm15, %v4901_v50, %v1269_v59  ;;  %v1217_v50 = vand.u32 2147483648, %v824_v49 }
 0x244   : > { %v1274_v42 = vsel %vm1272_vm12, %v1273_v47, %v1271_v33  ;;  %v1278_v54 = vsel %vm1277_vm14, %v4906_v22, %v1276_v35  ;;  %v2196_v14 = vpop.eup %2195 }
 0x245   : > { %v1281_v29 = vsel %vm1279_vm0, %v1280_v1, %v1278_v54  ;;  %v1344_v6 = vadd.f32 1e-06, %v1274_v42  ;;  %v1213_v32 = vmul.f32 %v2196_v14, %v824_v49  ;;  %v1537_v27 = vadd.f32 %v3274_v17, %v1274_v42 }
 0x246   : > { %v1345_v19 = vadd.f32 1e-06, %v1281_v29  ;;  %v1538_v51 = vadd.f32 %v3274_v17, %v1281_v29 }
 0x247   : > { %2203 = vrcp.f32 %v1344_v6  ;;  %v1215_v23 = vsel %vm1214_vm10, %v824_v49, %v1213_v32  ;;  %v1601_v46 = vmax.f32 %v1537_v27, 0.0 }
 0x248   : > { %v2198_v20 = vpop.eup %2197  ;;  %2205 = vrcp.f32 %v1345_v19  ;;  %v1218_v22 = vsel %vm1216_vm4, %v1217_v50, %v1215_v23  ;;  %v1602_v55 = vmax.f32 %v1538_v51, 0.0 }
 0x249   : > { %v2200_v5 = vpop.eup %2199  ;;  %v1641_v21 = vmul.f32 %v2198_v20, %v1577_v58  ;;  %v1336_v25 = vadd.f32 1e-06, %v1218_v22  ;;  %v1529_v9 = vadd.f32 %v3274_v17, %v1218_v22 }
 0x24a   : > { %v2202_v48 = vpop.eup %2201  ;;  %v1642_v30 = vmul.f32 %v2200_v5, %v1578_v38 }
 0x24b   : > { %v1705_v26 = vmul.f32 %v2269_v62, %v1641_v21  ;;  %v1220_v41 = vmul.f32 %v2202_v48, %v4940_v40  ;;  %2207 = vrcp.f32 %v1336_v25  ;;  %v1593_v60 = vmax.f32 %v1529_v9, 0.0 }
 0x24c   : > { %v1706_v8 = vmul.f32 %v2270_v0, %v1642_v30 }
 0x24d   : > { %1769 = vst [vmem:[%s3642_s4 + $0x130] sm:$0xff] %v1705_v26  ;;  %v1222_v39 = vsel %vm1221_vm5, %v4940_v40, %v1220_v41  ;;  %v2273_v40 = vld [vmem:[%s2508_s6 + $0x1b0] sm:$0xff] }
 0x24e   : > { %1770 = vst [vmem:[%s3642_s4 + $0x138] sm:$0xff] %v1706_v8  ;;  %v1225_v7 = vsel %vm1223_vm6, %v1224_v45, %v1222_v39 }
 0x24f   : > { %v1337_v18 = vadd.f32 1e-06, %v1225_v7  ;;  %v1530_v11 = vadd.f32 %v3274_v17, %v1225_v7  ;;  %v2274_v17 = vld [vmem:[%s2508_s6 + $0x1b8] sm:$0xff] }
 0x251   : > { %v2204_v56 = vpop.eup %2203  ;;  %2209 = vrcp.f32 %v1337_v18  ;;  %v1594_v3 = vmax.f32 %v1530_v11, 0.0 }
 0x252   : > { %v2206_v15 = vpop.eup %2205  ;;  %v1665_v49 = vmul.f32 %v2204_v56, %v1601_v46 }
 0x253   : > { %v1666_v37 = vmul.f32 %v2206_v15, %v1602_v55 }
 0x254   : > { %v1729_v43 = vmul.f32 %v2271_v13, %v1665_v49 }
 0x255   : > { %v1730_v52 = vmul.f32 %v2272_v12, %v1666_v37  ;;  %v2208_v63 = vpop.eup %2207 }
 0x256   : > { %1793 = vst [vmem:[%s3642_s4 + $0x1f0] sm:$0xff] %v1729_v43  ;;  %v1657_v24 = vmul.f32 %v2208_v63, %v1593_v60 }
 0x257   : > { %1794 = vst [vmem:[%s3642_s4 + $0x1f8] sm:$0xff] %v1730_v52 }
 0x258   : > { %v1721_v10 = vmul.f32 %v2273_v40, %v1657_v24 }
 0x25a   : > { %1785 = vst [vmem:[%s3642_s4 + $0x1b0] sm:$0xff] %v1721_v10 }
 0x25b   : > { %v2210_v44 = vpop.eup %2209 }
 0x25c   : > { %v1658_v36 = vmul.f32 %v2210_v44, %v1594_v3 }
 0x25e   : > { %v1722_v53 = vmul.f32 %v2274_v17, %v1658_v36 }
 0x260   : > { %1786 = vst [vmem:[%s3642_s4 + $0x1b8] sm:$0xff] %v1722_v53 }
 0x261   : > { %2318 = shalt.err (!%p2315_p1)
}
 0x262   : > { %s2319_s24 = scalar_lea.hbm %s4983_s10, 8192  ;;  %s2323_s28 = scalar_lea.hbm %s5032_s2, 32768 }
 0x263   : > { %p2320_p3 = scmp.ne.s32.totalorder %s4983_s10, %s2319_s24  ;;  %p2324_p0 = scmp.lt.u32.totalorder %s4983_s10, %s5032_s2 }
 0x264   : > { %p2325_p2 = scmp.lt.u32.totalorder %s2323_s28, %s2319_s24  ;;  %p2327_p6 = scmp.lt.u32.totalorder %s2319_s24, %s4983_s10 }
 0x265   : > { %p2321_p4 = pnand %p2320_p3, %p5371_p10 }
 0x266   : > { %p2326_p7 = por %p2325_p2, %p2324_p0 }
 0x267   : > { %p2322_p5 = pneg %p2321_p4 }
 0x268   : > { %p2328_p11 = por %p2327_p6, %p2326_p7 }
 0x26a   : > { %p2329_p12 = pnand %p2328_p11, %p2322_p5 }
 0x26c   : > { %2332 = shalt.err (!%p2329_p12)
}
 0x26d   : > { %s2379_s29 = smov 1024   ;;  %s2380_s21 = smov 64  }
 0x26e   : > { %1905 = dma.vmem_to_hbm [thread:$0]  (%p5371_p10), %s4985_s7, 8192, %s4983_s10, %s1796_s15, %s2379_s29, %s2379_s29, %s2380_s21  }
 0x26f PF: > { %p1916_p8 = scmp.ge.s32.totalorder %s2371_s14, 2  ;;  %s1825_s3 = sand.u32 1, %s2359_s11  }
 0x270   : > { %p5372_p9 = scmp.ne.s32.totalorder %s5121_s23, 0  ;;  %s1826_s4 = scalar_lea.sflag [#allocation5], %s1825_s3 }
 0x272   : > { %p1912_p13 = pnand %p1916_p8, %p5372_p9 }
 0x274   : > { %2354 = dma.done.wait (!%p1912_p13), %s1826_s4, 8192  }
 0x275   : > { %2356 = vsyncadd (!%p1912_p13), %s1826_s4, 4294959104  ;;  %p16_p1 = scmp.ge.s32.totalorder %s2424_s16, 6   ;;  %s5373_s11 = smov %s2363_s12 }
 0x276   : > { %s5374_s12 = smov %s2367_s13  ;;  %s5375_s13 = smov %s2436_s19 }
 0x277   : > { %s5376_s14 = smov %s2424_s16  ;;  %18 = sbr.rel (!%p16_p1) target bundleno = 7 (0x7), region = 73 }
 0x27e   :  { %1831 = vsyncpa [#allocation4], 1 }
 0x27f   :  { %1833 = vsyncpa [#allocation4 + $0x1], 1 }
 0x280   :  { %1834 = vsyncpa [#allocation5], 1 }
 0x281   :  { %1836 = vsyncpa [#allocation5 + $0x1], 1 }

</bundles_post_ra>
